<compile_context>
chip_gen: v7x
topology: tpu7x:2x2x1
jax: 0.10.0
libtpu: 0.0.40
codegen_flags: <defaults>
</compile_context>

<pallas_src>
import functools
from math import pi as PI, log as _pylog

import jax
import jax.numpy as jnp
from jax.experimental import pallas as pl
from jax.experimental.pallas import tpu as pltpu

TWO_PI = 2.0 * PI
INV_2PI = 1.0 / TWO_PI
_EPS_T = 1e-6
_LOG2 = _pylog(2.0)
_LANE = 128


# --------------------------------------------------------------------------
# small helpers (usable both inside the kernel and in the pure-JAX reference)
# --------------------------------------------------------------------------
def mod_2pi(x):
    return x - TWO_PI * jnp.floor(x * INV_2PI)


def _softplus(x):
    return jnp.maximum(x, 0.0) + jnp.log(1.0 + jnp.exp(-jnp.abs(x)))


# --------------------------------------------------------------------------
# Pallas kernel: one grid step processes one lane-dense batch tile and runs
# the full autoregressive site loop in-kernel.
# --------------------------------------------------------------------------
def _flow_kernel(z_ref, *rest, n_layers, n_sites, n_mixture, weighted,
                 min_weight, ramp_pow):
    K = n_mixture
    w0c0_ref = rest[0]                              # (S, H0, 1) layer-0 col 0
    w0c1_ref = rest[1]                              # (S, H0, 1) layer-0 col 1
    w_refs = rest[2:2 + (n_layers - 1)]             # hidden/output weights
    b_refs = rest[2 + (n_layers - 1):1 + 2 * n_layers]   # all biases
    phi_ref = rest[1 + 2 * n_layers]                # (L, Bt) output
    ldj_ref = rest[2 + 2 * n_layers]                # (1, Bt) output

    # hoisted Python-constant scales
    a_scale = ramp_pow / _LOG2
    w_scale = 1.0 - K * min_weight
    inv_k = 1.0 / K

    phi0 = z_ref[0:1, :]                            # (1, Bt) = phi_0
    phi_ref[0:1, :] = phi0
    phi_prev = phi0
    ldj = jnp.zeros_like(phi0)

    # Statically unrolled site loop (n_sites = L-1 is small here).
    # TODO(synk): for large lattices switch to lax.fori_loop with dynamic
    #             first-axis indexing of the stacked weight refs.
    for x in range(n_sites):
        # Sum_j (phi_{j+1}-phi_j) telescopes exactly to phi_{x-1} - phi_0.
        sum_u = phi_prev - phi0
        cos_u = jnp.cos(sum_u)
        sin_u = jnp.sin(sum_u)

        # Layer 0 (d_in == 2): rank-2 VPU update, no concat / column slices.
        act = w0c0_ref[x] * cos_u + w0c1_ref[x] * sin_u + b_refs[0][x]
        if n_layers > 1:
            act = jnp.tanh(act)
        for l in range(1, n_layers):
            act = jnp.dot(w_refs[l - 1][x], act,
                          preferred_element_type=jnp.float32) + b_refs[l][x]
            if l < n_layers - 1:
                act = jnp.tanh(act)

        raw_a = act[0:K, :]                         # (K, Bt) log-scales
        raw_b = act[K:2 * K, :]                     # (K, Bt) shifts
        a = a_scale * _softplus(raw_a)              # > 0; == ramp_pow at 0

        z_x = z_ref[x + 1:x + 2, :]                 # (1, Bt)
        V = mod_2pi(z_x - phi_prev)                 # (1, Bt) in [0, 2pi)
        t = jnp.clip(V * INV_2PI, _EPS_T, 1.0 - _EPS_T)
        log_t = jnp.log(t)
        log_1mt = jnp.log(1.0 - t)
        logit_t = log_t - log_1mt

        u = a * logit_t + raw_b                     # (K, Bt)
        g = 1.0 / (1.0 + jnp.exp(-u))               # ramp-power sigmoid comps
        dg = a * g * (1.0 - g)

        if weighted:
            raw_w = act[2 * K:3 * K, :]
            m = jnp.max(raw_w, axis=0, keepdims=True)
            e = jnp.exp(raw_w - m)
            sm = e / jnp.sum(e, axis=0, keepdims=True)
            w = min_weight + w_scale * sm
            g_mix = jnp.sum(w * g, axis=0, keepdims=True)         # (1, Bt)
            num = jnp.sum(w * dg, axis=0, keepdims=True)          # (1, Bt)
        else:
            g_mix = inv_k * jnp.sum(g, axis=0, keepdims=True)
            num = inv_k * jnp.sum(dg, axis=0, keepdims=True)

        phi_x = mod_2pi(TWO_PI * g_mix + phi_prev)
        # log dU/dV = log(num) - log t - log(1-t): reuse logs from logit_t.
        ldj = ldj + (jnp.log(jnp.maximum(num, 1e-30)) - log_t - log_1mt)

        phi_ref[x + 1:x + 2, :] = phi_x
        phi_prev = phi_x

    ldj_ref[...] = ldj


# --------------------------------------------------------------------------
# Wrapper
# --------------------------------------------------------------------------
def autoregressive_flow_forward(z, weights, biases, *, n_mixture, weighted,
                                min_weight, ramp_pow, batch_tile=512):
    """z: (B, L, 1) angles.  Returns (phi: (B, L, 1), ldj_total: (B, 1, 1))."""
    B, L, _ = z.shape
    S = L - 1
    n_layers = len(weights)

    # (L, B) layout: sites on sublanes, batch on lanes; pad lanes to 128-mult.
    z_lb = jnp.transpose(z[..., 0], (1, 0)).astype(jnp.float32)    # (L, B)
    b_pad = ((B + _LANE - 1) // _LANE) * _LANE
    bt = min(b_pad, batch_tile)
    b_pad = ((b_pad + bt - 1) // bt) * bt
    z_lb = jnp.pad(z_lb, ((0, 0), (0, b_pad - B)))
    n_tiles = b_pad // bt

    # Pre-split the layer-0 (d_in == 2) weight columns; everything resident.
    w0 = weights[0].astype(jnp.float32)                            # (S, H0, 2)
    w0c0 = w0[:, :, 0:1]
    w0c1 = w0[:, :, 1:2]
    w_rest = [w.astype(jnp.float32) for w in weights[1:]]
    b_all = [b.astype(jnp.float32) for b in biases]

    kernel = functools.partial(
        _flow_kernel, n_layers=n_layers, n_sites=S, n_mixture=n_mixture,
        weighted=weighted, min_weight=min_weight, ramp_pow=ramp_pow)

    def _resident(arr):
        nd = arr.ndim
        return pl.BlockSpec(arr.shape, lambda b, _nd=nd: (0,) * _nd)

    in_specs = [pl.BlockSpec((L, bt), lambda b: (0, b)),           # z tile
                _resident(w0c0), _resident(w0c1)]
    in_specs += [_resident(w) for w in w_rest]
    in_specs += [_resident(bb) for bb in b_all]

    out_specs = [pl.BlockSpec((L, bt), lambda b: (0, b)),          # phi
                 pl.BlockSpec((1, bt), lambda b: (0, b))]          # ldj
    out_shape = [jax.ShapeDtypeStruct((L, b_pad), jnp.float32),
                 jax.ShapeDtypeStruct((1, b_pad), jnp.float32)]

    phi_lb, ldj_1b = pl.pallas_call(
        kernel,
        grid_spec=pltpu.PrefetchScalarGridSpec(
            num_scalar_prefetch=0,
            grid=(n_tiles,),
            in_specs=in_specs,
            out_specs=out_specs),
        out_shape=out_shape,
        compiler_params=pltpu.CompilerParams(
            dimension_semantics=("parallel",)),
    )(z_lb, w0c0, w0c1, *w_rest, *b_all)

    phi = jnp.transpose(phi_lb[:, :B], (1, 0))[..., None]          # (B, L, 1)
    ldj = jnp.transpose(ldj_1b[:, :B], (1, 0))[..., None]          # (B, 1, 1)
    return phi, ldj


# --------------------------------------------------------------------------
# Pure-JAX reference (same math, literal torch-style loop) for validation
# --------------------------------------------------------------------------
def reference_forward(z, weights, biases, *, n_mixture, weighted,
                      min_weight, ramp_pow):
    B, L, _ = z.shape
    K = n_mixture
    nl = len(weights)
    phi = z[:, 0:1, :].astype(jnp.float32)                          # (B,1,1)
    ldj_total = jnp.zeros((B, 1, 1), jnp.float32)
    for x in range(1, L):
        diffs = phi[:, 1:, :] - phi[:, :-1, :]
        sum_u = jnp.sum(jnp.transpose(diffs, (0, 2, 1)),
                        axis=-1, keepdims=True)                     # (B,1,1)
        ctx = jnp.concatenate([jnp.cos(sum_u), jnp.sin(sum_u)],
                              axis=-1)[:, 0, :]                     # (B,2)
        act = ctx
        for l in range(nl):
            W = weights[l][x - 1]                                   # (dout,din)
            b = biases[l][x - 1][:, 0]                              # (dout,)
            act = act @ W.T + b
            if l < nl - 1:
                act = jnp.tanh(act)
        raw_a = act[:, :K]
        raw_b = act[:, K:2 * K]
        a = (ramp_pow / _LOG2) * _softplus(raw_a)
        if weighted:
            raw_w = act[:, 2 * K:3 * K]
            m = jnp.max(raw_w, axis=-1, keepdims=True)
            e = jnp.exp(raw_w - m)
            sm = e / jnp.sum(e, axis=-1, keepdims=True)
            w = min_weight + (1.0 - K * min_weight) * sm
        else:
            w = jnp.full_like(raw_a, 1.0 / K)
        phi_prev = phi[:, -1:, :]                                   # (B,1,1)
        V = mod_2pi(z[:, x:x + 1, :] - phi_prev)
        t = jnp.clip(V[:, 0, :] * INV_2PI, _EPS_T, 1.0 - _EPS_T)    # (B,1)
        logit_t = jnp.log(t) - jnp.log(1.0 - t)
        u = a * logit_t + raw_b
        g = 1.0 / (1.0 + jnp.exp(-u))
        g_mix = jnp.sum(w * g, axis=-1, keepdims=True)              # (B,1)
        dgdt = jnp.sum(w * a * g * (1.0 - g), axis=-1,
                       keepdims=True) / (t * (1.0 - t))
        U = TWO_PI * g_mix
        phi_x = mod_2pi(U[:, :, None] + phi_prev)
        phi = jnp.concatenate([phi, phi_x], axis=1)
        ldj_total = ldj_total + jnp.log(jnp.maximum(dgdt, 1e-30))[:, :, None]
    return phi, ldj_total


# --------------------------------------------------------------------------
# Deterministic parameter initialisation (per-site MLPs, stacked over sites)
# --------------------------------------------------------------------------
def init_params(key, lattice_size, n_mixture, net_shape, weighted):
    P = (3 if weighted else 2) * n_mixture
    dims = [2] + list(net_shape) + [P]
    S = lattice_size - 1
    weights, biases = [], []
    for l in range(len(dims) - 1):
        key, kw, kb = jax.random.split(key, 3)
        scale = 0.5 / float(dims[l]) ** 0.5
        W = scale * jax.random.normal(kw, (S, dims[l + 1], dims[l]),
                                      jnp.float32)
        b = 0.1 * jax.random.normal(kb, (S, dims[l + 1], 1), jnp.float32)
        weights.append(W)
        biases.append(b)
    return weights, biases


if __name__ == "__main__":
    B = 8             # batch
    L = 8             # lattice_size
    K = 4             # n_mixture
    net_shape = [32]  # hidden widths
    weighted, min_weight, ramp_pow = True, 0.01, 2

    key = jax.random.PRNGKey(0)
    k_z, k_p = jax.random.split(key)
    z = jax.random.uniform(k_z, (B, L, 1), jnp.float32, 0.0, TWO_PI)
    weights, biases = init_params(k_p, L, K, net_shape, weighted)

    phi, ldj = autoregressive_flow_forward(
        z, weights, biases, n_mixture=K, weighted=weighted,
        min_weight=min_weight, ramp_pow=ramp_pow)
    jax.block_until_ready((phi, ldj))

    phi_ref, ldj_ref = reference_forward(
        z, weights, biases, n_mixture=K, weighted=weighted,
        min_weight=min_weight, ramp_pow=ramp_pow)

    assert phi.shape == (B, L, 1) and ldj.shape == (B, 1, 1)
    assert bool(jnp.all(jnp.isfinite(phi))) and bool(jnp.all(jnp.isfinite(ldj)))
    # compare angles on the circle (wrap-aware)
    dphi = jnp.abs(phi - phi_ref)
    dphi = jnp.minimum(dphi, TWO_PI - dphi)
    assert float(jnp.max(dphi)) < 5e-3, f"phi mismatch {float(jnp.max(dphi))}"
    dldj = float(jnp.max(jnp.abs(ldj - ldj_ref)))
    assert dldj < 5e-3, f"ldj mismatch {dldj}"

    print("KERNEL_OK")
</pallas_src>

<mosaic_0001>
module attributes {stable_mosaic.version = 11 : i64} {
  func.func @_flow_kernel(%arg0: i32, %arg1: memref<8x128xf32, #tpu.memory_space<vmem>>, %arg2: memref<7x32x1xf32, #tpu.memory_space<vmem>>, %arg3: memref<7x32x1xf32, #tpu.memory_space<vmem>>, %arg4: memref<7x12x32xf32, #tpu.memory_space<vmem>>, %arg5: memref<7x32x1xf32, #tpu.memory_space<vmem>>, %arg6: memref<7x12x1xf32, #tpu.memory_space<vmem>>, %arg7: memref<8x128xf32, #tpu.memory_space<vmem>>, %arg8: memref<1x128xf32, #tpu.memory_space<vmem>>) attributes {dimension_semantics = [#tpu.dimension_semantics<parallel>], iteration_bounds = array<i64: 1>, scalar_prefetch = 0 : i64, scratch_operands = 0 : i64, tpu.core_type = #tpu.core_type<tc>, window_params = [{transform_indices = @transform_0, window_bounds = array<i64: 8, 128>}, {pipeline_mode = #tpu.pipeline_mode<synchronous>, transform_indices = @transform_1, window_bounds = array<i64: 7, 32, 1>}, {pipeline_mode = #tpu.pipeline_mode<synchronous>, transform_indices = @transform_2, window_bounds = array<i64: 7, 32, 1>}, {pipeline_mode = #tpu.pipeline_mode<synchronous>, transform_indices = @transform_3, window_bounds = array<i64: 7, 12, 32>}, {pipeline_mode = #tpu.pipeline_mode<synchronous>, transform_indices = @transform_4, window_bounds = array<i64: 7, 32, 1>}, {pipeline_mode = #tpu.pipeline_mode<synchronous>, transform_indices = @transform_5, window_bounds = array<i64: 7, 12, 1>}, {transform_indices = @transform_6, window_bounds = array<i64: 8, 128>}, {transform_indices = @transform_7, window_bounds = array<i64: 1, 128>}]} {
    %c0 = arith.constant 0 : index
    %c0_0 = arith.constant 0 : index
    %0 = vector.load %arg1[%c0, %c0_0] : memref<8x128xf32, #tpu.memory_space<vmem>>, vector<1x128xf32>
    %c0_1 = arith.constant 0 : index
    %c0_2 = arith.constant 0 : index
    %1 = vector.load %arg7[%c0_1, %c0_2] : memref<8x128xf32, #tpu.memory_space<vmem>>, vector<1x128xf32>
    tpu.vector_store %arg7[%c0_1, %c0_2], %0 {strides = array<i32>} : memref<8x128xf32, #tpu.memory_space<vmem>>, vector<1x128xf32>,
    %cst = arith.constant 0.000000e+00 : f32
    %2 = vector.broadcast %cst : f32 to vector<1x128xf32>
    %3 = arith.subf %0, %0 : vector<1x128xf32>
    %4 = math.cos %3 : vector<1x128xf32>
    %5 = math.sin %3 : vector<1x128xf32>
    %c0_3 = arith.constant 0 : index
    %c0_4 = arith.constant 0 : index
    %c0_5 = arith.constant 0 : index
    %6 = vector.load %arg2[%c0_3, %c0_4, %c0_5] : memref<7x32x1xf32, #tpu.memory_space<vmem>>, vector<1x32x1xf32>
    %7 = vector.shape_cast %6 : vector<1x32x1xf32> to vector<32x1xf32>
    %8 = vector.broadcast %7 : vector<32x1xf32> to vector<32x128xf32>
    %9 = vector.broadcast %4 : vector<1x128xf32> to vector<32x128xf32>
    %10 = arith.mulf %8, %9 : vector<32x128xf32>
    %c0_6 = arith.constant 0 : index
    %c0_7 = arith.constant 0 : index
    %c0_8 = arith.constant 0 : index
    %11 = vector.load %arg3[%c0_6, %c0_7, %c0_8] : memref<7x32x1xf32, #tpu.memory_space<vmem>>, vector<1x32x1xf32>
    %12 = vector.shape_cast %11 : vector<1x32x1xf32> to vector<32x1xf32>
    %13 = vector.broadcast %12 : vector<32x1xf32> to vector<32x128xf32>
    %14 = vector.broadcast %5 : vector<1x128xf32> to vector<32x128xf32>
    %15 = arith.mulf %13, %14 : vector<32x128xf32>
    %16 = arith.addf %10, %15 : vector<32x128xf32>
    %c0_9 = arith.constant 0 : index
    %c0_10 = arith.constant 0 : index
    %c0_11 = arith.constant 0 : index
    %17 = vector.load %arg5[%c0_9, %c0_10, %c0_11] : memref<7x32x1xf32, #tpu.memory_space<vmem>>, vector<1x32x1xf32>
    %18 = vector.shape_cast %17 : vector<1x32x1xf32> to vector<32x1xf32>
    %19 = vector.broadcast %18 : vector<32x1xf32> to vector<32x128xf32>
    %20 = arith.addf %16, %19 : vector<32x128xf32>
    %21 = math.tanh %20 : vector<32x128xf32>
    %c0_12 = arith.constant 0 : index
    %c0_13 = arith.constant 0 : index
    %c0_14 = arith.constant 0 : index
    %22 = vector.load %arg4[%c0_12, %c0_13, %c0_14] : memref<7x12x32xf32, #tpu.memory_space<vmem>>, vector<1x12x32xf32>
    %23 = vector.shape_cast %22 : vector<1x12x32xf32> to vector<12x32xf32>
    %cst_15 = arith.constant dense<0.000000e+00> : vector<12x128xf32>
    %24 = tpu.matmul %23, %21, %cst_15 {dimension_numbers = #tpu.dot_dimension_numbers<[1], [0], [0], [1], [0, 0, 1, 1], [], []>} : vector<12x32xf32>, vector<32x128xf32>, vector<12x128xf32> -> vector<12x128xf32>
    %c0_16 = arith.constant 0 : index
    %c0_17 = arith.constant 0 : index
    %c0_18 = arith.constant 0 : index
    %25 = vector.load %arg6[%c0_16, %c0_17, %c0_18] : memref<7x12x1xf32, #tpu.memory_space<vmem>>, vector<1x12x1xf32>
    %26 = vector.shape_cast %25 : vector<1x12x1xf32> to vector<12x1xf32>
    %27 = vector.broadcast %26 : vector<12x1xf32> to vector<12x128xf32>
    %28 = arith.addf %24, %27 : vector<12x128xf32>
    %29 = vector.extract_strided_slice %28 {offsets = [0, 0], sizes = [4, 128], strides = [1, 1]} : vector<12x128xf32> to vector<4x128xf32>
    %30 = vector.extract_strided_slice %28 {offsets = [4, 0], sizes = [4, 128], strides = [1, 1]} : vector<12x128xf32> to vector<4x128xf32>
    %cst_19 = arith.constant 0.000000e+00 : f32
    %31 = vector.broadcast %cst_19 : f32 to vector<4x128xf32>
    %32 = arith.maximumf %29, %31 : vector<4x128xf32>
    %33 = math.absf %29 : vector<4x128xf32>
    %cst_20 = arith.constant 0.000000e+00 : f32
    %34 = vector.broadcast %cst_20 : f32 to vector<4x128xf32>
    %35 = arith.subf %34, %33 : vector<4x128xf32>
    %36 = math.exp %35 : vector<4x128xf32>
    %cst_21 = arith.constant 1.000000e+00 : f32
    %37 = vector.broadcast %cst_21 : f32 to vector<4x128xf32>
    %38 = arith.addf %37, %36 : vector<4x128xf32>
    %39 = math.log %38 : vector<4x128xf32>
    %40 = arith.addf %32, %39 : vector<4x128xf32>
    %cst_22 = arith.constant 2.885390e+00 : f32
    %41 = vector.broadcast %cst_22 : f32 to vector<4x128xf32>
    %42 = arith.mulf %41, %40 : vector<4x128xf32>
    %c1 = arith.constant 1 : index
    %c0_23 = arith.constant 0 : index
    %43 = vector.load %arg1[%c1, %c0_23] : memref<8x128xf32, #tpu.memory_space<vmem>>, vector<1x128xf32>
    %44 = arith.subf %43, %0 : vector<1x128xf32>
    %cst_24 = arith.constant 0.159154937 : f32
    %45 = vector.broadcast %cst_24 : f32 to vector<1x128xf32>
    %46 = arith.mulf %44, %45 : vector<1x128xf32>
    %47 = math.floor %46 : vector<1x128xf32>
    %cst_25 = arith.constant 6.28318548 : f32
    %48 = vector.broadcast %cst_25 : f32 to vector<1x128xf32>
    %49 = arith.mulf %48, %47 : vector<1x128xf32>
    %50 = arith.subf %44, %49 : vector<1x128xf32>
    %cst_26 = arith.constant 0.159154937 : f32
    %51 = vector.broadcast %cst_26 : f32 to vector<1x128xf32>
    %52 = arith.mulf %50, %51 : vector<1x128xf32>
    %cst_27 = arith.constant 9.99999997E-7 : f32
    %cst_28 = arith.constant 0.999998986 : f32
    %53 = vector.broadcast %cst_27 : f32 to vector<1x128xf32>
    %54 = arith.maximumf %53, %52 : vector<1x128xf32>
    %55 = vector.broadcast %cst_28 : f32 to vector<1x128xf32>
    %56 = arith.minimumf %55, %54 : vector<1x128xf32>
    %57 = math.log %56 : vector<1x128xf32>
    %cst_29 = arith.constant 1.000000e+00 : f32
    %58 = vector.broadcast %cst_29 : f32 to vector<1x128xf32>
    %59 = arith.subf %58, %56 : vector<1x128xf32>
    %60 = math.log %59 : vector<1x128xf32>
    %61 = arith.subf %57, %60 : vector<1x128xf32>
    %62 = vector.broadcast %61 : vector<1x128xf32> to vector<4x128xf32>
    %63 = arith.mulf %42, %62 : vector<4x128xf32>
    %64 = arith.addf %63, %30 : vector<4x128xf32>
    %cst_30 = arith.constant 0.000000e+00 : f32
    %65 = vector.broadcast %cst_30 : f32 to vector<4x128xf32>
    %66 = arith.subf %65, %64 : vector<4x128xf32>
    %67 = math.exp %66 : vector<4x128xf32>
    %cst_31 = arith.constant 1.000000e+00 : f32
    %68 = vector.broadcast %cst_31 : f32 to vector<4x128xf32>
    %69 = arith.addf %68, %67 : vector<4x128xf32>
    %cst_32 = arith.constant 1.000000e+00 : f32
    %70 = vector.broadcast %cst_32 : f32 to vector<4x128xf32>
    %71 = arith.divf %70, %69 : vector<4x128xf32>
    %72 = arith.mulf %42, %71 : vector<4x128xf32>
    %cst_33 = arith.constant 1.000000e+00 : f32
    %73 = vector.broadcast %cst_33 : f32 to vector<4x128xf32>
    %74 = arith.subf %73, %71 : vector<4x128xf32>
    %75 = arith.mulf %72, %74 : vector<4x128xf32>
    %76 = vector.extract_strided_slice %28 {offsets = [8, 0], sizes = [4, 128], strides = [1, 1]} : vector<12x128xf32> to vector<4x128xf32>
    %cst_34 = arith.constant dense<0xFF800000> : vector<128xf32>
    %77 = vector.multi_reduction <maximumf>, %76, %cst_34 [0] : vector<4x128xf32> to vector<128xf32>
    %78 = vector.shape_cast %77 : vector<128xf32> to vector<1x128xf32>
    %79 = vector.broadcast %78 : vector<1x128xf32> to vector<4x128xf32>
    %80 = arith.subf %76, %79 : vector<4x128xf32>
    %81 = math.exp %80 : vector<4x128xf32>
    %cst_35 = arith.constant dense<0.000000e+00> : vector<128xf32>
    %82 = vector.multi_reduction <add>, %81, %cst_35 [0] : vector<4x128xf32> to vector<128xf32>
    %83 = vector.shape_cast %82 : vector<128xf32> to vector<1x128xf32>
    %84 = vector.broadcast %83 : vector<1x128xf32> to vector<4x128xf32>
    %85 = arith.divf %81, %84 : vector<4x128xf32>
    %cst_36 = arith.constant 0.959999978 : f32
    %86 = vector.broadcast %cst_36 : f32 to vector<4x128xf32>
    %87 = arith.mulf %86, %85 : vector<4x128xf32>
    %cst_37 = arith.constant 0.00999999977 : f32
    %88 = vector.broadcast %cst_37 : f32 to vector<4x128xf32>
    %89 = arith.addf %88, %87 : vector<4x128xf32>
    %90 = arith.mulf %89, %71 : vector<4x128xf32>
    %cst_38 = arith.constant dense<0.000000e+00> : vector<128xf32>
    %91 = vector.multi_reduction <add>, %90, %cst_38 [0] : vector<4x128xf32> to vector<128xf32>
    %92 = vector.shape_cast %91 : vector<128xf32> to vector<1x128xf32>
    %93 = arith.mulf %89, %75 : vector<4x128xf32>
    %cst_39 = arith.constant dense<0.000000e+00> : vector<128xf32>
    %94 = vector.multi_reduction <add>, %93, %cst_39 [0] : vector<4x128xf32> to vector<128xf32>
    %95 = vector.shape_cast %94 : vector<128xf32> to vector<1x128xf32>
    %cst_40 = arith.constant 6.28318548 : f32
    %96 = vector.broadcast %cst_40 : f32 to vector<1x128xf32>
    %97 = arith.mulf %96, %92 : vector<1x128xf32>
    %98 = arith.addf %97, %0 : vector<1x128xf32>
    %cst_41 = arith.constant 0.159154937 : f32
    %99 = vector.broadcast %cst_41 : f32 to vector<1x128xf32>
    %100 = arith.mulf %98, %99 : vector<1x128xf32>
    %101 = math.floor %100 : vector<1x128xf32>
    %cst_42 = arith.constant 6.28318548 : f32
    %102 = vector.broadcast %cst_42 : f32 to vector<1x128xf32>
    %103 = arith.mulf %102, %101 : vector<1x128xf32>
    %104 = arith.subf %98, %103 : vector<1x128xf32>
    %cst_43 = arith.constant 1.000000e-30 : f32
    %105 = vector.broadcast %cst_43 : f32 to vector<1x128xf32>
    %106 = arith.maximumf %95, %105 : vector<1x128xf32>
    %107 = math.log %106 : vector<1x128xf32>
    %108 = arith.subf %107, %57 : vector<1x128xf32>
    %109 = arith.subf %108, %60 : vector<1x128xf32>
    %110 = arith.addf %2, %109 : vector<1x128xf32>
    %c1_44 = arith.constant 1 : index
    %c0_45 = arith.constant 0 : index
    %111 = vector.load %arg7[%c1_44, %c0_45] : memref<8x128xf32, #tpu.memory_space<vmem>>, vector<1x128xf32>
    tpu.vector_store %arg7[%c1_44, %c0_45], %104 {strides = array<i32>} : memref<8x128xf32, #tpu.memory_space<vmem>>, vector<1x128xf32>,
    %112 = arith.subf %104, %0 : vector<1x128xf32>
    %113 = math.cos %112 : vector<1x128xf32>
    %114 = math.sin %112 : vector<1x128xf32>
    %c1_46 = arith.constant 1 : index
    %c0_47 = arith.constant 0 : index
    %c0_48 = arith.constant 0 : index
    %115 = vector.load %arg2[%c1_46, %c0_47, %c0_48] : memref<7x32x1xf32, #tpu.memory_space<vmem>>, vector<1x32x1xf32>
    %116 = vector.shape_cast %115 : vector<1x32x1xf32> to vector<32x1xf32>
    %117 = vector.broadcast %116 : vector<32x1xf32> to vector<32x128xf32>
    %118 = vector.broadcast %113 : vector<1x128xf32> to vector<32x128xf32>
    %119 = arith.mulf %117, %118 : vector<32x128xf32>
    %c1_49 = arith.constant 1 : index
    %c0_50 = arith.constant 0 : index
    %c0_51 = arith.constant 0 : index
    %120 = vector.load %arg3[%c1_49, %c0_50, %c0_51] : memref<7x32x1xf32, #tpu.memory_space<vmem>>, vector<1x32x1xf32>
    %121 = vector.shape_cast %120 : vector<1x32x1xf32> to vector<32x1xf32>
    %122 = vector.broadcast %121 : vector<32x1xf32> to vector<32x128xf32>
    %123 = vector.broadcast %114 : vector<1x128xf32> to vector<32x128xf32>
    %124 = arith.mulf %122, %123 : vector<32x128xf32>
    %125 = arith.addf %119, %124 : vector<32x128xf32>
    %c1_52 = arith.constant 1 : index
    %c0_53 = arith.constant 0 : index
    %c0_54 = arith.constant 0 : index
    %126 = vector.load %arg5[%c1_52, %c0_53, %c0_54] : memref<7x32x1xf32, #tpu.memory_space<vmem>>, vector<1x32x1xf32>
    %127 = vector.shape_cast %126 : vector<1x32x1xf32> to vector<32x1xf32>
    %128 = vector.broadcast %127 : vector<32x1xf32> to vector<32x128xf32>
    %129 = arith.addf %125, %128 : vector<32x128xf32>
    %130 = math.tanh %129 : vector<32x128xf32>
    %c1_55 = arith.constant 1 : index
    %c0_56 = arith.constant 0 : index
    %c0_57 = arith.constant 0 : index
    %131 = vector.load %arg4[%c1_55, %c0_56, %c0_57] : memref<7x12x32xf32, #tpu.memory_space<vmem>>, vector<1x12x32xf32>
    %132 = vector.shape_cast %131 : vector<1x12x32xf32> to vector<12x32xf32>
    %cst_58 = arith.constant dense<0.000000e+00> : vector<12x128xf32>
    %133 = tpu.matmul %132, %130, %cst_58 {dimension_numbers = #tpu.dot_dimension_numbers<[1], [0], [0], [1], [0, 0, 1, 1], [], []>} : vector<12x32xf32>, vector<32x128xf32>, vector<12x128xf32> -> vector<12x128xf32>
    %c1_59 = arith.constant 1 : index
    %c0_60 = arith.constant 0 : index
    %c0_61 = arith.constant 0 : index
    %134 = vector.load %arg6[%c1_59, %c0_60, %c0_61] : memref<7x12x1xf32, #tpu.memory_space<vmem>>, vector<1x12x1xf32>
    %135 = vector.shape_cast %134 : vector<1x12x1xf32> to vector<12x1xf32>
    %136 = vector.broadcast %135 : vector<12x1xf32> to vector<12x128xf32>
    %137 = arith.addf %133, %136 : vector<12x128xf32>
    %138 = vector.extract_strided_slice %137 {offsets = [0, 0], sizes = [4, 128], strides = [1, 1]} : vector<12x128xf32> to vector<4x128xf32>
    %139 = vector.extract_strided_slice %137 {offsets = [4, 0], sizes = [4, 128], strides = [1, 1]} : vector<12x128xf32> to vector<4x128xf32>
    %cst_62 = arith.constant 0.000000e+00 : f32
    %140 = vector.broadcast %cst_62 : f32 to vector<4x128xf32>
    %141 = arith.maximumf %138, %140 : vector<4x128xf32>
    %142 = math.absf %138 : vector<4x128xf32>
    %cst_63 = arith.constant 0.000000e+00 : f32
    %143 = vector.broadcast %cst_63 : f32 to vector<4x128xf32>
    %144 = arith.subf %143, %142 : vector<4x128xf32>
    %145 = math.exp %144 : vector<4x128xf32>
    %cst_64 = arith.constant 1.000000e+00 : f32
    %146 = vector.broadcast %cst_64 : f32 to vector<4x128xf32>
    %147 = arith.addf %146, %145 : vector<4x128xf32>
    %148 = math.log %147 : vector<4x128xf32>
    %149 = arith.addf %141, %148 : vector<4x128xf32>
    %cst_65 = arith.constant 2.885390e+00 : f32
    %150 = vector.broadcast %cst_65 : f32 to vector<4x128xf32>
    %151 = arith.mulf %150, %149 : vector<4x128xf32>
    %c2 = arith.constant 2 : index
    %c0_66 = arith.constant 0 : index
    %152 = vector.load %arg1[%c2, %c0_66] : memref<8x128xf32, #tpu.memory_space<vmem>>, vector<1x128xf32>
    %153 = arith.subf %152, %104 : vector<1x128xf32>
    %cst_67 = arith.constant 0.159154937 : f32
    %154 = vector.broadcast %cst_67 : f32 to vector<1x128xf32>
    %155 = arith.mulf %153, %154 : vector<1x128xf32>
    %156 = math.floor %155 : vector<1x128xf32>
    %cst_68 = arith.constant 6.28318548 : f32
    %157 = vector.broadcast %cst_68 : f32 to vector<1x128xf32>
    %158 = arith.mulf %157, %156 : vector<1x128xf32>
    %159 = arith.subf %153, %158 : vector<1x128xf32>
    %cst_69 = arith.constant 0.159154937 : f32
    %160 = vector.broadcast %cst_69 : f32 to vector<1x128xf32>
    %161 = arith.mulf %159, %160 : vector<1x128xf32>
    %cst_70 = arith.constant 9.99999997E-7 : f32
    %cst_71 = arith.constant 0.999998986 : f32
    %162 = vector.broadcast %cst_70 : f32 to vector<1x128xf32>
    %163 = arith.maximumf %162, %161 : vector<1x128xf32>
    %164 = vector.broadcast %cst_71 : f32 to vector<1x128xf32>
    %165 = arith.minimumf %164, %163 : vector<1x128xf32>
    %166 = math.log %165 : vector<1x128xf32>
    %cst_72 = arith.constant 1.000000e+00 : f32
    %167 = vector.broadcast %cst_72 : f32 to vector<1x128xf32>
    %168 = arith.subf %167, %165 : vector<1x128xf32>
    %169 = math.log %168 : vector<1x128xf32>
    %170 = arith.subf %166, %169 : vector<1x128xf32>
    %171 = vector.broadcast %170 : vector<1x128xf32> to vector<4x128xf32>
    %172 = arith.mulf %151, %171 : vector<4x128xf32>
    %173 = arith.addf %172, %139 : vector<4x128xf32>
    %cst_73 = arith.constant 0.000000e+00 : f32
    %174 = vector.broadcast %cst_73 : f32 to vector<4x128xf32>
    %175 = arith.subf %174, %173 : vector<4x128xf32>
    %176 = math.exp %175 : vector<4x128xf32>
    %cst_74 = arith.constant 1.000000e+00 : f32
    %177 = vector.broadcast %cst_74 : f32 to vector<4x128xf32>
    %178 = arith.addf %177, %176 : vector<4x128xf32>
    %cst_75 = arith.constant 1.000000e+00 : f32
    %179 = vector.broadcast %cst_75 : f32 to vector<4x128xf32>
    %180 = arith.divf %179, %178 : vector<4x128xf32>
    %181 = arith.mulf %151, %180 : vector<4x128xf32>
    %cst_76 = arith.constant 1.000000e+00 : f32
    %182 = vector.broadcast %cst_76 : f32 to vector<4x128xf32>
    %183 = arith.subf %182, %180 : vector<4x128xf32>
    %184 = arith.mulf %181, %183 : vector<4x128xf32>
    %185 = vector.extract_strided_slice %137 {offsets = [8, 0], sizes = [4, 128], strides = [1, 1]} : vector<12x128xf32> to vector<4x128xf32>
    %cst_77 = arith.constant dense<0xFF800000> : vector<128xf32>
    %186 = vector.multi_reduction <maximumf>, %185, %cst_77 [0] : vector<4x128xf32> to vector<128xf32>
    %187 = vector.shape_cast %186 : vector<128xf32> to vector<1x128xf32>
    %188 = vector.broadcast %187 : vector<1x128xf32> to vector<4x128xf32>
    %189 = arith.subf %185, %188 : vector<4x128xf32>
    %190 = math.exp %189 : vector<4x128xf32>
    %cst_78 = arith.constant dense<0.000000e+00> : vector<128xf32>
    %191 = vector.multi_reduction <add>, %190, %cst_78 [0] : vector<4x128xf32> to vector<128xf32>
    %192 = vector.shape_cast %191 : vector<128xf32> to vector<1x128xf32>
    %193 = vector.broadcast %192 : vector<1x128xf32> to vector<4x128xf32>
    %194 = arith.divf %190, %193 : vector<4x128xf32>
    %cst_79 = arith.constant 0.959999978 : f32
    %195 = vector.broadcast %cst_79 : f32 to vector<4x128xf32>
    %196 = arith.mulf %195, %194 : vector<4x128xf32>
    %cst_80 = arith.constant 0.00999999977 : f32
    %197 = vector.broadcast %cst_80 : f32 to vector<4x128xf32>
    %198 = arith.addf %197, %196 : vector<4x128xf32>
    %199 = arith.mulf %198, %180 : vector<4x128xf32>
    %cst_81 = arith.constant dense<0.000000e+00> : vector<128xf32>
    %200 = vector.multi_reduction <add>, %199, %cst_81 [0] : vector<4x128xf32> to vector<128xf32>
    %201 = vector.shape_cast %200 : vector<128xf32> to vector<1x128xf32>
    %202 = arith.mulf %198, %184 : vector<4x128xf32>
    %cst_82 = arith.constant dense<0.000000e+00> : vector<128xf32>
    %203 = vector.multi_reduction <add>, %202, %cst_82 [0] : vector<4x128xf32> to vector<128xf32>
    %204 = vector.shape_cast %203 : vector<128xf32> to vector<1x128xf32>
    %cst_83 = arith.constant 6.28318548 : f32
    %205 = vector.broadcast %cst_83 : f32 to vector<1x128xf32>
    %206 = arith.mulf %205, %201 : vector<1x128xf32>
    %207 = arith.addf %206, %104 : vector<1x128xf32>
    %cst_84 = arith.constant 0.159154937 : f32
    %208 = vector.broadcast %cst_84 : f32 to vector<1x128xf32>
    %209 = arith.mulf %207, %208 : vector<1x128xf32>
    %210 = math.floor %209 : vector<1x128xf32>
    %cst_85 = arith.constant 6.28318548 : f32
    %211 = vector.broadcast %cst_85 : f32 to vector<1x128xf32>
    %212 = arith.mulf %211, %210 : vector<1x128xf32>
    %213 = arith.subf %207, %212 : vector<1x128xf32>
    %cst_86 = arith.constant 1.000000e-30 : f32
    %214 = vector.broadcast %cst_86 : f32 to vector<1x128xf32>
    %215 = arith.maximumf %204, %214 : vector<1x128xf32>
    %216 = math.log %215 : vector<1x128xf32>
    %217 = arith.subf %216, %166 : vector<1x128xf32>
    %218 = arith.subf %217, %169 : vector<1x128xf32>
    %219 = arith.addf %110, %218 : vector<1x128xf32>
    %c2_87 = arith.constant 2 : index
    %c0_88 = arith.constant 0 : index
    %220 = vector.load %arg7[%c2_87, %c0_88] : memref<8x128xf32, #tpu.memory_space<vmem>>, vector<1x128xf32>
    tpu.vector_store %arg7[%c2_87, %c0_88], %213 {strides = array<i32>} : memref<8x128xf32, #tpu.memory_space<vmem>>, vector<1x128xf32>,
    %221 = arith.subf %213, %0 : vector<1x128xf32>
    %222 = math.cos %221 : vector<1x128xf32>
    %223 = math.sin %221 : vector<1x128xf32>
    %c2_89 = arith.constant 2 : index
    %c0_90 = arith.constant 0 : index
    %c0_91 = arith.constant 0 : index
    %224 = vector.load %arg2[%c2_89, %c0_90, %c0_91] : memref<7x32x1xf32, #tpu.memory_space<vmem>>, vector<1x32x1xf32>
    %225 = vector.shape_cast %224 : vector<1x32x1xf32> to vector<32x1xf32>
    %226 = vector.broadcast %225 : vector<32x1xf32> to vector<32x128xf32>
    %227 = vector.broadcast %222 : vector<1x128xf32> to vector<32x128xf32>
    %228 = arith.mulf %226, %227 : vector<32x128xf32>
    %c2_92 = arith.constant 2 : index
    %c0_93 = arith.constant 0 : index
    %c0_94 = arith.constant 0 : index
    %229 = vector.load %arg3[%c2_92, %c0_93, %c0_94] : memref<7x32x1xf32, #tpu.memory_space<vmem>>, vector<1x32x1xf32>
    %230 = vector.shape_cast %229 : vector<1x32x1xf32> to vector<32x1xf32>
    %231 = vector.broadcast %230 : vector<32x1xf32> to vector<32x128xf32>
    %232 = vector.broadcast %223 : vector<1x128xf32> to vector<32x128xf32>
    %233 = arith.mulf %231, %232 : vector<32x128xf32>
    %234 = arith.addf %228, %233 : vector<32x128xf32>
    %c2_95 = arith.constant 2 : index
    %c0_96 = arith.constant 0 : index
    %c0_97 = arith.constant 0 : index
    %235 = vector.load %arg5[%c2_95, %c0_96, %c0_97] : memref<7x32x1xf32, #tpu.memory_space<vmem>>, vector<1x32x1xf32>
    %236 = vector.shape_cast %235 : vector<1x32x1xf32> to vector<32x1xf32>
    %237 = vector.broadcast %236 : vector<32x1xf32> to vector<32x128xf32>
    %238 = arith.addf %234, %237 : vector<32x128xf32>
    %239 = math.tanh %238 : vector<32x128xf32>
    %c2_98 = arith.constant 2 : index
    %c0_99 = arith.constant 0 : index
    %c0_100 = arith.constant 0 : index
    %240 = vector.load %arg4[%c2_98, %c0_99, %c0_100] : memref<7x12x32xf32, #tpu.memory_space<vmem>>, vector<1x12x32xf32>
    %241 = vector.shape_cast %240 : vector<1x12x32xf32> to vector<12x32xf32>
    %cst_101 = arith.constant dense<0.000000e+00> : vector<12x128xf32>
    %242 = tpu.matmul %241, %239, %cst_101 {dimension_numbers = #tpu.dot_dimension_numbers<[1], [0], [0], [1], [0, 0, 1, 1], [], []>} : vector<12x32xf32>, vector<32x128xf32>, vector<12x128xf32> -> vector<12x128xf32>
    %c2_102 = arith.constant 2 : index
    %c0_103 = arith.constant 0 : index
    %c0_104 = arith.constant 0 : index
    %243 = vector.load %arg6[%c2_102, %c0_103, %c0_104] : memref<7x12x1xf32, #tpu.memory_space<vmem>>, vector<1x12x1xf32>
    %244 = vector.shape_cast %243 : vector<1x12x1xf32> to vector<12x1xf32>
    %245 = vector.broadcast %244 : vector<12x1xf32> to vector<12x128xf32>
    %246 = arith.addf %242, %245 : vector<12x128xf32>
    %247 = vector.extract_strided_slice %246 {offsets = [0, 0], sizes = [4, 128], strides = [1, 1]} : vector<12x128xf32> to vector<4x128xf32>
    %248 = vector.extract_strided_slice %246 {offsets = [4, 0], sizes = [4, 128], strides = [1, 1]} : vector<12x128xf32> to vector<4x128xf32>
    %cst_105 = arith.constant 0.000000e+00 : f32
    %249 = vector.broadcast %cst_105 : f32 to vector<4x128xf32>
    %250 = arith.maximumf %247, %249 : vector<4x128xf32>
    %251 = math.absf %247 : vector<4x128xf32>
    %cst_106 = arith.constant 0.000000e+00 : f32
    %252 = vector.broadcast %cst_106 : f32 to vector<4x128xf32>
    %253 = arith.subf %252, %251 : vector<4x128xf32>
    %254 = math.exp %253 : vector<4x128xf32>
    %cst_107 = arith.constant 1.000000e+00 : f32
    %255 = vector.broadcast %cst_107 : f32 to vector<4x128xf32>
    %256 = arith.addf %255, %254 : vector<4x128xf32>
    %257 = math.log %256 : vector<4x128xf32>
    %258 = arith.addf %250, %257 : vector<4x128xf32>
    %cst_108 = arith.constant 2.885390e+00 : f32
    %259 = vector.broadcast %cst_108 : f32 to vector<4x128xf32>
    %260 = arith.mulf %259, %258 : vector<4x128xf32>
    %c3 = arith.constant 3 : index
    %c0_109 = arith.constant 0 : index
    %261 = vector.load %arg1[%c3, %c0_109] : memref<8x128xf32, #tpu.memory_space<vmem>>, vector<1x128xf32>
    %262 = arith.subf %261, %213 : vector<1x128xf32>
    %cst_110 = arith.constant 0.159154937 : f32
    %263 = vector.broadcast %cst_110 : f32 to vector<1x128xf32>
    %264 = arith.mulf %262, %263 : vector<1x128xf32>
    %265 = math.floor %264 : vector<1x128xf32>
    %cst_111 = arith.constant 6.28318548 : f32
    %266 = vector.broadcast %cst_111 : f32 to vector<1x128xf32>
    %267 = arith.mulf %266, %265 : vector<1x128xf32>
    %268 = arith.subf %262, %267 : vector<1x128xf32>
    %cst_112 = arith.constant 0.159154937 : f32
    %269 = vector.broadcast %cst_112 : f32 to vector<1x128xf32>
    %270 = arith.mulf %268, %269 : vector<1x128xf32>
    %cst_113 = arith.constant 9.99999997E-7 : f32
    %cst_114 = arith.constant 0.999998986 : f32
    %271 = vector.broadcast %cst_113 : f32 to vector<1x128xf32>
    %272 = arith.maximumf %271, %270 : vector<1x128xf32>
    %273 = vector.broadcast %cst_114 : f32 to vector<1x128xf32>
    %274 = arith.minimumf %273, %272 : vector<1x128xf32>
    %275 = math.log %274 : vector<1x128xf32>
    %cst_115 = arith.constant 1.000000e+00 : f32
    %276 = vector.broadcast %cst_115 : f32 to vector<1x128xf32>
    %277 = arith.subf %276, %274 : vector<1x128xf32>
    %278 = math.log %277 : vector<1x128xf32>
    %279 = arith.subf %275, %278 : vector<1x128xf32>
    %280 = vector.broadcast %279 : vector<1x128xf32> to vector<4x128xf32>
    %281 = arith.mulf %260, %280 : vector<4x128xf32>
    %282 = arith.addf %281, %248 : vector<4x128xf32>
    %cst_116 = arith.constant 0.000000e+00 : f32
    %283 = vector.broadcast %cst_116 : f32 to vector<4x128xf32>
    %284 = arith.subf %283, %282 : vector<4x128xf32>
    %285 = math.exp %284 : vector<4x128xf32>
    %cst_117 = arith.constant 1.000000e+00 : f32
    %286 = vector.broadcast %cst_117 : f32 to vector<4x128xf32>
    %287 = arith.addf %286, %285 : vector<4x128xf32>
    %cst_118 = arith.constant 1.000000e+00 : f32
    %288 = vector.broadcast %cst_118 : f32 to vector<4x128xf32>
    %289 = arith.divf %288, %287 : vector<4x128xf32>
    %290 = arith.mulf %260, %289 : vector<4x128xf32>
    %cst_119 = arith.constant 1.000000e+00 : f32
    %291 = vector.broadcast %cst_119 : f32 to vector<4x128xf32>
    %292 = arith.subf %291, %289 : vector<4x128xf32>
    %293 = arith.mulf %290, %292 : vector<4x128xf32>
    %294 = vector.extract_strided_slice %246 {offsets = [8, 0], sizes = [4, 128], strides = [1, 1]} : vector<12x128xf32> to vector<4x128xf32>
    %cst_120 = arith.constant dense<0xFF800000> : vector<128xf32>
    %295 = vector.multi_reduction <maximumf>, %294, %cst_120 [0] : vector<4x128xf32> to vector<128xf32>
    %296 = vector.shape_cast %295 : vector<128xf32> to vector<1x128xf32>
    %297 = vector.broadcast %296 : vector<1x128xf32> to vector<4x128xf32>
    %298 = arith.subf %294, %297 : vector<4x128xf32>
    %299 = math.exp %298 : vector<4x128xf32>
    %cst_121 = arith.constant dense<0.000000e+00> : vector<128xf32>
    %300 = vector.multi_reduction <add>, %299, %cst_121 [0] : vector<4x128xf32> to vector<128xf32>
    %301 = vector.shape_cast %300 : vector<128xf32> to vector<1x128xf32>
    %302 = vector.broadcast %301 : vector<1x128xf32> to vector<4x128xf32>
    %303 = arith.divf %299, %302 : vector<4x128xf32>
    %cst_122 = arith.constant 0.959999978 : f32
    %304 = vector.broadcast %cst_122 : f32 to vector<4x128xf32>
    %305 = arith.mulf %304, %303 : vector<4x128xf32>
    %cst_123 = arith.constant 0.00999999977 : f32
    %306 = vector.broadcast %cst_123 : f32 to vector<4x128xf32>
    %307 = arith.addf %306, %305 : vector<4x128xf32>
    %308 = arith.mulf %307, %289 : vector<4x128xf32>
    %cst_124 = arith.constant dense<0.000000e+00> : vector<128xf32>
    %309 = vector.multi_reduction <add>, %308, %cst_124 [0] : vector<4x128xf32> to vector<128xf32>
    %310 = vector.shape_cast %309 : vector<128xf32> to vector<1x128xf32>
    %311 = arith.mulf %307, %293 : vector<4x128xf32>
    %cst_125 = arith.constant dense<0.000000e+00> : vector<128xf32>
    %312 = vector.multi_reduction <add>, %311, %cst_125 [0] : vector<4x128xf32> to vector<128xf32>
    %313 = vector.shape_cast %312 : vector<128xf32> to vector<1x128xf32>
    %cst_126 = arith.constant 6.28318548 : f32
    %314 = vector.broadcast %cst_126 : f32 to vector<1x128xf32>
    %315 = arith.mulf %314, %310 : vector<1x128xf32>
    %316 = arith.addf %315, %213 : vector<1x128xf32>
    %cst_127 = arith.constant 0.159154937 : f32
    %317 = vector.broadcast %cst_127 : f32 to vector<1x128xf32>
    %318 = arith.mulf %316, %317 : vector<1x128xf32>
    %319 = math.floor %318 : vector<1x128xf32>
    %cst_128 = arith.constant 6.28318548 : f32
    %320 = vector.broadcast %cst_128 : f32 to vector<1x128xf32>
    %321 = arith.mulf %320, %319 : vector<1x128xf32>
    %322 = arith.subf %316, %321 : vector<1x128xf32>
    %cst_129 = arith.constant 1.000000e-30 : f32
    %323 = vector.broadcast %cst_129 : f32 to vector<1x128xf32>
    %324 = arith.maximumf %313, %323 : vector<1x128xf32>
    %325 = math.log %324 : vector<1x128xf32>
    %326 = arith.subf %325, %275 : vector<1x128xf32>
    %327 = arith.subf %326, %278 : vector<1x128xf32>
    %328 = arith.addf %219, %327 : vector<1x128xf32>
    %c3_130 = arith.constant 3 : index
    %c0_131 = arith.constant 0 : index
    %329 = vector.load %arg7[%c3_130, %c0_131] : memref<8x128xf32, #tpu.memory_space<vmem>>, vector<1x128xf32>
    tpu.vector_store %arg7[%c3_130, %c0_131], %322 {strides = array<i32>} : memref<8x128xf32, #tpu.memory_space<vmem>>, vector<1x128xf32>,
    %330 = arith.subf %322, %0 : vector<1x128xf32>
    %331 = math.cos %330 : vector<1x128xf32>
    %332 = math.sin %330 : vector<1x128xf32>
    %c3_132 = arith.constant 3 : index
    %c0_133 = arith.constant 0 : index
    %c0_134 = arith.constant 0 : index
    %333 = vector.load %arg2[%c3_132, %c0_133, %c0_134] : memref<7x32x1xf32, #tpu.memory_space<vmem>>, vector<1x32x1xf32>
    %334 = vector.shape_cast %333 : vector<1x32x1xf32> to vector<32x1xf32>
    %335 = vector.broadcast %334 : vector<32x1xf32> to vector<32x128xf32>
    %336 = vector.broadcast %331 : vector<1x128xf32> to vector<32x128xf32>
    %337 = arith.mulf %335, %336 : vector<32x128xf32>
    %c3_135 = arith.constant 3 : index
    %c0_136 = arith.constant 0 : index
    %c0_137 = arith.constant 0 : index
    %338 = vector.load %arg3[%c3_135, %c0_136, %c0_137] : memref<7x32x1xf32, #tpu.memory_space<vmem>>, vector<1x32x1xf32>
    %339 = vector.shape_cast %338 : vector<1x32x1xf32> to vector<32x1xf32>
    %340 = vector.broadcast %339 : vector<32x1xf32> to vector<32x128xf32>
    %341 = vector.broadcast %332 : vector<1x128xf32> to vector<32x128xf32>
    %342 = arith.mulf %340, %341 : vector<32x128xf32>
    %343 = arith.addf %337, %342 : vector<32x128xf32>
    %c3_138 = arith.constant 3 : index
    %c0_139 = arith.constant 0 : index
    %c0_140 = arith.constant 0 : index
    %344 = vector.load %arg5[%c3_138, %c0_139, %c0_140] : memref<7x32x1xf32, #tpu.memory_space<vmem>>, vector<1x32x1xf32>
    %345 = vector.shape_cast %344 : vector<1x32x1xf32> to vector<32x1xf32>
    %346 = vector.broadcast %345 : vector<32x1xf32> to vector<32x128xf32>
    %347 = arith.addf %343, %346 : vector<32x128xf32>
    %348 = math.tanh %347 : vector<32x128xf32>
    %c3_141 = arith.constant 3 : index
    %c0_142 = arith.constant 0 : index
    %c0_143 = arith.constant 0 : index
    %349 = vector.load %arg4[%c3_141, %c0_142, %c0_143] : memref<7x12x32xf32, #tpu.memory_space<vmem>>, vector<1x12x32xf32>
    %350 = vector.shape_cast %349 : vector<1x12x32xf32> to vector<12x32xf32>
    %cst_144 = arith.constant dense<0.000000e+00> : vector<12x128xf32>
    %351 = tpu.matmul %350, %348, %cst_144 {dimension_numbers = #tpu.dot_dimension_numbers<[1], [0], [0], [1], [0, 0, 1, 1], [], []>} : vector<12x32xf32>, vector<32x128xf32>, vector<12x128xf32> -> vector<12x128xf32>
    %c3_145 = arith.constant 3 : index
    %c0_146 = arith.constant 0 : index
    %c0_147 = arith.constant 0 : index
    %352 = vector.load %arg6[%c3_145, %c0_146, %c0_147] : memref<7x12x1xf32, #tpu.memory_space<vmem>>, vector<1x12x1xf32>
    %353 = vector.shape_cast %352 : vector<1x12x1xf32> to vector<12x1xf32>
    %354 = vector.broadcast %353 : vector<12x1xf32> to vector<12x128xf32>
    %355 = arith.addf %351, %354 : vector<12x128xf32>
    %356 = vector.extract_strided_slice %355 {offsets = [0, 0], sizes = [4, 128], strides = [1, 1]} : vector<12x128xf32> to vector<4x128xf32>
    %357 = vector.extract_strided_slice %355 {offsets = [4, 0], sizes = [4, 128], strides = [1, 1]} : vector<12x128xf32> to vector<4x128xf32>
    %cst_148 = arith.constant 0.000000e+00 : f32
    %358 = vector.broadcast %cst_148 : f32 to vector<4x128xf32>
    %359 = arith.maximumf %356, %358 : vector<4x128xf32>
    %360 = math.absf %356 : vector<4x128xf32>
    %cst_149 = arith.constant 0.000000e+00 : f32
    %361 = vector.broadcast %cst_149 : f32 to vector<4x128xf32>
    %362 = arith.subf %361, %360 : vector<4x128xf32>
    %363 = math.exp %362 : vector<4x128xf32>
    %cst_150 = arith.constant 1.000000e+00 : f32
    %364 = vector.broadcast %cst_150 : f32 to vector<4x128xf32>
    %365 = arith.addf %364, %363 : vector<4x128xf32>
    %366 = math.log %365 : vector<4x128xf32>
    %367 = arith.addf %359, %366 : vector<4x128xf32>
    %cst_151 = arith.constant 2.885390e+00 : f32
    %368 = vector.broadcast %cst_151 : f32 to vector<4x128xf32>
    %369 = arith.mulf %368, %367 : vector<4x128xf32>
    %c4 = arith.constant 4 : index
    %c0_152 = arith.constant 0 : index
    %370 = vector.load %arg1[%c4, %c0_152] : memref<8x128xf32, #tpu.memory_space<vmem>>, vector<1x128xf32>
    %371 = arith.subf %370, %322 : vector<1x128xf32>
    %cst_153 = arith.constant 0.159154937 : f32
    %372 = vector.broadcast %cst_153 : f32 to vector<1x128xf32>
    %373 = arith.mulf %371, %372 : vector<1x128xf32>
    %374 = math.floor %373 : vector<1x128xf32>
    %cst_154 = arith.constant 6.28318548 : f32
    %375 = vector.broadcast %cst_154 : f32 to vector<1x128xf32>
    %376 = arith.mulf %375, %374 : vector<1x128xf32>
    %377 = arith.subf %371, %376 : vector<1x128xf32>
    %cst_155 = arith.constant 0.159154937 : f32
    %378 = vector.broadcast %cst_155 : f32 to vector<1x128xf32>
    %379 = arith.mulf %377, %378 : vector<1x128xf32>
    %cst_156 = arith.constant 9.99999997E-7 : f32
    %cst_157 = arith.constant 0.999998986 : f32
    %380 = vector.broadcast %cst_156 : f32 to vector<1x128xf32>
    %381 = arith.maximumf %380, %379 : vector<1x128xf32>
    %382 = vector.broadcast %cst_157 : f32 to vector<1x128xf32>
    %383 = arith.minimumf %382, %381 : vector<1x128xf32>
    %384 = math.log %383 : vector<1x128xf32>
    %cst_158 = arith.constant 1.000000e+00 : f32
    %385 = vector.broadcast %cst_158 : f32 to vector<1x128xf32>
    %386 = arith.subf %385, %383 : vector<1x128xf32>
    %387 = math.log %386 : vector<1x128xf32>
    %388 = arith.subf %384, %387 : vector<1x128xf32>
    %389 = vector.broadcast %388 : vector<1x128xf32> to vector<4x128xf32>
    %390 = arith.mulf %369, %389 : vector<4x128xf32>
    %391 = arith.addf %390, %357 : vector<4x128xf32>
    %cst_159 = arith.constant 0.000000e+00 : f32
    %392 = vector.broadcast %cst_159 : f32 to vector<4x128xf32>
    %393 = arith.subf %392, %391 : vector<4x128xf32>
    %394 = math.exp %393 : vector<4x128xf32>
    %cst_160 = arith.constant 1.000000e+00 : f32
    %395 = vector.broadcast %cst_160 : f32 to vector<4x128xf32>
    %396 = arith.addf %395, %394 : vector<4x128xf32>
    %cst_161 = arith.constant 1.000000e+00 : f32
    %397 = vector.broadcast %cst_161 : f32 to vector<4x128xf32>
    %398 = arith.divf %397, %396 : vector<4x128xf32>
    %399 = arith.mulf %369, %398 : vector<4x128xf32>
    %cst_162 = arith.constant 1.000000e+00 : f32
    %400 = vector.broadcast %cst_162 : f32 to vector<4x128xf32>
    %401 = arith.subf %400, %398 : vector<4x128xf32>
    %402 = arith.mulf %399, %401 : vector<4x128xf32>
    %403 = vector.extract_strided_slice %355 {offsets = [8, 0], sizes = [4, 128], strides = [1, 1]} : vector<12x128xf32> to vector<4x128xf32>
    %cst_163 = arith.constant dense<0xFF800000> : vector<128xf32>
    %404 = vector.multi_reduction <maximumf>, %403, %cst_163 [0] : vector<4x128xf32> to vector<128xf32>
    %405 = vector.shape_cast %404 : vector<128xf32> to vector<1x128xf32>
    %406 = vector.broadcast %405 : vector<1x128xf32> to vector<4x128xf32>
    %407 = arith.subf %403, %406 : vector<4x128xf32>
    %408 = math.exp %407 : vector<4x128xf32>
    %cst_164 = arith.constant dense<0.000000e+00> : vector<128xf32>
    %409 = vector.multi_reduction <add>, %408, %cst_164 [0] : vector<4x128xf32> to vector<128xf32>
    %410 = vector.shape_cast %409 : vector<128xf32> to vector<1x128xf32>
    %411 = vector.broadcast %410 : vector<1x128xf32> to vector<4x128xf32>
    %412 = arith.divf %408, %411 : vector<4x128xf32>
    %cst_165 = arith.constant 0.959999978 : f32
    %413 = vector.broadcast %cst_165 : f32 to vector<4x128xf32>
    %414 = arith.mulf %413, %412 : vector<4x128xf32>
    %cst_166 = arith.constant 0.00999999977 : f32
    %415 = vector.broadcast %cst_166 : f32 to vector<4x128xf32>
    %416 = arith.addf %415, %414 : vector<4x128xf32>
    %417 = arith.mulf %416, %398 : vector<4x128xf32>
    %cst_167 = arith.constant dense<0.000000e+00> : vector<128xf32>
    %418 = vector.multi_reduction <add>, %417, %cst_167 [0] : vector<4x128xf32> to vector<128xf32>
    %419 = vector.shape_cast %418 : vector<128xf32> to vector<1x128xf32>
    %420 = arith.mulf %416, %402 : vector<4x128xf32>
    %cst_168 = arith.constant dense<0.000000e+00> : vector<128xf32>
    %421 = vector.multi_reduction <add>, %420, %cst_168 [0] : vector<4x128xf32> to vector<128xf32>
    %422 = vector.shape_cast %421 : vector<128xf32> to vector<1x128xf32>
    %cst_169 = arith.constant 6.28318548 : f32
    %423 = vector.broadcast %cst_169 : f32 to vector<1x128xf32>
    %424 = arith.mulf %423, %419 : vector<1x128xf32>
    %425 = arith.addf %424, %322 : vector<1x128xf32>
    %cst_170 = arith.constant 0.159154937 : f32
    %426 = vector.broadcast %cst_170 : f32 to vector<1x128xf32>
    %427 = arith.mulf %425, %426 : vector<1x128xf32>
    %428 = math.floor %427 : vector<1x128xf32>
    %cst_171 = arith.constant 6.28318548 : f32
    %429 = vector.broadcast %cst_171 : f32 to vector<1x128xf32>
    %430 = arith.mulf %429, %428 : vector<1x128xf32>
    %431 = arith.subf %425, %430 : vector<1x128xf32>
    %cst_172 = arith.constant 1.000000e-30 : f32
    %432 = vector.broadcast %cst_172 : f32 to vector<1x128xf32>
    %433 = arith.maximumf %422, %432 : vector<1x128xf32>
    %434 = math.log %433 : vector<1x128xf32>
    %435 = arith.subf %434, %384 : vector<1x128xf32>
    %436 = arith.subf %435, %387 : vector<1x128xf32>
    %437 = arith.addf %328, %436 : vector<1x128xf32>
    %c4_173 = arith.constant 4 : index
    %c0_174 = arith.constant 0 : index
    %438 = vector.load %arg7[%c4_173, %c0_174] : memref<8x128xf32, #tpu.memory_space<vmem>>, vector<1x128xf32>
    tpu.vector_store %arg7[%c4_173, %c0_174], %431 {strides = array<i32>} : memref<8x128xf32, #tpu.memory_space<vmem>>, vector<1x128xf32>,
    %439 = arith.subf %431, %0 : vector<1x128xf32>
    %440 = math.cos %439 : vector<1x128xf32>
    %441 = math.sin %439 : vector<1x128xf32>
    %c4_175 = arith.constant 4 : index
    %c0_176 = arith.constant 0 : index
    %c0_177 = arith.constant 0 : index
    %442 = vector.load %arg2[%c4_175, %c0_176, %c0_177] : memref<7x32x1xf32, #tpu.memory_space<vmem>>, vector<1x32x1xf32>
    %443 = vector.shape_cast %442 : vector<1x32x1xf32> to vector<32x1xf32>
    %444 = vector.broadcast %443 : vector<32x1xf32> to vector<32x128xf32>
    %445 = vector.broadcast %440 : vector<1x128xf32> to vector<32x128xf32>
    %446 = arith.mulf %444, %445 : vector<32x128xf32>
    %c4_178 = arith.constant 4 : index
    %c0_179 = arith.constant 0 : index
    %c0_180 = arith.constant 0 : index
    %447 = vector.load %arg3[%c4_178, %c0_179, %c0_180] : memref<7x32x1xf32, #tpu.memory_space<vmem>>, vector<1x32x1xf32>
    %448 = vector.shape_cast %447 : vector<1x32x1xf32> to vector<32x1xf32>
    %449 = vector.broadcast %448 : vector<32x1xf32> to vector<32x128xf32>
    %450 = vector.broadcast %441 : vector<1x128xf32> to vector<32x128xf32>
    %451 = arith.mulf %449, %450 : vector<32x128xf32>
    %452 = arith.addf %446, %451 : vector<32x128xf32>
    %c4_181 = arith.constant 4 : index
    %c0_182 = arith.constant 0 : index
    %c0_183 = arith.constant 0 : index
    %453 = vector.load %arg5[%c4_181, %c0_182, %c0_183] : memref<7x32x1xf32, #tpu.memory_space<vmem>>, vector<1x32x1xf32>
    %454 = vector.shape_cast %453 : vector<1x32x1xf32> to vector<32x1xf32>
    %455 = vector.broadcast %454 : vector<32x1xf32> to vector<32x128xf32>
    %456 = arith.addf %452, %455 : vector<32x128xf32>
    %457 = math.tanh %456 : vector<32x128xf32>
    %c4_184 = arith.constant 4 : index
    %c0_185 = arith.constant 0 : index
    %c0_186 = arith.constant 0 : index
    %458 = vector.load %arg4[%c4_184, %c0_185, %c0_186] : memref<7x12x32xf32, #tpu.memory_space<vmem>>, vector<1x12x32xf32>
    %459 = vector.shape_cast %458 : vector<1x12x32xf32> to vector<12x32xf32>
    %cst_187 = arith.constant dense<0.000000e+00> : vector<12x128xf32>
    %460 = tpu.matmul %459, %457, %cst_187 {dimension_numbers = #tpu.dot_dimension_numbers<[1], [0], [0], [1], [0, 0, 1, 1], [], []>} : vector<12x32xf32>, vector<32x128xf32>, vector<12x128xf32> -> vector<12x128xf32>
    %c4_188 = arith.constant 4 : index
    %c0_189 = arith.constant 0 : index
    %c0_190 = arith.constant 0 : index
    %461 = vector.load %arg6[%c4_188, %c0_189, %c0_190] : memref<7x12x1xf32, #tpu.memory_space<vmem>>, vector<1x12x1xf32>
    %462 = vector.shape_cast %461 : vector<1x12x1xf32> to vector<12x1xf32>
    %463 = vector.broadcast %462 : vector<12x1xf32> to vector<12x128xf32>
    %464 = arith.addf %460, %463 : vector<12x128xf32>
    %465 = vector.extract_strided_slice %464 {offsets = [0, 0], sizes = [4, 128], strides = [1, 1]} : vector<12x128xf32> to vector<4x128xf32>
    %466 = vector.extract_strided_slice %464 {offsets = [4, 0], sizes = [4, 128], strides = [1, 1]} : vector<12x128xf32> to vector<4x128xf32>
    %cst_191 = arith.constant 0.000000e+00 : f32
    %467 = vector.broadcast %cst_191 : f32 to vector<4x128xf32>
    %468 = arith.maximumf %465, %467 : vector<4x128xf32>
    %469 = math.absf %465 : vector<4x128xf32>
    %cst_192 = arith.constant 0.000000e+00 : f32
    %470 = vector.broadcast %cst_192 : f32 to vector<4x128xf32>
    %471 = arith.subf %470, %469 : vector<4x128xf32>
    %472 = math.exp %471 : vector<4x128xf32>
    %cst_193 = arith.constant 1.000000e+00 : f32
    %473 = vector.broadcast %cst_193 : f32 to vector<4x128xf32>
    %474 = arith.addf %473, %472 : vector<4x128xf32>
    %475 = math.log %474 : vector<4x128xf32>
    %476 = arith.addf %468, %475 : vector<4x128xf32>
    %cst_194 = arith.constant 2.885390e+00 : f32
    %477 = vector.broadcast %cst_194 : f32 to vector<4x128xf32>
    %478 = arith.mulf %477, %476 : vector<4x128xf32>
    %c5 = arith.constant 5 : index
    %c0_195 = arith.constant 0 : index
    %479 = vector.load %arg1[%c5, %c0_195] : memref<8x128xf32, #tpu.memory_space<vmem>>, vector<1x128xf32>
    %480 = arith.subf %479, %431 : vector<1x128xf32>
    %cst_196 = arith.constant 0.159154937 : f32
    %481 = vector.broadcast %cst_196 : f32 to vector<1x128xf32>
    %482 = arith.mulf %480, %481 : vector<1x128xf32>
    %483 = math.floor %482 : vector<1x128xf32>
    %cst_197 = arith.constant 6.28318548 : f32
    %484 = vector.broadcast %cst_197 : f32 to vector<1x128xf32>
    %485 = arith.mulf %484, %483 : vector<1x128xf32>
    %486 = arith.subf %480, %485 : vector<1x128xf32>
    %cst_198 = arith.constant 0.159154937 : f32
    %487 = vector.broadcast %cst_198 : f32 to vector<1x128xf32>
    %488 = arith.mulf %486, %487 : vector<1x128xf32>
    %cst_199 = arith.constant 9.99999997E-7 : f32
    %cst_200 = arith.constant 0.999998986 : f32
    %489 = vector.broadcast %cst_199 : f32 to vector<1x128xf32>
    %490 = arith.maximumf %489, %488 : vector<1x128xf32>
    %491 = vector.broadcast %cst_200 : f32 to vector<1x128xf32>
    %492 = arith.minimumf %491, %490 : vector<1x128xf32>
    %493 = math.log %492 : vector<1x128xf32>
    %cst_201 = arith.constant 1.000000e+00 : f32
    %494 = vector.broadcast %cst_201 : f32 to vector<1x128xf32>
    %495 = arith.subf %494, %492 : vector<1x128xf32>
    %496 = math.log %495 : vector<1x128xf32>
    %497 = arith.subf %493, %496 : vector<1x128xf32>
    %498 = vector.broadcast %497 : vector<1x128xf32> to vector<4x128xf32>
    %499 = arith.mulf %478, %498 : vector<4x128xf32>
    %500 = arith.addf %499, %466 : vector<4x128xf32>
    %cst_202 = arith.constant 0.000000e+00 : f32
    %501 = vector.broadcast %cst_202 : f32 to vector<4x128xf32>
    %502 = arith.subf %501, %500 : vector<4x128xf32>
    %503 = math.exp %502 : vector<4x128xf32>
    %cst_203 = arith.constant 1.000000e+00 : f32
    %504 = vector.broadcast %cst_203 : f32 to vector<4x128xf32>
    %505 = arith.addf %504, %503 : vector<4x128xf32>
    %cst_204 = arith.constant 1.000000e+00 : f32
    %506 = vector.broadcast %cst_204 : f32 to vector<4x128xf32>
    %507 = arith.divf %506, %505 : vector<4x128xf32>
    %508 = arith.mulf %478, %507 : vector<4x128xf32>
    %cst_205 = arith.constant 1.000000e+00 : f32
    %509 = vector.broadcast %cst_205 : f32 to vector<4x128xf32>
    %510 = arith.subf %509, %507 : vector<4x128xf32>
    %511 = arith.mulf %508, %510 : vector<4x128xf32>
    %512 = vector.extract_strided_slice %464 {offsets = [8, 0], sizes = [4, 128], strides = [1, 1]} : vector<12x128xf32> to vector<4x128xf32>
    %cst_206 = arith.constant dense<0xFF800000> : vector<128xf32>
    %513 = vector.multi_reduction <maximumf>, %512, %cst_206 [0] : vector<4x128xf32> to vector<128xf32>
    %514 = vector.shape_cast %513 : vector<128xf32> to vector<1x128xf32>
    %515 = vector.broadcast %514 : vector<1x128xf32> to vector<4x128xf32>
    %516 = arith.subf %512, %515 : vector<4x128xf32>
    %517 = math.exp %516 : vector<4x128xf32>
    %cst_207 = arith.constant dense<0.000000e+00> : vector<128xf32>
    %518 = vector.multi_reduction <add>, %517, %cst_207 [0] : vector<4x128xf32> to vector<128xf32>
    %519 = vector.shape_cast %518 : vector<128xf32> to vector<1x128xf32>
    %520 = vector.broadcast %519 : vector<1x128xf32> to vector<4x128xf32>
    %521 = arith.divf %517, %520 : vector<4x128xf32>
    %cst_208 = arith.constant 0.959999978 : f32
    %522 = vector.broadcast %cst_208 : f32 to vector<4x128xf32>
    %523 = arith.mulf %522, %521 : vector<4x128xf32>
    %cst_209 = arith.constant 0.00999999977 : f32
    %524 = vector.broadcast %cst_209 : f32 to vector<4x128xf32>
    %525 = arith.addf %524, %523 : vector<4x128xf32>
    %526 = arith.mulf %525, %507 : vector<4x128xf32>
    %cst_210 = arith.constant dense<0.000000e+00> : vector<128xf32>
    %527 = vector.multi_reduction <add>, %526, %cst_210 [0] : vector<4x128xf32> to vector<128xf32>
    %528 = vector.shape_cast %527 : vector<128xf32> to vector<1x128xf32>
    %529 = arith.mulf %525, %511 : vector<4x128xf32>
    %cst_211 = arith.constant dense<0.000000e+00> : vector<128xf32>
    %530 = vector.multi_reduction <add>, %529, %cst_211 [0] : vector<4x128xf32> to vector<128xf32>
    %531 = vector.shape_cast %530 : vector<128xf32> to vector<1x128xf32>
    %cst_212 = arith.constant 6.28318548 : f32
    %532 = vector.broadcast %cst_212 : f32 to vector<1x128xf32>
    %533 = arith.mulf %532, %528 : vector<1x128xf32>
    %534 = arith.addf %533, %431 : vector<1x128xf32>
    %cst_213 = arith.constant 0.159154937 : f32
    %535 = vector.broadcast %cst_213 : f32 to vector<1x128xf32>
    %536 = arith.mulf %534, %535 : vector<1x128xf32>
    %537 = math.floor %536 : vector<1x128xf32>
    %cst_214 = arith.constant 6.28318548 : f32
    %538 = vector.broadcast %cst_214 : f32 to vector<1x128xf32>
    %539 = arith.mulf %538, %537 : vector<1x128xf32>
    %540 = arith.subf %534, %539 : vector<1x128xf32>
    %cst_215 = arith.constant 1.000000e-30 : f32
    %541 = vector.broadcast %cst_215 : f32 to vector<1x128xf32>
    %542 = arith.maximumf %531, %541 : vector<1x128xf32>
    %543 = math.log %542 : vector<1x128xf32>
    %544 = arith.subf %543, %493 : vector<1x128xf32>
    %545 = arith.subf %544, %496 : vector<1x128xf32>
    %546 = arith.addf %437, %545 : vector<1x128xf32>
    %c5_216 = arith.constant 5 : index
    %c0_217 = arith.constant 0 : index
    %547 = vector.load %arg7[%c5_216, %c0_217] : memref<8x128xf32, #tpu.memory_space<vmem>>, vector<1x128xf32>
    tpu.vector_store %arg7[%c5_216, %c0_217], %540 {strides = array<i32>} : memref<8x128xf32, #tpu.memory_space<vmem>>, vector<1x128xf32>,
    %548 = arith.subf %540, %0 : vector<1x128xf32>
    %549 = math.cos %548 : vector<1x128xf32>
    %550 = math.sin %548 : vector<1x128xf32>
    %c5_218 = arith.constant 5 : index
    %c0_219 = arith.constant 0 : index
    %c0_220 = arith.constant 0 : index
    %551 = vector.load %arg2[%c5_218, %c0_219, %c0_220] : memref<7x32x1xf32, #tpu.memory_space<vmem>>, vector<1x32x1xf32>
    %552 = vector.shape_cast %551 : vector<1x32x1xf32> to vector<32x1xf32>
    %553 = vector.broadcast %552 : vector<32x1xf32> to vector<32x128xf32>
    %554 = vector.broadcast %549 : vector<1x128xf32> to vector<32x128xf32>
    %555 = arith.mulf %553, %554 : vector<32x128xf32>
    %c5_221 = arith.constant 5 : index
    %c0_222 = arith.constant 0 : index
    %c0_223 = arith.constant 0 : index
    %556 = vector.load %arg3[%c5_221, %c0_222, %c0_223] : memref<7x32x1xf32, #tpu.memory_space<vmem>>, vector<1x32x1xf32>
    %557 = vector.shape_cast %556 : vector<1x32x1xf32> to vector<32x1xf32>
    %558 = vector.broadcast %557 : vector<32x1xf32> to vector<32x128xf32>
    %559 = vector.broadcast %550 : vector<1x128xf32> to vector<32x128xf32>
    %560 = arith.mulf %558, %559 : vector<32x128xf32>
    %561 = arith.addf %555, %560 : vector<32x128xf32>
    %c5_224 = arith.constant 5 : index
    %c0_225 = arith.constant 0 : index
    %c0_226 = arith.constant 0 : index
    %562 = vector.load %arg5[%c5_224, %c0_225, %c0_226] : memref<7x32x1xf32, #tpu.memory_space<vmem>>, vector<1x32x1xf32>
    %563 = vector.shape_cast %562 : vector<1x32x1xf32> to vector<32x1xf32>
    %564 = vector.broadcast %563 : vector<32x1xf32> to vector<32x128xf32>
    %565 = arith.addf %561, %564 : vector<32x128xf32>
    %566 = math.tanh %565 : vector<32x128xf32>
    %c5_227 = arith.constant 5 : index
    %c0_228 = arith.constant 0 : index
    %c0_229 = arith.constant 0 : index
    %567 = vector.load %arg4[%c5_227, %c0_228, %c0_229] : memref<7x12x32xf32, #tpu.memory_space<vmem>>, vector<1x12x32xf32>
    %568 = vector.shape_cast %567 : vector<1x12x32xf32> to vector<12x32xf32>
    %cst_230 = arith.constant dense<0.000000e+00> : vector<12x128xf32>
    %569 = tpu.matmul %568, %566, %cst_230 {dimension_numbers = #tpu.dot_dimension_numbers<[1], [0], [0], [1], [0, 0, 1, 1], [], []>} : vector<12x32xf32>, vector<32x128xf32>, vector<12x128xf32> -> vector<12x128xf32>
    %c5_231 = arith.constant 5 : index
    %c0_232 = arith.constant 0 : index
    %c0_233 = arith.constant 0 : index
    %570 = vector.load %arg6[%c5_231, %c0_232, %c0_233] : memref<7x12x1xf32, #tpu.memory_space<vmem>>, vector<1x12x1xf32>
    %571 = vector.shape_cast %570 : vector<1x12x1xf32> to vector<12x1xf32>
    %572 = vector.broadcast %571 : vector<12x1xf32> to vector<12x128xf32>
    %573 = arith.addf %569, %572 : vector<12x128xf32>
    %574 = vector.extract_strided_slice %573 {offsets = [0, 0], sizes = [4, 128], strides = [1, 1]} : vector<12x128xf32> to vector<4x128xf32>
    %575 = vector.extract_strided_slice %573 {offsets = [4, 0], sizes = [4, 128], strides = [1, 1]} : vector<12x128xf32> to vector<4x128xf32>
    %cst_234 = arith.constant 0.000000e+00 : f32
    %576 = vector.broadcast %cst_234 : f32 to vector<4x128xf32>
    %577 = arith.maximumf %574, %576 : vector<4x128xf32>
    %578 = math.absf %574 : vector<4x128xf32>
    %cst_235 = arith.constant 0.000000e+00 : f32
    %579 = vector.broadcast %cst_235 : f32 to vector<4x128xf32>
    %580 = arith.subf %579, %578 : vector<4x128xf32>
    %581 = math.exp %580 : vector<4x128xf32>
    %cst_236 = arith.constant 1.000000e+00 : f32
    %582 = vector.broadcast %cst_236 : f32 to vector<4x128xf32>
    %583 = arith.addf %582, %581 : vector<4x128xf32>
    %584 = math.log %583 : vector<4x128xf32>
    %585 = arith.addf %577, %584 : vector<4x128xf32>
    %cst_237 = arith.constant 2.885390e+00 : f32
    %586 = vector.broadcast %cst_237 : f32 to vector<4x128xf32>
    %587 = arith.mulf %586, %585 : vector<4x128xf32>
    %c6 = arith.constant 6 : index
    %c0_238 = arith.constant 0 : index
    %588 = vector.load %arg1[%c6, %c0_238] : memref<8x128xf32, #tpu.memory_space<vmem>>, vector<1x128xf32>
    %589 = arith.subf %588, %540 : vector<1x128xf32>
    %cst_239 = arith.constant 0.159154937 : f32
    %590 = vector.broadcast %cst_239 : f32 to vector<1x128xf32>
    %591 = arith.mulf %589, %590 : vector<1x128xf32>
    %592 = math.floor %591 : vector<1x128xf32>
    %cst_240 = arith.constant 6.28318548 : f32
    %593 = vector.broadcast %cst_240 : f32 to vector<1x128xf32>
    %594 = arith.mulf %593, %592 : vector<1x128xf32>
    %595 = arith.subf %589, %594 : vector<1x128xf32>
    %cst_241 = arith.constant 0.159154937 : f32
    %596 = vector.broadcast %cst_241 : f32 to vector<1x128xf32>
    %597 = arith.mulf %595, %596 : vector<1x128xf32>
    %cst_242 = arith.constant 9.99999997E-7 : f32
    %cst_243 = arith.constant 0.999998986 : f32
    %598 = vector.broadcast %cst_242 : f32 to vector<1x128xf32>
    %599 = arith.maximumf %598, %597 : vector<1x128xf32>
    %600 = vector.broadcast %cst_243 : f32 to vector<1x128xf32>
    %601 = arith.minimumf %600, %599 : vector<1x128xf32>
    %602 = math.log %601 : vector<1x128xf32>
    %cst_244 = arith.constant 1.000000e+00 : f32
    %603 = vector.broadcast %cst_244 : f32 to vector<1x128xf32>
    %604 = arith.subf %603, %601 : vector<1x128xf32>
    %605 = math.log %604 : vector<1x128xf32>
    %606 = arith.subf %602, %605 : vector<1x128xf32>
    %607 = vector.broadcast %606 : vector<1x128xf32> to vector<4x128xf32>
    %608 = arith.mulf %587, %607 : vector<4x128xf32>
    %609 = arith.addf %608, %575 : vector<4x128xf32>
    %cst_245 = arith.constant 0.000000e+00 : f32
    %610 = vector.broadcast %cst_245 : f32 to vector<4x128xf32>
    %611 = arith.subf %610, %609 : vector<4x128xf32>
    %612 = math.exp %611 : vector<4x128xf32>
    %cst_246 = arith.constant 1.000000e+00 : f32
    %613 = vector.broadcast %cst_246 : f32 to vector<4x128xf32>
    %614 = arith.addf %613, %612 : vector<4x128xf32>
    %cst_247 = arith.constant 1.000000e+00 : f32
    %615 = vector.broadcast %cst_247 : f32 to vector<4x128xf32>
    %616 = arith.divf %615, %614 : vector<4x128xf32>
    %617 = arith.mulf %587, %616 : vector<4x128xf32>
    %cst_248 = arith.constant 1.000000e+00 : f32
    %618 = vector.broadcast %cst_248 : f32 to vector<4x128xf32>
    %619 = arith.subf %618, %616 : vector<4x128xf32>
    %620 = arith.mulf %617, %619 : vector<4x128xf32>
    %621 = vector.extract_strided_slice %573 {offsets = [8, 0], sizes = [4, 128], strides = [1, 1]} : vector<12x128xf32> to vector<4x128xf32>
    %cst_249 = arith.constant dense<0xFF800000> : vector<128xf32>
    %622 = vector.multi_reduction <maximumf>, %621, %cst_249 [0] : vector<4x128xf32> to vector<128xf32>
    %623 = vector.shape_cast %622 : vector<128xf32> to vector<1x128xf32>
    %624 = vector.broadcast %623 : vector<1x128xf32> to vector<4x128xf32>
    %625 = arith.subf %621, %624 : vector<4x128xf32>
    %626 = math.exp %625 : vector<4x128xf32>
    %cst_250 = arith.constant dense<0.000000e+00> : vector<128xf32>
    %627 = vector.multi_reduction <add>, %626, %cst_250 [0] : vector<4x128xf32> to vector<128xf32>
    %628 = vector.shape_cast %627 : vector<128xf32> to vector<1x128xf32>
    %629 = vector.broadcast %628 : vector<1x128xf32> to vector<4x128xf32>
    %630 = arith.divf %626, %629 : vector<4x128xf32>
    %cst_251 = arith.constant 0.959999978 : f32
    %631 = vector.broadcast %cst_251 : f32 to vector<4x128xf32>
    %632 = arith.mulf %631, %630 : vector<4x128xf32>
    %cst_252 = arith.constant 0.00999999977 : f32
    %633 = vector.broadcast %cst_252 : f32 to vector<4x128xf32>
    %634 = arith.addf %633, %632 : vector<4x128xf32>
    %635 = arith.mulf %634, %616 : vector<4x128xf32>
    %cst_253 = arith.constant dense<0.000000e+00> : vector<128xf32>
    %636 = vector.multi_reduction <add>, %635, %cst_253 [0] : vector<4x128xf32> to vector<128xf32>
    %637 = vector.shape_cast %636 : vector<128xf32> to vector<1x128xf32>
    %638 = arith.mulf %634, %620 : vector<4x128xf32>
    %cst_254 = arith.constant dense<0.000000e+00> : vector<128xf32>
    %639 = vector.multi_reduction <add>, %638, %cst_254 [0] : vector<4x128xf32> to vector<128xf32>
    %640 = vector.shape_cast %639 : vector<128xf32> to vector<1x128xf32>
    %cst_255 = arith.constant 6.28318548 : f32
    %641 = vector.broadcast %cst_255 : f32 to vector<1x128xf32>
    %642 = arith.mulf %641, %637 : vector<1x128xf32>
    %643 = arith.addf %642, %540 : vector<1x128xf32>
    %cst_256 = arith.constant 0.159154937 : f32
    %644 = vector.broadcast %cst_256 : f32 to vector<1x128xf32>
    %645 = arith.mulf %643, %644 : vector<1x128xf32>
    %646 = math.floor %645 : vector<1x128xf32>
    %cst_257 = arith.constant 6.28318548 : f32
    %647 = vector.broadcast %cst_257 : f32 to vector<1x128xf32>
    %648 = arith.mulf %647, %646 : vector<1x128xf32>
    %649 = arith.subf %643, %648 : vector<1x128xf32>
    %cst_258 = arith.constant 1.000000e-30 : f32
    %650 = vector.broadcast %cst_258 : f32 to vector<1x128xf32>
    %651 = arith.maximumf %640, %650 : vector<1x128xf32>
    %652 = math.log %651 : vector<1x128xf32>
    %653 = arith.subf %652, %602 : vector<1x128xf32>
    %654 = arith.subf %653, %605 : vector<1x128xf32>
    %655 = arith.addf %546, %654 : vector<1x128xf32>
    %c6_259 = arith.constant 6 : index
    %c0_260 = arith.constant 0 : index
    %656 = vector.load %arg7[%c6_259, %c0_260] : memref<8x128xf32, #tpu.memory_space<vmem>>, vector<1x128xf32>
    tpu.vector_store %arg7[%c6_259, %c0_260], %649 {strides = array<i32>} : memref<8x128xf32, #tpu.memory_space<vmem>>, vector<1x128xf32>,
    %657 = arith.subf %649, %0 : vector<1x128xf32>
    %658 = math.cos %657 : vector<1x128xf32>
    %659 = math.sin %657 : vector<1x128xf32>
    %c6_261 = arith.constant 6 : index
    %c0_262 = arith.constant 0 : index
    %c0_263 = arith.constant 0 : index
    %660 = vector.load %arg2[%c6_261, %c0_262, %c0_263] : memref<7x32x1xf32, #tpu.memory_space<vmem>>, vector<1x32x1xf32>
    %661 = vector.shape_cast %660 : vector<1x32x1xf32> to vector<32x1xf32>
    %662 = vector.broadcast %661 : vector<32x1xf32> to vector<32x128xf32>
    %663 = vector.broadcast %658 : vector<1x128xf32> to vector<32x128xf32>
    %664 = arith.mulf %662, %663 : vector<32x128xf32>
    %c6_264 = arith.constant 6 : index
    %c0_265 = arith.constant 0 : index
    %c0_266 = arith.constant 0 : index
    %665 = vector.load %arg3[%c6_264, %c0_265, %c0_266] : memref<7x32x1xf32, #tpu.memory_space<vmem>>, vector<1x32x1xf32>
    %666 = vector.shape_cast %665 : vector<1x32x1xf32> to vector<32x1xf32>
    %667 = vector.broadcast %666 : vector<32x1xf32> to vector<32x128xf32>
    %668 = vector.broadcast %659 : vector<1x128xf32> to vector<32x128xf32>
    %669 = arith.mulf %667, %668 : vector<32x128xf32>
    %670 = arith.addf %664, %669 : vector<32x128xf32>
    %c6_267 = arith.constant 6 : index
    %c0_268 = arith.constant 0 : index
    %c0_269 = arith.constant 0 : index
    %671 = vector.load %arg5[%c6_267, %c0_268, %c0_269] : memref<7x32x1xf32, #tpu.memory_space<vmem>>, vector<1x32x1xf32>
    %672 = vector.shape_cast %671 : vector<1x32x1xf32> to vector<32x1xf32>
    %673 = vector.broadcast %672 : vector<32x1xf32> to vector<32x128xf32>
    %674 = arith.addf %670, %673 : vector<32x128xf32>
    %675 = math.tanh %674 : vector<32x128xf32>
    %c6_270 = arith.constant 6 : index
    %c0_271 = arith.constant 0 : index
    %c0_272 = arith.constant 0 : index
    %676 = vector.load %arg4[%c6_270, %c0_271, %c0_272] : memref<7x12x32xf32, #tpu.memory_space<vmem>>, vector<1x12x32xf32>
    %677 = vector.shape_cast %676 : vector<1x12x32xf32> to vector<12x32xf32>
    %cst_273 = arith.constant dense<0.000000e+00> : vector<12x128xf32>
    %678 = tpu.matmul %677, %675, %cst_273 {dimension_numbers = #tpu.dot_dimension_numbers<[1], [0], [0], [1], [0, 0, 1, 1], [], []>} : vector<12x32xf32>, vector<32x128xf32>, vector<12x128xf32> -> vector<12x128xf32>
    %c6_274 = arith.constant 6 : index
    %c0_275 = arith.constant 0 : index
    %c0_276 = arith.constant 0 : index
    %679 = vector.load %arg6[%c6_274, %c0_275, %c0_276] : memref<7x12x1xf32, #tpu.memory_space<vmem>>, vector<1x12x1xf32>
    %680 = vector.shape_cast %679 : vector<1x12x1xf32> to vector<12x1xf32>
    %681 = vector.broadcast %680 : vector<12x1xf32> to vector<12x128xf32>
    %682 = arith.addf %678, %681 : vector<12x128xf32>
    %683 = vector.extract_strided_slice %682 {offsets = [0, 0], sizes = [4, 128], strides = [1, 1]} : vector<12x128xf32> to vector<4x128xf32>
    %684 = vector.extract_strided_slice %682 {offsets = [4, 0], sizes = [4, 128], strides = [1, 1]} : vector<12x128xf32> to vector<4x128xf32>
    %cst_277 = arith.constant 0.000000e+00 : f32
    %685 = vector.broadcast %cst_277 : f32 to vector<4x128xf32>
    %686 = arith.maximumf %683, %685 : vector<4x128xf32>
    %687 = math.absf %683 : vector<4x128xf32>
    %cst_278 = arith.constant 0.000000e+00 : f32
    %688 = vector.broadcast %cst_278 : f32 to vector<4x128xf32>
    %689 = arith.subf %688, %687 : vector<4x128xf32>
    %690 = math.exp %689 : vector<4x128xf32>
    %cst_279 = arith.constant 1.000000e+00 : f32
    %691 = vector.broadcast %cst_279 : f32 to vector<4x128xf32>
    %692 = arith.addf %691, %690 : vector<4x128xf32>
    %693 = math.log %692 : vector<4x128xf32>
    %694 = arith.addf %686, %693 : vector<4x128xf32>
    %cst_280 = arith.constant 2.885390e+00 : f32
    %695 = vector.broadcast %cst_280 : f32 to vector<4x128xf32>
    %696 = arith.mulf %695, %694 : vector<4x128xf32>
    %c7 = arith.constant 7 : index
    %c0_281 = arith.constant 0 : index
    %697 = vector.load %arg1[%c7, %c0_281] : memref<8x128xf32, #tpu.memory_space<vmem>>, vector<1x128xf32>
    %698 = arith.subf %697, %649 : vector<1x128xf32>
    %cst_282 = arith.constant 0.159154937 : f32
    %699 = vector.broadcast %cst_282 : f32 to vector<1x128xf32>
    %700 = arith.mulf %698, %699 : vector<1x128xf32>
    %701 = math.floor %700 : vector<1x128xf32>
    %cst_283 = arith.constant 6.28318548 : f32
    %702 = vector.broadcast %cst_283 : f32 to vector<1x128xf32>
    %703 = arith.mulf %702, %701 : vector<1x128xf32>
    %704 = arith.subf %698, %703 : vector<1x128xf32>
    %cst_284 = arith.constant 0.159154937 : f32
    %705 = vector.broadcast %cst_284 : f32 to vector<1x128xf32>
    %706 = arith.mulf %704, %705 : vector<1x128xf32>
    %cst_285 = arith.constant 9.99999997E-7 : f32
    %cst_286 = arith.constant 0.999998986 : f32
    %707 = vector.broadcast %cst_285 : f32 to vector<1x128xf32>
    %708 = arith.maximumf %707, %706 : vector<1x128xf32>
    %709 = vector.broadcast %cst_286 : f32 to vector<1x128xf32>
    %710 = arith.minimumf %709, %708 : vector<1x128xf32>
    %711 = math.log %710 : vector<1x128xf32>
    %cst_287 = arith.constant 1.000000e+00 : f32
    %712 = vector.broadcast %cst_287 : f32 to vector<1x128xf32>
    %713 = arith.subf %712, %710 : vector<1x128xf32>
    %714 = math.log %713 : vector<1x128xf32>
    %715 = arith.subf %711, %714 : vector<1x128xf32>
    %716 = vector.broadcast %715 : vector<1x128xf32> to vector<4x128xf32>
    %717 = arith.mulf %696, %716 : vector<4x128xf32>
    %718 = arith.addf %717, %684 : vector<4x128xf32>
    %cst_288 = arith.constant 0.000000e+00 : f32
    %719 = vector.broadcast %cst_288 : f32 to vector<4x128xf32>
    %720 = arith.subf %719, %718 : vector<4x128xf32>
    %721 = math.exp %720 : vector<4x128xf32>
    %cst_289 = arith.constant 1.000000e+00 : f32
    %722 = vector.broadcast %cst_289 : f32 to vector<4x128xf32>
    %723 = arith.addf %722, %721 : vector<4x128xf32>
    %cst_290 = arith.constant 1.000000e+00 : f32
    %724 = vector.broadcast %cst_290 : f32 to vector<4x128xf32>
    %725 = arith.divf %724, %723 : vector<4x128xf32>
    %726 = arith.mulf %696, %725 : vector<4x128xf32>
    %cst_291 = arith.constant 1.000000e+00 : f32
    %727 = vector.broadcast %cst_291 : f32 to vector<4x128xf32>
    %728 = arith.subf %727, %725 : vector<4x128xf32>
    %729 = arith.mulf %726, %728 : vector<4x128xf32>
    %730 = vector.extract_strided_slice %682 {offsets = [8, 0], sizes = [4, 128], strides = [1, 1]} : vector<12x128xf32> to vector<4x128xf32>
    %cst_292 = arith.constant dense<0xFF800000> : vector<128xf32>
    %731 = vector.multi_reduction <maximumf>, %730, %cst_292 [0] : vector<4x128xf32> to vector<128xf32>
    %732 = vector.shape_cast %731 : vector<128xf32> to vector<1x128xf32>
    %733 = vector.broadcast %732 : vector<1x128xf32> to vector<4x128xf32>
    %734 = arith.subf %730, %733 : vector<4x128xf32>
    %735 = math.exp %734 : vector<4x128xf32>
    %cst_293 = arith.constant dense<0.000000e+00> : vector<128xf32>
    %736 = vector.multi_reduction <add>, %735, %cst_293 [0] : vector<4x128xf32> to vector<128xf32>
    %737 = vector.shape_cast %736 : vector<128xf32> to vector<1x128xf32>
    %738 = vector.broadcast %737 : vector<1x128xf32> to vector<4x128xf32>
    %739 = arith.divf %735, %738 : vector<4x128xf32>
    %cst_294 = arith.constant 0.959999978 : f32
    %740 = vector.broadcast %cst_294 : f32 to vector<4x128xf32>
    %741 = arith.mulf %740, %739 : vector<4x128xf32>
    %cst_295 = arith.constant 0.00999999977 : f32
    %742 = vector.broadcast %cst_295 : f32 to vector<4x128xf32>
    %743 = arith.addf %742, %741 : vector<4x128xf32>
    %744 = arith.mulf %743, %725 : vector<4x128xf32>
    %cst_296 = arith.constant dense<0.000000e+00> : vector<128xf32>
    %745 = vector.multi_reduction <add>, %744, %cst_296 [0] : vector<4x128xf32> to vector<128xf32>
    %746 = vector.shape_cast %745 : vector<128xf32> to vector<1x128xf32>
    %747 = arith.mulf %743, %729 : vector<4x128xf32>
    %cst_297 = arith.constant dense<0.000000e+00> : vector<128xf32>
    %748 = vector.multi_reduction <add>, %747, %cst_297 [0] : vector<4x128xf32> to vector<128xf32>
    %749 = vector.shape_cast %748 : vector<128xf32> to vector<1x128xf32>
    %cst_298 = arith.constant 6.28318548 : f32
    %750 = vector.broadcast %cst_298 : f32 to vector<1x128xf32>
    %751 = arith.mulf %750, %746 : vector<1x128xf32>
    %752 = arith.addf %751, %649 : vector<1x128xf32>
    %cst_299 = arith.constant 0.159154937 : f32
    %753 = vector.broadcast %cst_299 : f32 to vector<1x128xf32>
    %754 = arith.mulf %752, %753 : vector<1x128xf32>
    %755 = math.floor %754 : vector<1x128xf32>
    %cst_300 = arith.constant 6.28318548 : f32
    %756 = vector.broadcast %cst_300 : f32 to vector<1x128xf32>
    %757 = arith.mulf %756, %755 : vector<1x128xf32>
    %758 = arith.subf %752, %757 : vector<1x128xf32>
    %cst_301 = arith.constant 1.000000e-30 : f32
    %759 = vector.broadcast %cst_301 : f32 to vector<1x128xf32>
    %760 = arith.maximumf %749, %759 : vector<1x128xf32>
    %761 = math.log %760 : vector<1x128xf32>
    %762 = arith.subf %761, %711 : vector<1x128xf32>
    %763 = arith.subf %762, %714 : vector<1x128xf32>
    %764 = arith.addf %655, %763 : vector<1x128xf32>
    %c7_302 = arith.constant 7 : index
    %c0_303 = arith.constant 0 : index
    %765 = vector.load %arg7[%c7_302, %c0_303] : memref<8x128xf32, #tpu.memory_space<vmem>>, vector<1x128xf32>
    tpu.vector_store %arg7[%c7_302, %c0_303], %758 {strides = array<i32>} : memref<8x128xf32, #tpu.memory_space<vmem>>, vector<1x128xf32>,
    %c0_304 = arith.constant 0 : index
    %c0_305 = arith.constant 0 : index
    %766 = vector.load %arg8[%c0_304, %c0_305] : memref<1x128xf32, #tpu.memory_space<vmem>>, vector<1x128xf32>
    tpu.vector_store %arg8[%c0_304, %c0_305], %764 {strides = array<i32>} : memref<1x128xf32, #tpu.memory_space<vmem>>, vector<1x128xf32>,
    return
  }
  func.func @transform_0(%arg0: i32) -> (i32, i32) {
    %c0_i32 = arith.constant 0 : i32
    %c0_i32_0 = arith.constant 0 : i32
    return %c0_i32, %arg0 : i32, i32
  }
  func.func @transform_1(%arg0: i32) -> (i32, i32, i32) {
    %c0_i32 = arith.constant 0 : i32
    %c0_i32_0 = arith.constant 0 : i32
    %c0_i32_1 = arith.constant 0 : i32
    %c0_i32_2 = arith.constant 0 : i32
    return %c0_i32, %c0_i32_0, %c0_i32_1 : i32, i32, i32
  }
  func.func @transform_2(%arg0: i32) -> (i32, i32, i32) {
    %c0_i32 = arith.constant 0 : i32
    %c0_i32_0 = arith.constant 0 : i32
    %c0_i32_1 = arith.constant 0 : i32
    %c0_i32_2 = arith.constant 0 : i32
    return %c0_i32, %c0_i32_0, %c0_i32_1 : i32, i32, i32
  }
  func.func @transform_3(%arg0: i32) -> (i32, i32, i32) {
    %c0_i32 = arith.constant 0 : i32
    %c0_i32_0 = arith.constant 0 : i32
    %c0_i32_1 = arith.constant 0 : i32
    %c0_i32_2 = arith.constant 0 : i32
    return %c0_i32, %c0_i32_0, %c0_i32_1 : i32, i32, i32
  }
  func.func @transform_4(%arg0: i32) -> (i32, i32, i32) {
    %c0_i32 = arith.constant 0 : i32
    %c0_i32_0 = arith.constant 0 : i32
    %c0_i32_1 = arith.constant 0 : i32
    %c0_i32_2 = arith.constant 0 : i32
    return %c0_i32, %c0_i32_0, %c0_i32_1 : i32, i32, i32
  }
  func.func @transform_5(%arg0: i32) -> (i32, i32, i32) {
    %c0_i32 = arith.constant 0 : i32
    %c0_i32_0 = arith.constant 0 : i32
    %c0_i32_1 = arith.constant 0 : i32
    %c0_i32_2 = arith.constant 0 : i32
    return %c0_i32, %c0_i32_0, %c0_i32_1 : i32, i32, i32
  }
  func.func @transform_6(%arg0: i32) -> (i32, i32) {
    %c0_i32 = arith.constant 0 : i32
    %c0_i32_0 = arith.constant 0 : i32
    return %c0_i32, %arg0 : i32, i32
  }
  func.func @transform_7(%arg0: i32) -> (i32, i32) {
    %c0_i32 = arith.constant 0 : i32
    %c0_i32_0 = arith.constant 0 : i32
    return %c0_i32, %arg0 : i32, i32
  }
}

</mosaic_0001>

<bundles_post_ra>
// kernel: tpu_custom_call.1
= control target key start
LH: loop header
LB: loop body
LE: loop exit
PB: predicated region body
PF: predicated region fallthrough
CT: control target
= control target key end

     0   :  { %13 = vsyncpa [#allocation3], 0  ;;  %v4200_v2 = vmov 0   ;;  %s5063_s0 = inlined_call_operand.vmem [shape: f32[8,128], index: 0, kind: input, shape index: {}]   ;;  %s5064_s1 = inlined_call_operand.vmem [shape: f32[7,32,1], index: 1, kind: input, shape index: {}]   ;;  %s5065_s2 = inlined_call_operand.vmem [shape: f32[7,32,1], index: 2, kind: input, shape index: {}]   ;;  %s5066_s3 = inlined_call_operand.vmem [shape: f32[7,12,32], index: 3, kind: input, shape index: {}]   ;;  %s5067_s4 = inlined_call_operand.vmem [shape: f32[7,32,1], index: 4, kind: input, shape index: {}]   ;;  %s5068_s5 = inlined_call_operand.vmem [shape: f32[7,12,1], index: 5, kind: input, shape index: {}]   ;;  %s5069_s6 = inlined_call_operand.hbm [shape: f32[8,128], index: 6, kind: output, shape index: {0}]   ;;  %s5070_s7 = inlined_call_operand.hbm [shape: f32[1,128], index: 7, kind: output, shape index: {1}]  }
   0x1   :  { %v269_v0 = vld [vmem:[%s5065_s2] sm:$0xff]  ;;  %3941 = vset.pattern.permute.xlu1 %v4200_v2  ;;  %3940 = vset.pattern.permute.xlu0 %v4200_v2  ;;  %v270_v3 = vld [vmem:[%s5065_s2 + $0x8] sm:$0xff]  ;;  %v240_v5 = vld [vmem:[%s5064_s1 + $0x18] sm:$0xff] }
   0x2   :  { %v237_v1 = vld [vmem:[%s5064_s1] sm:$0xff]  ;;  %275 = vperm.xlu1 %3941, %v269_v0   ;;  %v238_v4 = vld [vmem:[%s5064_s1 + $0x8] sm:$0xff]  ;;  %v239_v6 = vld [vmem:[%s5064_s1 + $0x10] sm:$0xff] }
   0x3   :  { %243 = vperm.xlu0 %3940, %v237_v1   ;;  %v272_v7 = vld [vmem:[%s5065_s2 + $0x18] sm:$0xff]  ;;  %v271_v8 = vld [vmem:[%s5065_s2 + $0x10] sm:$0xff]  ;;  %v306_v9 = vld [vmem:[%s5067_s4 + $0x8] sm:$0xff] }
   0x4   :  { %v305_v10 = vld [vmem:[%s5067_s4] sm:$0xff]  ;;  %v308_v11 = vld [vmem:[%s5067_s4 + $0x18] sm:$0xff]  ;;  %v307_v12 = vld [vmem:[%s5067_s4 + $0x10] sm:$0xff] }
   0x5   :  { %v4288_v13 = vld [vmem:[%s5063_s0] sm:$0x1]  ;;  %v340_v15 = vld [vmem:[%s5068_s5 + $0x8] sm:$0xf] }
   0x6   :  { %280 = vperm.xlu1 %3941, %v270_v3   ;;  %v4292_v14 = vsub.f32 %v4288_v13, %v4288_v13  ;;  %28 = vst [vmem:[#allocation2] sm:$0x1] %v4288_v13  ;;  %v339_v16 = vld [vmem:[%s5068_s5] sm:$0xff]  ;;  %v3581_v19 = vld [vmem:[%s5064_s1 + $0x28] sm:$0xff] }
   0x7   :  { %248 = vperm.xlu0 %3940, %v238_v4   ;;  %v3580_v20 = vld [vmem:[%s5064_s1 + $0x20] sm:$0xff] }
   0x8   :  { %v33_v17 = vand.u32 2139095040, %v4292_v14 }
   0xa   :  { %258 = vperm.xlu1 %3941, %v240_v5   ;;  %v34_v18 = vshrl.u32 %v33_v17, 23 }
   0xb   :  { %253 = vperm.xlu0 %3940, %v239_v6  }
   0xe   :  { %290 = vperm.xlu1 %3941, %v272_v7  }
   0xf   :  { %285 = vperm.xlu0 %3940, %v271_v8  }
  0x12   :  { %316 = vperm.xlu1 %3941, %v306_v9  }
  0x13   :  { %311 = vperm.xlu0 %3940, %v305_v10  }
  0x16   :  { %326 = vperm.xlu1 %3941, %v308_v11  }
  0x17   :  { %321 = vperm.xlu0 %3940, %v307_v12  }
  0x1a   :  { %348 = vperm.xlu1 %3941, %v340_v15  }
  0x1b   :  { %343 = vperm.xlu0 %3940, %v339_v16  }
  0x1c   :  { %14 = vsyncpa [#allocation5], 0  ;;  %v3562_v21 = vadd.s32 4294967169, %v34_v18  ;;  %v30_v22 = vand.u32 2147483647, %v4292_v14  ;;  %v3585_v24 = vld [vmem:[%s5065_s2 + $0x28] sm:$0xff] }
  0x1d   :  { %v3584_v25 = vld [vmem:[%s5065_s2 + $0x20] sm:$0xff]  ;;  %v3583_v29 = vld [vmem:[%s5064_s1 + $0x38] sm:$0xff]  ;;  %v3582_v30 = vld [vmem:[%s5064_s1 + $0x30] sm:$0xff]  ;;  %v4201_v33 = vmov 683565275   ;;  %vm351_vm3 = vcmask 261120  }
  0x1e   :  { %747 = vperm.xlu1 %3941, %v3581_v19   ;;  %v40_v23 = vadd.s32 1, %v3562_v21  ;;  %v37_v27 = vand.u32 8388607, %v30_v22  ;;  %v4202_v35 = vmov 2475754826   ;;  %v3587_v47 = vld [vmem:[%s5065_s2 + $0x38] sm:$0xff] }
  0x1f   :  { %742 = vperm.xlu0 %3940, %v3580_v20   ;;  %v4203_v37 = vmov 2131351028   ;;  %v4204_v39 = vmov 2102212464   ;;  %v4205_v41 = vmov 920167782  }
  0x20   :  { %vm41_vm0 = vcmp.gt.s32.totalorder %v40_v23, 0  ;;  %v38_v43 = vor.u32 8388608, %v37_v27  ;;  %v3586_v48 = vld [vmem:[%s5065_s2 + $0x30] sm:$0xff]  ;;  %v4206_v51 = vmov 1326507024   ;;  %v337_v53 = vld [vmem:[%s5066_s3] sm:$0xff] }
  0x21   :  { %v42_v26 = vsel %vm41_vm0, %v40_v23, 0  ;;  %3778 = vmatprep.mubr.msk.f32.mxu0 %vm351_vm3, %v337_v53  ;;  %v3589_v59 = vld [vmem:[%s5067_s4 + $0x28] sm:$0xff]  ;;  %v3588_v60 = vld [vmem:[%s5067_s4 + $0x20] sm:$0xff]  ;;  %v3591_v16 = vld [vmem:[%s5067_s4 + $0x38] sm:$0xff]  ;;  %vm32_vm8 = vcmp.lt.s32.totalorder %v4292_v14, 0  ;;  %vm122_vm0 = vweird.f32 %v4292_v14 }
  0x22   :  { %780 = vperm.xlu1 %3941, %v3585_v24   ;;  %v44_v28 = vand.u32 31, %v42_v26  ;;  %v43_v31 = vshrl.u32 %v42_v26, 5  ;;  %v78_v63 = vshll.u32 %v38_v43, 8  ;;  %v3590_v17 = vld [vmem:[%s5067_s4 + $0x30] sm:$0xff]  ;;  %v3595_v20 = vld [vmem:[%s5068_s5 + $0x18] sm:$0xf] }
  0x23   :  { %775 = vperm.xlu0 %3940, %v3584_v25   ;;  %v3594_v21 = vld [vmem:[%s5068_s5 + $0x10] sm:$0xff]  ;;  %v3607_v25 = vld [vmem:[%s5064_s1 + $0x48] sm:$0xff]  ;;  %v3606_v26 = vld [vmem:[%s5064_s1 + $0x40] sm:$0xff]  ;;  %vm31_vm9 = vcmp.le.f32.partialorder %v30_v22, 0.7853982 }
  0x24   :  { %v45_v32 = vsub.s32 32, %v44_v28  ;;  %v47_v34 = vshll.u32 %v4201_v33, %v44_v28  ;;  %v50_v36 = vshll.u32 %v4202_v35, %v44_v28  ;;  %v53_v38 = vshll.u32 %v4203_v37, %v44_v28  ;;  %v3612_v43 = vld [vmem:[%s5065_s2 + $0x50] sm:$0xff]  ;;  %v3621_v53 = vld [vmem:[%s5068_s5 + $0x28] sm:$0xf] }
  0x25   :  { %v56_v40 = vshll.u32 %v4204_v39, %v44_v28  ;;  %v59_v42 = vshll.u32 %v4205_v41, %v44_v28  ;;  %vm62_vm1 = vcmp.lt.s32.totalorder %v43_v31, 1  ;;  %vm65_vm2 = vcmp.lt.s32.totalorder %v43_v31, 4 }
  0x26   :  { %757 = vperm.xlu1 %3941, %v3583_v29   ;;  %v46_v44 = vshrl.u32 %v4201_v33, %v45_v32  ;;  %v48_v45 = vshrl.u32 %v4202_v35, %v45_v32  ;;  %v51_v46 = vshrl.u32 %v4203_v37, %v45_v32  ;;  %v54_v49 = vshrl.u32 %v4204_v39, %v45_v32  ;;  %v3611_v29 = vld [vmem:[%s5065_s2 + $0x48] sm:$0xff] }
  0x27   :  { %752 = vperm.xlu0 %3940, %v3582_v30   ;;  %v57_v50 = vshrl.u32 %v4205_v41, %v45_v32  ;;  %v60_v52 = vshrl.u32 %v4206_v51, %v45_v32  ;;  %vm64_vm4 = vcmp.lt.s32.totalorder %v43_v31, 3  ;;  %vm63_vm5 = vcmp.lt.s32.totalorder %v43_v31, 2  ;;  %v3610_v30 = vld [vmem:[%s5065_s2 + $0x40] sm:$0xff] }
  0x28   :  { %v49_v54 = vor.u32 %v48_v45, %v47_v34  ;;  %v52_v55 = vor.u32 %v51_v46, %v50_v36  ;;  %v55_v56 = vor.u32 %v54_v49, %v53_v38  ;;  %v3609_v34 = vld [vmem:[%s5064_s1 + $0x58] sm:$0xff]  ;;  %v3608_v36 = vld [vmem:[%s5064_s1 + $0x50] sm:$0xff]  ;;  %v3615_v46 = vld [vmem:[%s5067_s4 + $0x48] sm:$0xff] }
  0x29   :  { %v58_v57 = vor.u32 %v57_v50, %v56_v40  ;;  %v61_v58 = vor.u32 %v60_v52, %v59_v42  ;;  %v3613_v42 = vld [vmem:[%s5065_s2 + $0x58] sm:$0xff]  ;;  %v3616_v50 = vld [vmem:[%s5067_s4 + $0x50] sm:$0xff] }
  0x2a   :  { %790 = vperm.xlu1 %3941, %v3587_v47   ;;  %v66_v61 = vsel %vm62_vm1, %v46_v44, %v49_v54  ;;  %v70_v62 = vsel %vm62_vm1, %v49_v54, %v52_v55  ;;  %v67_v0 = vsel %vm65_vm2, %v55_v56, 2102212464  ;;  %v74_v2 = vsel %vm62_vm1, %v52_v55, %v55_v56  ;;  %v3614_v47 = vld [vmem:[%s5067_s4 + $0x40] sm:$0xff]  ;;  %v3617_v49 = vld [vmem:[%s5067_s4 + $0x58] sm:$0xff] }
  0x2b   :  { %785 = vperm.xlu0 %3940, %v3586_v48   ;;  %v71_v1 = vsel %vm65_vm2, %v58_v57, 920167782  ;;  %v75_v3 = vsel %vm65_vm2, %v61_v58, 1326507024  ;;  %v68_v4 = vsel %vm64_vm4, %v52_v55, %v67_v0  ;;  %v3620_v54 = vld [vmem:[%s5068_s5 + $0x20] sm:$0xff]  ;;  %v3633_v58 = vld [vmem:[%s5064_s1 + $0x68] sm:$0xff] }
  0x2c   :  { %v72_v5 = vsel %vm64_vm4, %v55_v56, %v71_v1  ;;  %v76_v6 = vsel %vm64_vm4, %v58_v57, %v75_v3  ;;  %v69_v7 = vsel %vm63_vm5, %v66_v61, %v68_v4  ;;  %v3636_v0 = vld [vmem:[%s5065_s2 + $0x60] sm:$0xff]  ;;  %v3635_v3 = vld [vmem:[%s5064_s1 + $0x78] sm:$0xff]  ;;  %v3634_v4 = vld [vmem:[%s5064_s1 + $0x70] sm:$0xff]  ;;  %vm476_vm1 = vcmask 1043456  }
  0x2d   :  { %v73_v8 = vsel %vm63_vm5, %v70_v62, %v72_v5  ;;  %v77_v9 = vsel %vm63_vm5, %v74_v2, %v76_v6  ;;  %v85_v18 = vmul.u32 %v78_v63, %v69_v7  ;;  %v3639_v7 = vld [vmem:[%s5065_s2 + $0x78] sm:$0xff] }
  0x2e   :  { %817 = vperm.xlu1 %3941, %v3589_v59   ;;  %v4359_v10 = vmul.u32.u64.low %v78_v63, %v77_v9  ;;  %v4360_v11 = vmul.u32.u64.high %v78_v63, %v77_v9, %v4359_v10  ;;  %v4362_v12 = vmul.u32.u64.low %v78_v63, %v73_v8  ;;  %v4363_v15 = vmul.u32.u64.high %v78_v63, %v73_v8, %v4362_v12  ;;  %v3632_v59 = vld [vmem:[%s5064_s1 + $0x60] sm:$0xff]  ;;  %v3637_v63 = vld [vmem:[%s5065_s2 + $0x68] sm:$0xff]  ;;  %v3638_v8 = vld [vmem:[%s5065_s2 + $0x70] sm:$0xff] }
  0x2f   :  { %812 = vperm.xlu0 %3940, %v3588_v60   ;;  %v3641_v10 = vld [vmem:[%s5067_s4 + $0x68] sm:$0xff] }
  0x30   :  { %vm87_vm6 = vc.u32 %v4360_v11, %v4362_v12  ;;  %v88_v19 = vadd.s32 1, %v4363_v15  ;;  %v86_v55 = vadd.s32 %v4362_v12, %v4360_v11  ;;  %v3640_v11 = vld [vmem:[%s5067_s4 + $0x60] sm:$0xff] }
  0x32   :  { %827 = vperm.xlu1 %3941, %v3591_v16   ;;  %v89_v23 = vsel %vm87_vm6, %v88_v19, %v4363_v15  ;;  %v3643_v15 = vld [vmem:[%s5067_s4 + $0x78] sm:$0xff]  ;;  %v3642_v16 = vld [vmem:[%s5067_s4 + $0x70] sm:$0xff] }
  0x33   :  { %822 = vperm.xlu0 %3940, %v3590_v17   ;;  %v90_v24 = vadd.s32 %v89_v23, %v85_v18  ;;  %v3659_v23 = vld [vmem:[%s5064_s1 + $0x88] sm:$0xff] }
  0x35   :  { %v91_v27 = vadd.s32 536870912, %v90_v24 }
  0x36   :  { %851 = vperm.xlu1 %3941, %v3595_v20   ;;  %v3647_v20 = vld [vmem:[%s5068_s5 + $0x38] sm:$0xf] }
  0x37   :  { %846 = vperm.xlu0 %3940, %v3594_v21   ;;  %v4386_v28 = vshrl.u32 %v91_v27, 30  ;;  %v3646_v21 = vld [vmem:[%s5068_s5 + $0x30] sm:$0xff]  ;;  %v3662_v27 = vld [vmem:[%s5065_s2 + $0x80] sm:$0xff] }
  0x39   :  { %v93_v31 = vshll.u32 %v4386_v28, 30  ;;  %v116_v18 = vsub.s32 4, %v4386_v28 }
  0x3a   :  { %1248 = vperm.xlu1 %3941, %v3607_v25  }
  0x3b   :  { %1243 = vperm.xlu0 %3940, %v3606_v26   ;;  %v94_v32 = vsub.s32 %v90_v24, %v93_v31  ;;  %v117_v22 = vsel %vm32_vm8, %v116_v18, %v4386_v28  ;;  %v3658_v24 = vld [vmem:[%s5064_s1 + $0x80] sm:$0xff]  ;;  %v3663_v26 = vld [vmem:[%s5065_s2 + $0x88] sm:$0xff]  ;;  %v3660_v31 = vld [vmem:[%s5064_s1 + $0x90] sm:$0xff] }
  0x3c   :  { %v119_v25 = vsel %vm31_vm9, 0, %v117_v22 }
  0x3d   :  { %v96_v38 = vsub.s32 0, %v94_v32  ;;  %v226_v28 = vadd.s32 3, %v119_v25 }
  0x3e   :  { %1281 = vperm.xlu1 %3941, %v3611_v29  }
  0x3f   :  { %1276 = vperm.xlu0 %3940, %v3610_v30   ;;  %v3563_v40 = vmin.u32 %v96_v38, %v94_v32  ;;  %v3661_v30 = vld [vmem:[%s5064_s1 + $0x98] sm:$0xff] }
  0x40   :  { %v3665_v38 = vld [vmem:[%s5065_s2 + $0x98] sm:$0xff] }
  0x41   :  { %v98_v44 = vclz %v3563_v40  ;;  %v3664_v40 = vld [vmem:[%s5065_s2 + $0x90] sm:$0xff] }
  0x42   :  { %1258 = vperm.xlu1 %3941, %v3609_v34   ;;  %v227_v34 = vand.u32 3, %v226_v28  ;;  %v3686_v28 = vld [vmem:[%s5064_s1 + $0xb0] sm:$0xff] }
  0x43   :  { %1253 = vperm.xlu0 %3940, %v3608_v36   ;;  %v3564_v45 = vadd.s32 4294967294, %v98_v44  ;;  %v123_v36 = vand.u32 3, %v119_v25 }
  0x44   :  { %vm229_vm10 = vcmp.eq.s32.totalorder %v227_v34, 0  ;;  %vm232_vm11 = vcmp.eq.s32.totalorder %v227_v34, 2  ;;  %vm228_vm14 = vcmp.lt.s32.totalorder %v227_v34, 2 }
  0x45   :  { %vm3565_vm7 = vcmp.lt.s32.totalorder %v3564_v45, 0  ;;  %vm125_vm12 = vcmp.eq.s32.totalorder %v123_v36, 0  ;;  %vm128_vm13 = vcmp.eq.s32.totalorder %v123_v36, 2  ;;  %vm124_vm15 = vcmp.lt.s32.totalorder %v123_v36, 2 }
  0x46   :  { %1291 = vperm.xlu1 %3941, %v3613_v42   ;;  %v101_v48 = vsel %vm3565_vm7, 0, %v3564_v45  ;;  %v261_v42 = vlaneseq }
  0x47   :  { %1286 = vperm.xlu0 %3940, %v3612_v43   ;;  %v106_v52 = vsub.s32 4294967266, %v101_v48  ;;  %v102_v56 = vsub.s32 32, %v101_v48  ;;  %v103_v60 = vshll.u32 %v94_v32, %v101_v48 }
  0x49   :  { %v107_v57 = vadd.s32 127, %v106_v52  ;;  %v104_v61 = vshrl.u32 %v86_v55, %v102_v56  ;;  %v262_v52 = vshrl.u32 %v261_v42, 7  ;;  %v3693_v42 = vld [vmem:[%s5067_s4 + $0xa8] sm:$0xff] }
  0x4a   :  { %1318 = vperm.xlu1 %3941, %v3615_v46  }
  0x4b   :  { %1313 = vperm.xlu0 %3940, %v3614_v47   ;;  %v108_v62 = vshll.u32 %v107_v57, 23  ;;  %v105_v1 = vor.u32 %v104_v61, %v103_v60  ;;  %v3669_v57 = vld [vmem:[%s5067_s4 + $0x98] sm:$0xff] }
  0x4d   :  { %v109_v2 = vor.u32 4788187, %v108_v62  ;;  %v112_v6 = vcvt.s32.f32 %v105_v1 }
  0x4e   :  { %1328 = vperm.xlu1 %3941, %v3617_v49   ;;  %v3667_v49 = vld [vmem:[%s5067_s4 + $0x88] sm:$0xff] }
  0x4f   :  { %1323 = vperm.xlu0 %3940, %v3616_v50   ;;  %v110_v5 = vand.u32 2147483647, %v109_v2  ;;  %v3666_v50 = vld [vmem:[%s5067_s4 + $0x80] sm:$0xff] }
  0x51   :  { %v113_v9 = vmul.f32 %v112_v6, %v110_v5  ;;  %v3685_v5 = vld [vmem:[%s5064_s1 + $0xa8] sm:$0xff]  ;;  %v3684_v6 = vld [vmem:[%s5064_s1 + $0xa0] sm:$0xff] }
  0x52   :  { %1352 = vperm.xlu1 %3941, %v3621_v53  }
  0x53   :  { %1347 = vperm.xlu0 %3940, %v3620_v54   ;;  %v114_v12 = vxor.u32 2147483648, %v113_v9 }
  0x55   :  { %v115_v17 = vsel %vm32_vm8, %v114_v12, %v113_v9 }
  0x56   :  { %1749 = vperm.xlu1 %3941, %v3633_v58   ;;  %v118_v19 = vsel %vm31_vm9, %v4292_v14, %v115_v17  ;;  %v3668_v58 = vld [vmem:[%s5067_s4 + $0x90] sm:$0xff]  ;;  %v3673_v14 = vld [vmem:[%s5068_s5 + $0x48] sm:$0xf] }
  0x57   :  { %1744 = vperm.xlu0 %3940, %v3632_v59   ;;  %3942 = vcosq.f32 %v118_v19  ;;  %v4515_v59 = vsub.s32 0, %v262_v52  ;;  %v3699_v52 = vld [vmem:[%s5068_s5 + $0x58] sm:$0xf] }
  0x58   :  { %3944 = vsinq.f32 %v118_v19 }
  0x5a   :  { %1782 = vperm.xlu1 %3941, %v3637_v63  }
  0x5b   :  { %1777 = vperm.xlu0 %3940, %v3636_v0   ;;  %v3672_v0 = vld [vmem:[%s5068_s5 + $0x40] sm:$0xff] }
  0x5e   :  { %1759 = vperm.xlu1 %3941, %v3635_v3  }
  0x5f   :  { %1754 = vperm.xlu0 %3940, %v3634_v4  }
  0x61   :  { %v3943_v29 = vpop.eup %3942 }
  0x62   :  { %1792 = vperm.xlu1 %3941, %v3639_v7   ;;  %v3945_v32 = vpop.eup %3944  ;;  %v129_v44 = vxor.u32 2147483648, %v3943_v29 }
  0x63   :  { %1787 = vperm.xlu0 %3940, %v3638_v8   ;;  %v126_v43 = vxor.u32 2147483648, %v3945_v32 }
  0x64   :  { %v234_v46 = vsel %vm232_vm11, %v129_v44, %v3945_v32  ;;  %v130_v48 = vsel %vm128_vm13, %v129_v44, %v3945_v32 }
  0x65   :  { %v231_v45 = vsel %vm229_vm10, %v3943_v29, %v126_v43  ;;  %v127_v47 = vsel %vm125_vm12, %v3943_v29, %v126_v43  ;;  %v3692_v43 = vld [vmem:[%s5067_s4 + $0xa0] sm:$0xff] }
  0x66   :  { %1819 = vperm.xlu1 %3941, %v3641_v10   ;;  %v235_v55 = vsel %vm228_vm14, %v231_v45, %v234_v46  ;;  %v131_v56 = vsel %vm124_vm15, %v127_v47, %v130_v48  ;;  %v3695_v46 = vld [vmem:[%s5067_s4 + $0xb8] sm:$0xff]  ;;  %v3694_v48 = vld [vmem:[%s5067_s4 + $0xb0] sm:$0xff] }
  0x67   :  { %1814 = vperm.xlu0 %3940, %v3640_v11   ;;  %v236_v60 = vsel %vm122_vm0, nan, %v235_v55  ;;  %v132_v61 = vsel %vm122_vm0, nan, %v131_v56  ;;  %v338_v55 = vld [vmem:[%s5066_s3 + $0x8] sm:$0xf] }
  0x68   :  { %v296_v1 = vrot.slane %v236_v60, %v4515_v59  ;;  %v264_v2 = vrot.slane %v132_v61, %v4515_v59  ;;  %v3711_v56 = vld [vmem:[%s5064_s1 + $0xc8] sm:$0xff]  ;;  %v3714_v60 = vld [vmem:[%s5065_s2 + $0xc0] sm:$0xff]  ;;  %v3713_v61 = vld [vmem:[%s5064_s1 + $0xd8] sm:$0xff] }
  0x6a   :  { %1829 = vperm.xlu1 %3941, %v3643_v15   ;;  %v3689_v15 = vld [vmem:[%s5065_s2 + $0xa8] sm:$0xff] }
  0x6b   :  { %1824 = vperm.xlu0 %3940, %v3642_v16   ;;  %v3688_v16 = vld [vmem:[%s5065_s2 + $0xa0] sm:$0xff] }
  0x6e   :  { %1853 = vperm.xlu1 %3941, %v3647_v20  }
  0x6f   :  { %1848 = vperm.xlu0 %3940, %v3646_v21  }
  0x72   :  { %2250 = vperm.xlu1 %3941, %v3659_v23  }
  0x73   :  { %2245 = vperm.xlu0 %3940, %v3658_v24  }
  0x76   :  { %2283 = vperm.xlu1 %3941, %v3663_v26  }
  0x77   :  { %2278 = vperm.xlu0 %3940, %v3662_v27   ;;  %v3687_v27 = vld [vmem:[%s5064_s1 + $0xb8] sm:$0xff] }
  0x7a   :  { %2260 = vperm.xlu1 %3941, %v3661_v30  }
  0x7b   :  { %2255 = vperm.xlu0 %3940, %v3660_v31  }
  0x7e   :  { %2293 = vperm.xlu1 %3941, %v3665_v38   ;;  %v3691_v38 = vld [vmem:[%s5065_s2 + $0xb8] sm:$0xff] }
  0x7f   :  { %2288 = vperm.xlu0 %3940, %v3664_v40   ;;  %v3690_v40 = vld [vmem:[%s5065_s2 + $0xb0] sm:$0xff] }
  0x81   :  { %v276_v53 = vpop.permute.xlu1 %275 }
  0x82   :  { %v244_v54 = vpop.permute.xlu0 %243  ;;  %2320 = vperm.xlu1 %3941, %v3667_v49   ;;  %v297_v7 = vmul.f32 %v296_v1, %v276_v53 }
  0x83   :  { %2315 = vperm.xlu0 %3940, %v3666_v50   ;;  %v265_v8 = vmul.f32 %v264_v2, %v244_v54  ;;  %v3698_v54 = vld [vmem:[%s5068_s5 + $0x50] sm:$0xff] }
  0x85   :  { %v281_v62 = vpop.permute.xlu1 %280  ;;  %v301_v20 = vadd.f32 %v297_v7, %v265_v8 }
  0x86   :  { %v249_v63 = vpop.permute.xlu0 %248  ;;  %2330 = vperm.xlu1 %3941, %v3669_v57   ;;  %v298_v9 = vmul.f32 %v296_v1, %v281_v62  ;;  %v3710_v57 = vld [vmem:[%s5064_s1 + $0xc0] sm:$0xff]  ;;  %v3712_v62 = vld [vmem:[%s5064_s1 + $0xd0] sm:$0xff] }
  0x87   :  { %2325 = vperm.xlu0 %3940, %v3668_v58   ;;  %v266_v10 = vmul.f32 %v264_v2, %v249_v63  ;;  %v3715_v58 = vld [vmem:[%s5065_s2 + $0xc8] sm:$0xff]  ;;  %v3717_v63 = vld [vmem:[%s5065_s2 + $0xd8] sm:$0xff] }
  0x89   :  { %v259_v3 = vpop.permute.xlu1 %258  ;;  %v302_v19 = vadd.f32 %v298_v9, %v266_v10 }
  0x8a   :  { %v254_v4 = vpop.permute.xlu0 %253  ;;  %2354 = vperm.xlu1 %3941, %v3673_v14   ;;  %v268_v21 = vmul.f32 %v264_v2, %v259_v3  ;;  %v3716_v14 = vld [vmem:[%s5065_s2 + $0xd0] sm:$0xff] }
  0x8b   :  { %2349 = vperm.xlu0 %3940, %v3672_v0   ;;  %v267_v24 = vmul.f32 %v264_v2, %v254_v4  ;;  %v3719_v0 = vld [vmem:[%s5067_s4 + $0xc8] sm:$0xff]  ;;  %v3721_v2 = vld [vmem:[%s5067_s4 + $0xd8] sm:$0xff]  ;;  %v3720_v3 = vld [vmem:[%s5067_s4 + $0xd0] sm:$0xff] }
  0x8c   :  { %v3725_v4 = vld [vmem:[%s5068_s5 + $0x68] sm:$0xf] }
  0x8d   :  { %v291_v11 = vpop.permute.xlu1 %290 }
  0x8e   :  { %v286_v12 = vpop.permute.xlu0 %285  ;;  %2751 = vperm.xlu1 %3941, %v3685_v5   ;;  %v300_v17 = vmul.f32 %v296_v1, %v291_v11  ;;  %v3724_v5 = vld [vmem:[%s5068_s5 + $0x60] sm:$0xff] }
  0x8f   :  { %2746 = vperm.xlu0 %3940, %v3684_v6   ;;  %v299_v18 = vmul.f32 %v296_v1, %v286_v12  ;;  %v3718_v1 = vld [vmem:[%s5067_s4 + $0xc0] sm:$0xff] }
  0x90   :  { %v304_v29 = vadd.f32 %v300_v17, %v268_v21  ;;  %v443_v6 = vld [vmem:[%s5063_s0 + $0x1] sm:$0x1] }
  0x91   :  { %v317_v22 = vpop.permute.xlu1 %316  ;;  %v303_v30 = vadd.f32 %v299_v18, %v267_v24  ;;  %v444_v7 = vsub.f32 %v443_v6, %v4288_v13 }
  0x92   :  { %v312_v23 = vpop.permute.xlu0 %311  ;;  %v330_v25 = vadd.f32 %v317_v22, %v302_v19  ;;  %2784 = vperm.xlu1 %3941, %v3689_v15  }
  0x93   :  { %v329_v26 = vadd.f32 %v312_v23, %v301_v20  ;;  %2779 = vperm.xlu0 %3940, %v3688_v16   ;;  %v445_v8 = vmul.f32 0.15915494, %v444_v7 }
  0x94   :  { %3946 = vtanh.f32 %v330_v25 }
  0x95   :  { %3948 = vtanh.f32 %v329_v26  ;;  %v327_v31 = vpop.permute.xlu1 %326  ;;  %v446_v9 = vfloor.f32 %v445_v8 }
  0x96   :  { %v322_v32 = vpop.permute.xlu0 %321  ;;  %v332_v34 = vadd.f32 %v327_v31, %v304_v29  ;;  %2761 = vperm.xlu1 %3941, %v3687_v27  }
  0x97   :  { %v331_v36 = vadd.f32 %v322_v32, %v303_v30  ;;  %2756 = vperm.xlu0 %3940, %v3686_v28   ;;  %v447_v10 = vmul.f32 6.2831855, %v446_v9 }
  0x98   :  { %3950 = vtanh.f32 %v332_v34 }
  0x99   :  { %3952 = vtanh.f32 %v331_v36  ;;  %v448_v11 = vsub.f32 %v444_v7, %v447_v10  ;;  %v349_v15 = vpop.permute.xlu1 %348 }
  0x9a   :  { %2794 = vperm.xlu1 %3941, %v3691_v38   ;;  %v344_v17 = vpop.permute.xlu0 %343 }
  0x9b   :  { %2789 = vperm.xlu0 %3940, %v3690_v40   ;;  %v449_v12 = vmul.f32 0.15915494, %v448_v11 }
  0x9d   :  { %v450_v22 = vmax.f32 %v449_v12, 1e-06 }
  0x9e   :  { %v3947_v44 = vpop.eup %3946  ;;  %2821 = vperm.xlu1 %3941, %v3693_v42  }
  0x9f   :  { %2816 = vperm.xlu0 %3940, %v3692_v43   ;;  %v3949_v45 = vpop.eup %3948  ;;  %v451_v27 = vmin.f32 %v450_v22, 0.999999 }
  0xa0   :  { %v3847_v47 = vpack.c.bf16 %v3947_v44, %v3949_v45 }
  0xa1   :  { %v454_v31 = vsub.f32 1.0, %v451_v27 }
  0xa2   :  { %v3951_v49 = vpop.eup %3950  ;;  %3848 = vmatprep.subr.bf16.mxu0 %v3847_v47  ;;  %2831 = vperm.xlu1 %3941, %v3695_v46  }
  0xa3   :  { %v3953_v50 = vpop.eup %3952  ;;  %2826 = vperm.xlu0 %3940, %v3694_v48   ;;  %3850 = vmatpush3.bf16.msra.mxu0 %v3847_v47 }
  0xa4   :  { %v3851_v53 = vpack.c.bf16 %v3951_v49, %v3953_v50 }
  0xa6   :  { %3852 = vmatprep.subr.bf16.mxu0 %v3851_v53  ;;  %2855 = vperm.xlu1 %3941, %v3699_v52  }
  0xa7   :  { %2850 = vperm.xlu0 %3940, %v3698_v54   ;;  %3854 = vmatpush3.bf16.msra.mxu0 %v3851_v53 }
  0xaa   :  { %3779 = vmatmul.mubr.msk.f32.vlgmr.msra.gmra.mrb[0].mxu0 %vm351_vm3, %v338_v55  ;;  %3252 = vperm.xlu1 %3941, %v3711_v56  }
  0xab   :  { %3247 = vperm.xlu0 %3940, %v3710_v57  }
  0xae   :  { %3285 = vperm.xlu1 %3941, %v3715_v58  }
  0xaf   :  { %3280 = vperm.xlu0 %3940, %v3714_v60  }
  0xb2   :  { %3262 = vperm.xlu1 %3941, %v3713_v61  }
  0xb3   :  { %3257 = vperm.xlu0 %3940, %v3712_v62  }
  0xb6   :  { %3295 = vperm.xlu1 %3941, %v3717_v63  }
  0xb7   :  { %3290 = vperm.xlu0 %3940, %v3716_v14  }
  0xba   :  { %3322 = vperm.xlu1 %3941, %v3719_v0  }
  0xbb   :  { %3317 = vperm.xlu0 %3940, %v3718_v1  }
  0xbe   :  { %3332 = vperm.xlu1 %3941, %v3721_v2  }
  0xbf   :  { %3327 = vperm.xlu0 %3940, %v3720_v3  }
  0xc2   :  { %3356 = vperm.xlu1 %3941, %v3725_v4  }
  0xc3   :  { %3351 = vperm.xlu0 %3940, %v3724_v5  }
 0x17d   :  { %v3780_v16 = vpop.f32.mrb[0].mxu0 }
 0x17e   :  { %v430_v18 = vadd.f32 %v3780_v16, %v349_v15  ;;  %v424_v19 = vpop.f32.mrb[1].mxu0 }
 0x17f   :  { %v425_v20 = vadd.f32 %v424_v19, %v344_v17 }
 0x180   :  { %v477_v21 = vsel %vm476_vm1, %v430_v18, -inf }
 0x181   :  { %v478_v23 = vrot.slane %v477_v21, 4  ;;  %v434_v24 = vand.u32 2147483647, %v425_v20  ;;  %v433_v54 = vmax.f32 %v425_v20, 0.0  ;;  %v464_v63 = vrot.slane %v425_v20, 4 }
 0x183   :  { %v479_v25 = vmax.f32 %v477_v21, %v478_v23  ;;  %v435_v26 = vsub.f32 0.0, %v434_v24  ;;  %v3592_v23 = vld [vmem:[%s5066_s3 + $0x10] sm:$0xff] }
 0x184   :  { %3789 = vmatprep.mubr.msk.f32.mxu1 %vm351_vm3, %v3592_v23 }
 0x185   :  { %v480_v28 = vrot.slane %v479_v25, 2  ;;  %v436_v29 = vmul.f32 1.442695, %v435_v26 }
 0x187   :  { %v481_v30 = vmax.f32 %v479_v25, %v480_v28  ;;  %3954 = vpow2.f32 %v436_v29 }
 0x188   :  { %3956 = vlog2.f32 %v451_v27 }
 0x189   :  { %v482_v32 = vrot.slane %v481_v30, 1  ;;  %3958 = vlog2.f32 %v454_v31 }
 0x18b   :  { %v483_v34 = vmax.f32 %v481_v30, %v482_v32 }
 0x18d   :  { %v484_v36 = vsub.f32 %v430_v18, %v483_v34 }
 0x18f   :  { %v485_v38 = vmul.f32 1.442695, %v484_v36 }
 0x191   :  { %v3955_v40 = vpop.eup %3954  ;;  %3960 = vpow2.f32 %v485_v38 }
 0x192   :  { %v438_v42 = vadd.f32 1.0, %v3955_v40  ;;  %v3957_v43 = vpop.eup %3956 }
 0x193   :  { %v3959_v44 = vpop.eup %3958  ;;  %v4618_v45 = vmul.f32 0.6931472, %v3957_v43 }
 0x194   :  { %3962 = vlog2.f32 %v438_v42  ;;  %v4620_v46 = vmul.f32 0.6931472, %v3959_v44 }
 0x196   :  { %v457_v50 = vsub.f32 %v4618_v45, %v4620_v46 }
 0x198   :  { %v461_v58 = vrot.slane %v457_v50, %v4515_v59 }
 0x19b   :  { %v3961_v47 = vpop.eup %3960 }
 0x19c   :  { %v487_v48 = vsel %vm476_vm1, %v3961_v47, 0.0 }
 0x19d   :  { %v488_v49 = vrot.slane %v487_v48, 4 }
 0x19e   :  { %v3963_v52 = vpop.eup %3962 }
 0x19f   :  { %v489_v53 = vadd.f32 %v488_v49, %v487_v48  ;;  %v440_v55 = vmul.f32 0.6931472, %v3963_v52 }
 0x1a1   :  { %v490_v56 = vrot.slane %v489_v53, 2  ;;  %v441_v57 = vadd.f32 %v440_v55, %v433_v54 }
 0x1a3   :  { %v491_v60 = vadd.f32 %v490_v56, %v489_v53  ;;  %v442_v61 = vmul.f32 2.88539, %v441_v57 }
 0x1a5   :  { %v462_v62 = vmul.f32 %v461_v58, %v442_v61  ;;  %v492_v14 = vrot.slane %v491_v60, 1 }
 0x1a7   :  { %v466_v0 = vadd.f32 %v464_v63, %v462_v62  ;;  %v493_v2 = vadd.f32 %v492_v14, %v491_v60 }
 0x1a9   :  { %v467_v1 = vsub.f32 0.0, %v466_v0 }
 0x1ab   :  { %v468_v3 = vmul.f32 1.442695, %v467_v1 }
 0x1ad   :  { %3964 = vpow2.f32 %v468_v3 }
 0x1ae   :  { %3966 = vrcp.f32 %v493_v2 }
 0x1b7   :  { %v3965_v4 = vpop.eup %3964 }
 0x1b8   :  { %v3967_v5 = vpop.eup %3966  ;;  %v470_v6 = vadd.f32 1.0, %v3965_v4 }
 0x1b9   :  { %v495_v7 = vmul.f32 %v3967_v5, %v3961_v47 }
 0x1ba   :  { %3968 = vrcp.f32 %v470_v6 }
 0x1bb   :  { %v496_v8 = vmul.f32 0.96, %v495_v7 }
 0x1bd   :  { %v497_v9 = vadd.f32 0.01, %v496_v8 }
 0x1c4   :  { %v3969_v10 = vpop.eup %3968 }
 0x1c5   :  { %v473_v11 = vmul.f32 %v3969_v10, %v442_v61  ;;  %v474_v12 = vsub.f32 1.0, %v3969_v10  ;;  %v498_v15 = vmul.f32 %v3969_v10, %v497_v9 }
 0x1c7   :  { %v475_v16 = vmul.f32 %v474_v12, %v473_v11  ;;  %v499_v17 = vsel %vm476_vm1, %v498_v15, 0.0 }
 0x1c8   :  { %v500_v18 = vrot.slane %v499_v17, 4 }
 0x1c9   :  { %v4627_v19 = vmul.f32 %v497_v9, %v475_v16 }
 0x1ca   :  { %v501_v20 = vadd.f32 %v500_v18, %v499_v17 }
 0x1cc   :  { %v502_v21 = vrot.slane %v501_v20, 2 }
 0x1ce   :  { %v503_v22 = vadd.f32 %v502_v21, %v501_v20 }
 0x1d0   :  { %v504_v24 = vrot.slane %v503_v22, 1 }
 0x1d2   :  { %v505_v25 = vadd.f32 %v504_v24, %v503_v22 }
 0x1d4   :  { %v514_v26 = vmul.f32 6.2831855, %v505_v25 }
 0x1d6   :  { %v515_v27 = vadd.f32 %v514_v26, %v4288_v13 }
 0x1d8   :  { %v516_v28 = vmul.f32 0.15915494, %v515_v27 }
 0x1da   :  { %v517_v29 = vfloor.f32 %v516_v28 }
 0x1dc   :  { %v518_v30 = vmul.f32 6.2831855, %v517_v29 }
 0x1de   :  { %v4634_v31 = vsub.f32 %v515_v27, %v518_v30 }
 0x1e0   :  { %v4638_v32 = vsub.f32 %v4634_v31, %v4288_v13  ;;  %526 = vst [vmem:[#allocation2 + $0x1] sm:$0x1] %v4634_v31 }
 0x1e2   :  { %v531_v34 = vand.u32 2139095040, %v4638_v32  ;;  %v528_v42 = vand.u32 2147483647, %v4638_v32  ;;  %vm530_vm10 = vcmp.lt.s32.totalorder %v4638_v32, 0 }
 0x1e4   :  { %v532_v36 = vshrl.u32 %v531_v34, 23  ;;  %v535_v47 = vand.u32 8388607, %v528_v42  ;;  %vm529_vm11 = vcmp.le.f32.partialorder %v528_v42, 0.7853982 }
 0x1e6   :  { %v3572_v38 = vadd.s32 4294967169, %v532_v36  ;;  %v536_v62 = vor.u32 8388608, %v535_v47 }
 0x1e8   :  { %v538_v40 = vadd.s32 1, %v3572_v38  ;;  %v576_v11 = vshll.u32 %v536_v62, 8 }
 0x1ea   :  { %vm539_vm2 = vcmp.gt.s32.totalorder %v538_v40, 0 }
 0x1eb   :  { %v540_v43 = vsel %vm539_vm2, %v538_v40, 0 }
 0x1ec   :  { %v542_v44 = vand.u32 31, %v540_v43  ;;  %v541_v49 = vshrl.u32 %v540_v43, 5 }
 0x1ee   :  { %v543_v48 = vsub.s32 32, %v542_v44  ;;  %v545_v50 = vshll.u32 %v4201_v33, %v542_v44  ;;  %v548_v52 = vshll.u32 %v4202_v35, %v542_v44  ;;  %v551_v55 = vshll.u32 %v4203_v37, %v542_v44 }
 0x1ef   :  { %v554_v57 = vshll.u32 %v4204_v39, %v542_v44  ;;  %v557_v60 = vshll.u32 %v4205_v41, %v542_v44  ;;  %vm560_vm4 = vcmp.lt.s32.totalorder %v541_v49, 1  ;;  %vm563_vm5 = vcmp.lt.s32.totalorder %v541_v49, 4 }
 0x1f0   :  { %v546_v53 = vshrl.u32 %v4202_v35, %v543_v48  ;;  %v549_v54 = vshrl.u32 %v4203_v37, %v543_v48  ;;  %v552_v56 = vshrl.u32 %v4204_v39, %v543_v48  ;;  %v555_v58 = vshrl.u32 %v4205_v41, %v543_v48 }
 0x1f1   :  { %v558_v61 = vshrl.u32 %v4206_v51, %v543_v48  ;;  %v544_v6 = vshrl.u32 %v4201_v33, %v543_v48  ;;  %vm562_vm6 = vcmp.lt.s32.totalorder %v541_v49, 3  ;;  %vm561_vm7 = vcmp.lt.s32.totalorder %v541_v49, 2 }
 0x1f2   :  { %v547_v63 = vor.u32 %v546_v53, %v545_v50  ;;  %v550_v14 = vor.u32 %v549_v54, %v548_v52  ;;  %v553_v0 = vor.u32 %v552_v56, %v551_v55  ;;  %v556_v1 = vor.u32 %v555_v58, %v554_v57 }
 0x1f3   :  { %v559_v2 = vor.u32 %v558_v61, %v557_v60  ;;  %v748_v60 = vpop.permute.xlu1 %747  ;;  %v743_v61 = vpop.permute.xlu0 %742 }
 0x1f4   :  { %v565_v3 = vsel %vm563_vm5, %v553_v0, 2102212464  ;;  %v568_v4 = vsel %vm560_vm4, %v547_v63, %v550_v14  ;;  %v572_v5 = vsel %vm560_vm4, %v550_v14, %v553_v0  ;;  %v569_v7 = vsel %vm563_vm5, %v556_v1, 920167782 }
 0x1f5   :  { %v573_v8 = vsel %vm563_vm5, %v559_v2, 1326507024  ;;  %v570_v9 = vsel %vm562_vm6, %v553_v0, %v569_v7  ;;  %v564_v12 = vsel %vm560_vm4, %v544_v6, %v547_v63  ;;  %v566_v15 = vsel %vm562_vm6, %v550_v14, %v565_v3 }
 0x1f6   :  { %v574_v10 = vsel %vm562_vm6, %v556_v1, %v573_v8  ;;  %v571_v16 = vsel %vm561_vm7, %v568_v4, %v570_v9  ;;  %v567_v23 = vsel %vm561_vm7, %v564_v12, %v566_v15  ;;  %vm620_vm4 = vweird.f32 %v4638_v32 }
 0x1f7   :  { %v575_v17 = vsel %vm561_vm7, %v572_v5, %v574_v10  ;;  %v4659_v21 = vmul.u32.u64.low %v576_v11, %v571_v16  ;;  %v4660_v22 = vmul.u32.u64.high %v576_v11, %v571_v16, %v4659_v21  ;;  %v583_v25 = vmul.u32 %v576_v11, %v567_v23  ;;  %v781_v2 = vpop.permute.xlu1 %780  ;;  %v776_v3 = vpop.permute.xlu0 %775 }
 0x1f8   :  { %v4656_v18 = vmul.u32.u64.low %v576_v11, %v575_v17  ;;  %v4657_v20 = vmul.u32.u64.high %v576_v11, %v575_v17, %v4656_v18 }
 0x1f9   :  { %v586_v24 = vadd.s32 1, %v4660_v22 }
 0x1fa   :  { %vm585_vm8 = vc.u32 %v4657_v20, %v4659_v21  ;;  %v584_v47 = vadd.s32 %v4659_v21, %v4657_v20 }
 0x1fb   :  { %v587_v26 = vsel %vm585_vm8, %v586_v24, %v4660_v22  ;;  %v758_v7 = vpop.permute.xlu1 %757  ;;  %v753_v8 = vpop.permute.xlu0 %752 }
 0x1fc   :  { %v588_v27 = vadd.s32 %v587_v26, %v583_v25 }
 0x1fe   :  { %v589_v28 = vadd.s32 536870912, %v588_v27 }
 0x1ff   :  { %v791_v15 = vpop.permute.xlu1 %790  ;;  %v786_v16 = vpop.permute.xlu0 %785 }
 0x200   :  { %v590_v29 = vshrl.u32 %v589_v28, 30 }
 0x202   :  { %v591_v30 = vshll.u32 %v590_v29, 30  ;;  %v614_v63 = vsub.s32 4, %v590_v29 }
 0x203   :  { %v813_v28 = vpop.permute.xlu0 %812 }
 0x204   :  { %v592_v34 = vsub.s32 %v588_v27, %v591_v30  ;;  %v615_v1 = vsel %vm530_vm10, %v614_v63, %v590_v29  ;;  %v818_v27 = vpop.permute.xlu1 %817 }
 0x205   :  { %v617_v5 = vsel %vm529_vm11, 0, %v615_v1  ;;  %v3593_v1 = vld [vmem:[%s5066_s3 + $0x18] sm:$0xf] }
 0x206   :  { %v594_v36 = vsub.s32 0, %v592_v34  ;;  %v724_v6 = vadd.s32 3, %v617_v5  ;;  %v621_v9 = vand.u32 3, %v617_v5 }
 0x208   :  { %v3573_v38 = vmin.u32 %v594_v36, %v592_v34  ;;  %v725_v10 = vand.u32 3, %v724_v6  ;;  %vm626_vm12 = vcmp.eq.s32.totalorder %v621_v9, 2  ;;  %vm623_vm14 = vcmp.eq.s32.totalorder %v621_v9, 0 }
 0x209   :  { %vm622_vm0 = vcmp.lt.s32.totalorder %v621_v9, 2 }
 0x20a   :  { %v596_v40 = vclz %v3573_v38  ;;  %vm730_vm13 = vcmp.eq.s32.totalorder %v725_v10, 2  ;;  %vm727_vm15 = vcmp.eq.s32.totalorder %v725_v10, 0  ;;  %vm726_vm2 = vcmp.lt.s32.totalorder %v725_v10, 2 }
 0x20c   :  { %v3574_v43 = vadd.s32 4294967294, %v596_v40 }
 0x20e   :  { %vm3575_vm9 = vcmp.lt.s32.totalorder %v3574_v43, 0 }
 0x20f   :  { %v599_v44 = vsel %vm3575_vm9, 0, %v3574_v43 }
 0x210   :  { %v600_v48 = vsub.s32 32, %v599_v44  ;;  %v604_v49 = vsub.s32 4294967266, %v599_v44  ;;  %v601_v50 = vshll.u32 %v592_v34, %v599_v44 }
 0x212   :  { %v602_v52 = vshrl.u32 %v584_v47, %v600_v48  ;;  %v605_v53 = vadd.s32 127, %v604_v49 }
 0x214   :  { %v603_v54 = vor.u32 %v602_v52, %v601_v50  ;;  %v606_v55 = vshll.u32 %v605_v53, 23  ;;  %v828_v53 = vpop.permute.xlu1 %827 }
 0x216   :  { %v607_v56 = vor.u32 4788187, %v606_v55  ;;  %v610_v58 = vcvt.s32.f32 %v603_v54  ;;  %v823_v54 = vpop.permute.xlu0 %822 }
 0x218   :  { %v608_v57 = vand.u32 2147483647, %v607_v56 }
 0x21a   :  { %v611_v62 = vmul.f32 %v610_v58, %v608_v57  ;;  %v847_v10 = vpop.permute.xlu0 %846 }
 0x21c   :  { %v612_v14 = vxor.u32 2147483648, %v611_v62 }
 0x21e   :  { %v613_v0 = vsel %vm530_vm10, %v612_v14, %v611_v62 }
 0x21f   :  { %v616_v4 = vsel %vm529_vm11, %v4638_v32, %v613_v0 }
 0x220   :  { %3970 = vcosq.f32 %v616_v4 }
 0x221   :  { %3972 = vsinq.f32 %v616_v4 }
 0x22a   :  { %v3971_v11 = vpop.eup %3970 }
 0x22b   :  { %v3973_v12 = vpop.eup %3972  ;;  %v627_v17 = vxor.u32 2147483648, %v3971_v11 }
 0x22c   :  { %v624_v42 = vxor.u32 2147483648, %v3973_v12 }
 0x22d   :  { %v628_v18 = vsel %vm626_vm12, %v627_v17, %v3973_v12  ;;  %v732_v20 = vsel %vm730_vm13, %v627_v17, %v3973_v12 }
 0x22e   :  { %v625_v21 = vsel %vm623_vm14, %v3971_v11, %v624_v42  ;;  %v729_v22 = vsel %vm727_vm15, %v3971_v11, %v624_v42 }
 0x22f   :  { %v629_v23 = vsel %vm622_vm0, %v625_v21, %v628_v18  ;;  %v733_v24 = vsel %vm726_vm2, %v729_v22, %v732_v20 }
 0x230   :  { %v630_v25 = vsel %vm620_vm4, nan, %v629_v23  ;;  %v734_v26 = vsel %vm620_vm4, nan, %v733_v24 }
 0x231   :  { %v763_v29 = vrot.slane %v630_v25, %v4515_v59  ;;  %v796_v30 = vrot.slane %v734_v26, %v4515_v59 }
 0x233   :  { %v764_v34 = vmul.f32 %v763_v29, %v743_v61  ;;  %v765_v36 = vmul.f32 %v763_v29, %v748_v60  ;;  %v797_v38 = vmul.f32 %v796_v30, %v776_v3  ;;  %v798_v40 = vmul.f32 %v796_v30, %v781_v2  ;;  %v945_v2 = vld [vmem:[%s5063_s0 + $0x2] sm:$0x1] }
 0x234   :  { %v766_v43 = vmul.f32 %v763_v29, %v753_v8  ;;  %v767_v44 = vmul.f32 %v763_v29, %v758_v7  ;;  %v799_v47 = vmul.f32 %v796_v30, %v786_v16  ;;  %v800_v48 = vmul.f32 %v796_v30, %v791_v15  ;;  %v852_v8 = vpop.permute.xlu1 %851 }
 0x235   :  { %v801_v49 = vadd.f32 %v797_v38, %v764_v34  ;;  %v802_v32 = vadd.f32 %v798_v40, %v765_v36  ;;  %v946_v3 = vsub.f32 %v945_v2, %v4634_v31 }
 0x236   :  { %v803_v50 = vadd.f32 %v799_v47, %v766_v43  ;;  %v804_v52 = vadd.f32 %v800_v48, %v767_v44 }
 0x237   :  { %v830_v55 = vadd.f32 %v813_v28, %v801_v49  ;;  %v831_v56 = vadd.f32 %v818_v27, %v802_v32  ;;  %v947_v4 = vmul.f32 0.15915494, %v946_v3 }
 0x238   :  { %v832_v57 = vadd.f32 %v823_v54, %v803_v50  ;;  %v833_v58 = vadd.f32 %v828_v53, %v804_v52 }
 0x239   :  { %3974 = vtanh.f32 %v830_v55  ;;  %v948_v5 = vfloor.f32 %v947_v4  ;;  %v507_v4 = vsel %vm476_vm1, %v4627_v19, 0.0 }
 0x23a   :  { %3976 = vtanh.f32 %v831_v56 }
 0x23b   :  { %3978 = vtanh.f32 %v832_v57  ;;  %v949_v6 = vmul.f32 6.2831855, %v948_v5 }
 0x23c   :  { %3980 = vtanh.f32 %v833_v58 }
 0x23d   :  { %v950_v7 = vsub.f32 %v946_v3, %v949_v6 }
 0x23f   :  { %v951_v15 = vmul.f32 0.15915494, %v950_v7  ;;  %v508_v7 = vrot.slane %v507_v4, 4 }
 0x241   :  { %v952_v20 = vmax.f32 %v951_v15, 1e-06 }
 0x243   :  { %v3975_v60 = vpop.eup %3974  ;;  %v953_v25 = vmin.f32 %v952_v20, 0.999999 }
 0x244   :  { %v3977_v61 = vpop.eup %3976 }
 0x245   :  { %v3979_v62 = vpop.eup %3978  ;;  %v3855_v63 = vpack.c.bf16 %v3977_v61, %v3975_v60  ;;  %v956_v28 = vsub.f32 1.0, %v953_v25 }
 0x246   :  { %v3981_v14 = vpop.eup %3980 }
 0x247   :  { %3856 = vmatprep.subr.bf16.mxu1 %v3855_v63  ;;  %v3859_v0 = vpack.c.bf16 %v3981_v14, %v3979_v62 }
 0x248   :  { %3858 = vmatpush3.bf16.msra.mxu1 %v3855_v63 }
 0x249   :  { %3860 = vmatprep.subr.bf16.mxu1 %v3859_v0 }
 0x24c   :  { %3862 = vmatpush3.bf16.msra.mxu1 %v3859_v0 }
 0x24f   :  { %3790 = vmatmul.mubr.msk.f32.vlgmr.msra.gmra.mrb[0].mxu1 %vm351_vm3, %v3593_v1 }
 0x322   :  { %v3791_v9 = vpop.f32.mrb[0].mxu1 }
 0x323   :  { %v932_v11 = vadd.f32 %v3791_v9, %v852_v8  ;;  %v926_v12 = vpop.f32.mrb[1].mxu1 }
 0x324   :  { %v927_v16 = vadd.f32 %v926_v12, %v847_v10  ;;  %v509_v10 = vadd.f32 %v508_v7, %v507_v4 }
 0x325   :  { %v978_v17 = vsel %vm476_vm1, %v932_v11, -inf }
 0x326   :  { %v979_v42 = vrot.slane %v978_v17, 4  ;;  %v936_v18 = vand.u32 2147483647, %v927_v16  ;;  %v935_v53 = vmax.f32 %v927_v16, 0.0  ;;  %v966_v63 = vrot.slane %v927_v16, 4 }
 0x327   :  { %v510_v12 = vrot.slane %v509_v10, 2 }
 0x328   :  { %v980_v21 = vmax.f32 %v978_v17, %v979_v42  ;;  %v937_v22 = vsub.f32 0.0, %v936_v18 }
 0x329   :  { %v511_v17 = vadd.f32 %v510_v12, %v509_v10 }
 0x32a   :  { %v981_v23 = vrot.slane %v980_v21, 2  ;;  %v938_v24 = vmul.f32 1.442695, %v937_v22 }
 0x32c   :  { %v982_v26 = vmax.f32 %v980_v21, %v981_v23  ;;  %3982 = vpow2.f32 %v938_v24  ;;  %v512_v23 = vrot.slane %v511_v17, 1 }
 0x32d   :  { %3984 = vlog2.f32 %v956_v28 }
 0x32e   :  { %v983_v27 = vrot.slane %v982_v26, 1  ;;  %3986 = vlog2.f32 %v953_v25 }
 0x330   :  { %v984_v29 = vmax.f32 %v982_v26, %v983_v27  ;;  %v513_v27 = vadd.f32 %v512_v23, %v511_v17 }
 0x332   :  { %v985_v30 = vsub.f32 %v932_v11, %v984_v29 }
 0x334   :  { %v986_v34 = vmul.f32 1.442695, %v985_v30 }
 0x336   :  { %v3983_v36 = vpop.eup %3982  ;;  %3988 = vpow2.f32 %v986_v34 }
 0x337   :  { %v940_v38 = vadd.f32 1.0, %v3983_v36  ;;  %v3985_v40 = vpop.eup %3984  ;;  %v3618_v36 = vld [vmem:[%s5066_s3 + $0x20] sm:$0xff] }
 0x338   :  { %v3987_v43 = vpop.eup %3986  ;;  %v4682_v47 = vmul.f32 0.6931472, %v3985_v40  ;;  %3800 = vmatprep.mubr.msk.f32.mxu0 %vm351_vm3, %v3618_v36 }
 0x339   :  { %3990 = vlog2.f32 %v940_v38  ;;  %v4685_v32 = vmul.f32 0.6931472, %v3987_v43  ;;  %v520_v38 = vmax.f32 %v513_v27, 1e-30 }
 0x33b   :  { %v959_v55 = vsub.f32 %v4685_v32, %v4682_v47 }
 0x33d   :  { %v963_v61 = vrot.slane %v959_v55, %v4515_v59 }
 0x340   :  { %v3989_v44 = vpop.eup %3988 }
 0x341   :  { %v988_v48 = vsel %vm476_vm1, %v3989_v44, 0.0 }
 0x342   :  { %v989_v49 = vrot.slane %v988_v48, 4 }
 0x343   :  { %v3991_v50 = vpop.eup %3990 }
 0x344   :  { %v990_v52 = vadd.f32 %v989_v49, %v988_v48  ;;  %v942_v54 = vmul.f32 0.6931472, %v3991_v50 }
 0x346   :  { %v991_v56 = vrot.slane %v990_v52, 2  ;;  %v943_v57 = vadd.f32 %v942_v54, %v935_v53 }
 0x348   :  { %v992_v58 = vadd.f32 %v991_v56, %v990_v52  ;;  %v944_v60 = vmul.f32 2.88539, %v943_v57 }
 0x34a   :  { %v964_v62 = vmul.f32 %v963_v61, %v944_v60  ;;  %v993_v14 = vrot.slane %v992_v58, 1 }
 0x34c   :  { %v968_v0 = vadd.f32 %v966_v63, %v964_v62  ;;  %v994_v2 = vadd.f32 %v993_v14, %v992_v58 }
 0x34e   :  { %v969_v1 = vsub.f32 0.0, %v968_v0 }
 0x350   :  { %v970_v3 = vmul.f32 1.442695, %v969_v1 }
 0x352   :  { %3992 = vpow2.f32 %v970_v3 }
 0x353   :  { %3994 = vrcp.f32 %v994_v2 }
 0x35c   :  { %v3993_v5 = vpop.eup %3992 }
 0x35d   :  { %v3995_v6 = vpop.eup %3994  ;;  %v972_v8 = vadd.f32 1.0, %v3993_v5 }
 0x35e   :  { %v996_v9 = vmul.f32 %v3995_v6, %v3989_v44 }
 0x35f   :  { %3996 = vrcp.f32 %v972_v8 }
 0x360   :  { %v997_v11 = vmul.f32 0.96, %v996_v9  ;;  %3998 = vlog2.f32 %v520_v38 }
 0x362   :  { %v998_v15 = vadd.f32 0.01, %v997_v11 }
 0x369   :  { %v3997_v16 = vpop.eup %3996 }
 0x36a   :  { %v975_v42 = vmul.f32 %v3997_v16, %v944_v60  ;;  %v976_v18 = vsub.f32 1.0, %v3997_v16  ;;  %v999_v20 = vmul.f32 %v3997_v16, %v998_v15  ;;  %v3999_v58 = vpop.eup %3998 }
 0x36b   :  { %v522_v62 = vmul.f32 0.6931472, %v3999_v58 }
 0x36c   :  { %v977_v21 = vmul.f32 %v976_v18, %v975_v42  ;;  %v1000_v22 = vsel %vm476_vm1, %v999_v20, 0.0 }
 0x36d   :  { %v1001_v19 = vrot.slane %v1000_v22, 4 }
 0x36e   :  { %v1007_v24 = vmul.f32 %v998_v15, %v977_v21 }
 0x36f   :  { %v1002_v25 = vadd.f32 %v1001_v19, %v1000_v22 }
 0x370   :  { %v1008_v26 = vsel %vm476_vm1, %v1007_v24, 0.0 }
 0x371   :  { %v1003_v28 = vrot.slane %v1002_v25, 2  ;;  %v1009_v29 = vrot.slane %v1008_v26, 4 }
 0x373   :  { %v1004_v30 = vadd.f32 %v1003_v28, %v1002_v25  ;;  %v1010_v34 = vadd.f32 %v1009_v29, %v1008_v26 }
 0x375   :  { %v1005_v40 = vrot.slane %v1004_v30, 1  ;;  %v1011_v43 = vrot.slane %v1010_v34, 2 }
 0x377   :  { %v1006_v44 = vadd.f32 %v1005_v40, %v1004_v30  ;;  %v1012_v48 = vadd.f32 %v1011_v43, %v1010_v34 }
 0x379   :  { %v1013_v49 = vrot.slane %v1012_v48, 1  ;;  %v1015_v50 = vmul.f32 6.2831855, %v1006_v44 }
 0x37b   :  { %v1014_v52 = vadd.f32 %v1013_v49, %v1012_v48  ;;  %v1016_v53 = vadd.f32 %v1015_v50, %v4634_v31  ;;  %v523_v31 = vsub.f32 %v522_v62, %v4618_v45 }
 0x37d   :  { %v1017_v54 = vmul.f32 0.15915494, %v1016_v53  ;;  %v1021_v55 = vmax.f32 %v1014_v52, 1e-30  ;;  %v524_v5 = vsub.f32 %v523_v31, %v4620_v46 }
 0x37f   :  { %v1018_v56 = vfloor.f32 %v1017_v54  ;;  %4000 = vlog2.f32 %v1021_v55 }
 0x381   :  { %v1019_v57 = vmul.f32 6.2831855, %v1018_v56 }
 0x383   :  { %v4699_v60 = vsub.f32 %v1016_v53, %v1019_v57 }
 0x385   :  { %v4703_v61 = vsub.f32 %v4699_v60, %v4288_v13  ;;  %1027 = vst [vmem:[#allocation2 + $0x2] sm:$0x1] %v4699_v60 }
 0x387   :  { %v1032_v63 = vand.u32 2139095040, %v4703_v61  ;;  %v1029_v7 = vand.u32 2147483647, %v4703_v61  ;;  %vm1031_vm12 = vcmp.lt.s32.totalorder %v4703_v61, 0 }
 0x389   :  { %v4001_v14 = vpop.eup %4000  ;;  %v1033_v0 = vshrl.u32 %v1032_v63, 23  ;;  %v1036_v45 = vand.u32 8388607, %v1029_v7  ;;  %vm1030_vm13 = vcmp.le.f32.partialorder %v1029_v7, 0.7853982 }
 0x38a   :  { %v1023_v1 = vmul.f32 0.6931472, %v4001_v14 }
 0x38b   :  { %v3598_v2 = vadd.s32 4294967169, %v1033_v0  ;;  %v1037_v22 = vor.u32 8388608, %v1036_v45 }
 0x38c   :  { %v1024_v3 = vsub.f32 %v1023_v1, %v4685_v32 }
 0x38d   :  { %v1039_v4 = vadd.s32 1, %v3598_v2  ;;  %v1077_v43 = vshll.u32 %v1037_v22, 8 }
 0x38e   :  { %v1025_v6 = vsub.f32 %v1024_v3, %v4682_v47 }
 0x38f   :  { %vm1040_vm5 = vcmp.gt.s32.totalorder %v1039_v4, 0 }
 0x390   :  { %v1041_v8 = vsel %vm1040_vm5, %v1039_v4, 0  ;;  %v4712_v9 = vadd.f32 %v1025_v6, %v524_v5 }
 0x391   :  { %v1043_v10 = vand.u32 31, %v1041_v8  ;;  %v1042_v12 = vshrl.u32 %v1041_v8, 5 }
 0x393   :  { %v1044_v11 = vsub.s32 32, %v1043_v10  ;;  %v1046_v15 = vshll.u32 %v4201_v33, %v1043_v10  ;;  %v1049_v32 = vshll.u32 %v4202_v35, %v1043_v10  ;;  %v1052_v16 = vshll.u32 %v4203_v37, %v1043_v10 }
 0x394   :  { %v1055_v42 = vshll.u32 %v4204_v39, %v1043_v10  ;;  %v1058_v20 = vshll.u32 %v4205_v41, %v1043_v10  ;;  %vm1061_vm6 = vcmp.lt.s32.totalorder %v1042_v12, 1  ;;  %vm1064_vm7 = vcmp.lt.s32.totalorder %v1042_v12, 4 }
 0x395   :  { %v1047_v46 = vshrl.u32 %v4202_v35, %v1044_v11  ;;  %v1050_v47 = vshrl.u32 %v4203_v37, %v1044_v11  ;;  %v1053_v17 = vshrl.u32 %v4204_v39, %v1044_v11  ;;  %v1056_v18 = vshrl.u32 %v4205_v41, %v1044_v11 }
 0x396   :  { %v1059_v21 = vshrl.u32 %v4206_v51, %v1044_v11  ;;  %v1045_v30 = vshrl.u32 %v4201_v33, %v1044_v11  ;;  %vm1063_vm8 = vcmp.lt.s32.totalorder %v1042_v12, 3  ;;  %vm1062_vm9 = vcmp.lt.s32.totalorder %v1042_v12, 2 }
 0x397   :  { %v1048_v23 = vor.u32 %v1047_v46, %v1046_v15  ;;  %v1051_v19 = vor.u32 %v1050_v47, %v1049_v32  ;;  %v1054_v24 = vor.u32 %v1053_v17, %v1052_v16  ;;  %v1057_v25 = vor.u32 %v1056_v18, %v1055_v42  ;;  %v1249_v42 = vpop.permute.xlu1 %1248  ;;  %v1244_v18 = vpop.permute.xlu0 %1243 }
 0x398   :  { %v1060_v26 = vor.u32 %v1059_v21, %v1058_v20 }
 0x399   :  { %v1066_v27 = vsel %vm1064_vm7, %v1054_v24, 2102212464  ;;  %v1069_v28 = vsel %vm1061_vm6, %v1048_v23, %v1051_v19  ;;  %v1073_v29 = vsel %vm1061_vm6, %v1051_v19, %v1054_v24  ;;  %v1070_v34 = vsel %vm1064_vm7, %v1057_v25, 920167782 }
 0x39a   :  { %v1074_v36 = vsel %vm1064_vm7, %v1060_v26, 1326507024  ;;  %v1071_v38 = vsel %vm1063_vm8, %v1054_v24, %v1070_v34  ;;  %v1065_v44 = vsel %vm1061_vm6, %v1045_v30, %v1048_v23  ;;  %v1067_v48 = vsel %vm1063_vm8, %v1051_v19, %v1066_v27 }
 0x39b   :  { %v1075_v40 = vsel %vm1063_vm8, %v1057_v25, %v1074_v36  ;;  %v1072_v49 = vsel %vm1062_vm9, %v1069_v28, %v1071_v38  ;;  %v1068_v56 = vsel %vm1062_vm9, %v1065_v44, %v1067_v48  ;;  %v1282_v24 = vpop.permute.xlu1 %1281  ;;  %v1277_v25 = vpop.permute.xlu0 %1276  ;;  %vm1121_vm6 = vweird.f32 %v4703_v61 }
 0x39c   :  { %v1076_v50 = vsel %vm1062_vm9, %v1073_v29, %v1075_v40  ;;  %v4730_v54 = vmul.u32.u64.low %v1077_v43, %v1072_v49  ;;  %v4731_v55 = vmul.u32.u64.high %v1077_v43, %v1072_v49, %v4730_v54  ;;  %v1084_v58 = vmul.u32 %v1077_v43, %v1068_v56 }
 0x39d   :  { %v4727_v52 = vmul.u32.u64.low %v1077_v43, %v1076_v50  ;;  %v4728_v53 = vmul.u32.u64.high %v1077_v43, %v1076_v50, %v4727_v52 }
 0x39e   :  { %v1087_v57 = vadd.s32 1, %v4731_v55 }
 0x39f   :  { %vm1086_vm10 = vc.u32 %v4728_v53, %v4730_v54  ;;  %v1085_v8 = vadd.s32 %v4730_v54, %v4728_v53  ;;  %v1259_v29 = vpop.permute.xlu1 %1258  ;;  %v1254_v30 = vpop.permute.xlu0 %1253 }
 0x3a0   :  { %v1088_v62 = vsel %vm1086_vm10, %v1087_v57, %v4731_v55 }
 0x3a1   :  { %v1089_v63 = vadd.s32 %v1088_v62, %v1084_v58 }
 0x3a3   :  { %v1090_v14 = vadd.s32 536870912, %v1089_v63  ;;  %v1292_v43 = vpop.permute.xlu1 %1291  ;;  %v1287_v44 = vpop.permute.xlu0 %1286 }
 0x3a5   :  { %v1091_v0 = vshrl.u32 %v1090_v14, 30 }
 0x3a7   :  { %v1092_v31 = vshll.u32 %v1091_v0, 30  ;;  %v1115_v21 = vsub.s32 4, %v1091_v0  ;;  %v1319_v58 = vpop.permute.xlu1 %1318  ;;  %v1314_v62 = vpop.permute.xlu0 %1313 }
 0x3a9   :  { %v1093_v1 = vsub.s32 %v1089_v63, %v1092_v31  ;;  %v1116_v19 = vsel %vm1031_vm12, %v1115_v21, %v1091_v0 }
 0x3aa   :  { %v1118_v27 = vsel %vm1030_vm13, 0, %v1116_v19 }
 0x3ab   :  { %v1095_v2 = vsub.s32 0, %v1093_v1  ;;  %v1225_v28 = vadd.s32 3, %v1118_v27  ;;  %v1122_v34 = vand.u32 3, %v1118_v27 }
 0x3ad   :  { %v3599_v3 = vmin.u32 %v1095_v2, %v1093_v1  ;;  %v1226_v36 = vand.u32 3, %v1225_v28  ;;  %vm1127_vm14 = vcmp.eq.s32.totalorder %v1122_v34, 2  ;;  %vm1124_vm0 = vcmp.eq.s32.totalorder %v1122_v34, 0 }
 0x3ae   :  { %vm1123_vm4 = vcmp.lt.s32.totalorder %v1122_v34, 2 }
 0x3af   :  { %v1097_v4 = vclz %v3599_v3  ;;  %vm1231_vm15 = vcmp.eq.s32.totalorder %v1226_v36, 2  ;;  %vm1228_vm2 = vcmp.eq.s32.totalorder %v1226_v36, 0  ;;  %vm1227_vm5 = vcmp.lt.s32.totalorder %v1226_v36, 2 }
 0x3b1   :  { %v3600_v5 = vadd.s32 4294967294, %v1097_v4 }
 0x3b3   :  { %vm3601_vm11 = vcmp.lt.s32.totalorder %v3600_v5, 0 }
 0x3b4   :  { %v1100_v6 = vsel %vm3601_vm11, 0, %v3600_v5 }
 0x3b5   :  { %v1101_v10 = vsub.s32 32, %v1100_v6  ;;  %v1105_v11 = vsub.s32 4294967266, %v1100_v6  ;;  %v1102_v45 = vshll.u32 %v1093_v1, %v1100_v6 }
 0x3b7   :  { %v1103_v12 = vshrl.u32 %v1085_v8, %v1101_v10  ;;  %v1106_v15 = vadd.s32 127, %v1105_v11 }
 0x3b9   :  { %v1104_v32 = vor.u32 %v1103_v12, %v1102_v45  ;;  %v1107_v46 = vshll.u32 %v1106_v15, 23  ;;  %v1329_v45 = vpop.permute.xlu1 %1328  ;;  %v1324_v12 = vpop.permute.xlu0 %1323 }
 0x3bb   :  { %v1108_v47 = vor.u32 4788187, %v1107_v46  ;;  %v1111_v17 = vcvt.s32.f32 %v1104_v32 }
 0x3bd   :  { %v1109_v16 = vand.u32 2147483647, %v1108_v47  ;;  %v1353_v28 = vpop.permute.xlu1 %1352 }
 0x3bf   :  { %v1112_v20 = vmul.f32 %v1111_v17, %v1109_v16 }
 0x3c1   :  { %v1113_v22 = vxor.u32 2147483648, %v1112_v20 }
 0x3c3   :  { %v1114_v23 = vsel %vm1031_vm12, %v1113_v22, %v1112_v20  ;;  %v3619_v22 = vld [vmem:[%s5066_s3 + $0x28] sm:$0xf] }
 0x3c4   :  { %v1117_v26 = vsel %vm1030_vm13, %v4703_v61, %v1114_v23  ;;  %v1446_v23 = vld [vmem:[%s5063_s0 + $0x3] sm:$0x1] }
 0x3c5   :  { %4002 = vcosq.f32 %v1117_v26  ;;  %v1447_v19 = vsub.f32 %v1446_v23, %v4699_v60 }
 0x3c6   :  { %4004 = vsinq.f32 %v1117_v26 }
 0x3cf   :  { %v4003_v38 = vpop.eup %4002 }
 0x3d0   :  { %v4005_v40 = vpop.eup %4004  ;;  %v1128_v48 = vxor.u32 2147483648, %v4003_v38 }
 0x3d1   :  { %v1125_v7 = vxor.u32 2147483648, %v4005_v40 }
 0x3d2   :  { %v1129_v49 = vsel %vm1127_vm14, %v1128_v48, %v4005_v40  ;;  %v1233_v50 = vsel %vm1231_vm15, %v1128_v48, %v4005_v40 }
 0x3d3   :  { %v1126_v52 = vsel %vm1124_vm0, %v4003_v38, %v1125_v7  ;;  %v1230_v53 = vsel %vm1228_vm2, %v4003_v38, %v1125_v7 }
 0x3d4   :  { %v1130_v54 = vsel %vm1123_vm4, %v1126_v52, %v1129_v49  ;;  %v1234_v55 = vsel %vm1227_vm5, %v1230_v53, %v1233_v50 }
 0x3d5   :  { %v1131_v56 = vsel %vm1121_vm6, nan, %v1130_v54  ;;  %v1235_v57 = vsel %vm1121_vm6, nan, %v1234_v55 }
 0x3d6   :  { %v1264_v63 = vrot.slane %v1131_v56, %v4515_v59  ;;  %v1297_v14 = vrot.slane %v1235_v57, %v4515_v59 }
 0x3d8   :  { %v1265_v0 = vmul.f32 %v1264_v63, %v1244_v18  ;;  %v1266_v31 = vmul.f32 %v1264_v63, %v1249_v42  ;;  %v1298_v1 = vmul.f32 %v1297_v14, %v1277_v25  ;;  %v1299_v2 = vmul.f32 %v1297_v14, %v1282_v24 }
 0x3d9   :  { %v1267_v3 = vmul.f32 %v1264_v63, %v1254_v30  ;;  %v1268_v4 = vmul.f32 %v1264_v63, %v1259_v29  ;;  %v1300_v5 = vmul.f32 %v1297_v14, %v1287_v44  ;;  %v1301_v6 = vmul.f32 %v1297_v14, %v1292_v43  ;;  %v1348_v30 = vpop.permute.xlu0 %1347 }
 0x3da   :  { %v1302_v8 = vadd.f32 %v1298_v1, %v1265_v0  ;;  %v1303_v61 = vadd.f32 %v1299_v2, %v1266_v31  ;;  %v1448_v24 = vmul.f32 0.15915494, %v1447_v19 }
 0x3db   :  { %v1304_v10 = vadd.f32 %v1300_v5, %v1267_v3  ;;  %v1305_v11 = vadd.f32 %v1301_v6, %v1268_v4 }
 0x3dc   :  { %v1331_v15 = vadd.f32 %v1314_v62, %v1302_v8  ;;  %v1332_v32 = vadd.f32 %v1319_v58, %v1303_v61  ;;  %v1449_v25 = vfloor.f32 %v1448_v24 }
 0x3dd   :  { %v1333_v46 = vadd.f32 %v1324_v12, %v1304_v10  ;;  %v1334_v47 = vadd.f32 %v1329_v45, %v1305_v11 }
 0x3de   :  { %4006 = vtanh.f32 %v1331_v15  ;;  %v1450_v26 = vmul.f32 6.2831855, %v1449_v25 }
 0x3df   :  { %4008 = vtanh.f32 %v1332_v32 }
 0x3e0   :  { %4010 = vtanh.f32 %v1333_v46  ;;  %v1451_v27 = vsub.f32 %v1447_v19, %v1450_v26 }
 0x3e1   :  { %4012 = vtanh.f32 %v1334_v47 }
 0x3e2   :  { %v1452_v38 = vmul.f32 0.15915494, %v1451_v27 }
 0x3e4   :  { %v1453_v7 = vmax.f32 %v1452_v38, 1e-06 }
 0x3e6   :  { %v1454_v54 = vmin.f32 %v1453_v7, 0.999999 }
 0x3e8   :  { %v4007_v16 = vpop.eup %4006  ;;  %v1457_v57 = vsub.f32 1.0, %v1454_v54 }
 0x3e9   :  { %v4009_v17 = vpop.eup %4008 }
 0x3ea   :  { %v4011_v42 = vpop.eup %4010  ;;  %v3863_v18 = vpack.c.bf16 %v4009_v17, %v4007_v16 }
 0x3eb   :  { %v4013_v20 = vpop.eup %4012 }
 0x3ec   :  { %3864 = vmatprep.subr.bf16.mxu0 %v3863_v18  ;;  %v3867_v21 = vpack.c.bf16 %v4013_v20, %v4011_v42 }
 0x3ed   :  { %3866 = vmatpush3.bf16.msra.mxu0 %v3863_v18 }
 0x3ee   :  { %3868 = vmatprep.subr.bf16.mxu0 %v3867_v21 }
 0x3f1   :  { %3870 = vmatpush3.bf16.msra.mxu0 %v3867_v21 }
 0x3f4   :  { %3801 = vmatmul.mubr.msk.f32.vlgmr.msra.gmra.mrb[2].mxu0 %vm351_vm3, %v3619_v22 }
 0x4c7   :  { %v3802_v29 = vpop.f32.mrb[2].mxu0 }
 0x4c8   :  { %v1433_v34 = vadd.f32 %v3802_v29, %v1353_v28  ;;  %v1427_v36 = vpop.f32.mrb[3].mxu0 }
 0x4c9   :  { %v1428_v40 = vadd.f32 %v1427_v36, %v1348_v30 }
 0x4ca   :  { %v1479_v43 = vsel %vm476_vm1, %v1433_v34, -inf }
 0x4cb   :  { %v1480_v44 = vrot.slane %v1479_v43, 4  ;;  %v1437_v48 = vand.u32 2147483647, %v1428_v40  ;;  %v1436_v10 = vmax.f32 %v1428_v40, 0.0  ;;  %v1467_v17 = vrot.slane %v1428_v40, 4 }
 0x4cd   :  { %v1481_v49 = vmax.f32 %v1479_v43, %v1480_v44  ;;  %v1438_v50 = vsub.f32 0.0, %v1437_v48 }
 0x4cf   :  { %v1482_v52 = vrot.slane %v1481_v49, 2  ;;  %v1439_v53 = vmul.f32 1.442695, %v1438_v50 }
 0x4d1   :  { %v1483_v55 = vmax.f32 %v1481_v49, %v1482_v52  ;;  %4014 = vpow2.f32 %v1439_v53  ;;  %v3644_v53 = vld [vmem:[%s5066_s3 + $0x30] sm:$0xff] }
 0x4d2   :  { %4016 = vlog2.f32 %v1457_v57  ;;  %3811 = vmatprep.mubr.msk.f32.mxu1 %vm351_vm3, %v3644_v53 }
 0x4d3   :  { %v1484_v56 = vrot.slane %v1483_v55, 1  ;;  %4018 = vlog2.f32 %v1454_v54 }
 0x4d5   :  { %v1485_v58 = vmax.f32 %v1483_v55, %v1484_v56 }
 0x4d7   :  { %v1486_v62 = vsub.f32 %v1433_v34, %v1485_v58 }
 0x4d9   :  { %v1487_v63 = vmul.f32 1.442695, %v1486_v62 }
 0x4db   :  { %v4015_v14 = vpop.eup %4014  ;;  %4020 = vpow2.f32 %v1487_v63 }
 0x4dc   :  { %v1441_v0 = vadd.f32 1.0, %v4015_v14  ;;  %v4017_v31 = vpop.eup %4016 }
 0x4dd   :  { %v4019_v1 = vpop.eup %4018  ;;  %v4753_v3 = vmul.f32 0.6931472, %v4017_v31 }
 0x4de   :  { %4022 = vlog2.f32 %v1441_v0  ;;  %v4756_v6 = vmul.f32 0.6931472, %v4019_v1 }
 0x4e0   :  { %v1460_v45 = vsub.f32 %v4756_v6, %v4753_v3 }
 0x4e2   :  { %v1464_v47 = vrot.slane %v1460_v45, %v4515_v59 }
 0x4e5   :  { %v4021_v2 = vpop.eup %4020 }
 0x4e6   :  { %v1489_v4 = vsel %vm476_vm1, %v4021_v2, 0.0 }
 0x4e7   :  { %v1490_v5 = vrot.slane %v1489_v4, 4 }
 0x4e8   :  { %v4023_v8 = vpop.eup %4022 }
 0x4e9   :  { %v1491_v61 = vadd.f32 %v1490_v5, %v1489_v4  ;;  %v1443_v11 = vmul.f32 0.6931472, %v4023_v8 }
 0x4eb   :  { %v1492_v12 = vrot.slane %v1491_v61, 2  ;;  %v1444_v15 = vadd.f32 %v1443_v11, %v1436_v10 }
 0x4ed   :  { %v1493_v32 = vadd.f32 %v1492_v12, %v1491_v61  ;;  %v1445_v46 = vmul.f32 2.88539, %v1444_v15 }
 0x4ef   :  { %v1465_v16 = vmul.f32 %v1464_v47, %v1445_v46  ;;  %v1494_v42 = vrot.slane %v1493_v32, 1 }
 0x4f1   :  { %v1469_v18 = vadd.f32 %v1467_v17, %v1465_v16  ;;  %v1495_v21 = vadd.f32 %v1494_v42, %v1493_v32 }
 0x4f3   :  { %v1470_v20 = vsub.f32 0.0, %v1469_v18 }
 0x4f5   :  { %v1471_v22 = vmul.f32 1.442695, %v1470_v20 }
 0x4f7   :  { %4024 = vpow2.f32 %v1471_v22 }
 0x4f8   :  { %4026 = vrcp.f32 %v1495_v21 }
 0x501   :  { %v4025_v23 = vpop.eup %4024 }
 0x502   :  { %v4027_v19 = vpop.eup %4026  ;;  %v1473_v24 = vadd.f32 1.0, %v4025_v23 }
 0x503   :  { %v1497_v25 = vmul.f32 %v4027_v19, %v4021_v2 }
 0x504   :  { %4028 = vrcp.f32 %v1473_v24 }
 0x505   :  { %v1498_v26 = vmul.f32 0.96, %v1497_v25 }
 0x507   :  { %v1499_v27 = vadd.f32 0.01, %v1498_v26 }
 0x50e   :  { %v4029_v28 = vpop.eup %4028 }
 0x50f   :  { %v1476_v29 = vmul.f32 %v4029_v28, %v1445_v46  ;;  %v1477_v30 = vsub.f32 1.0, %v4029_v28  ;;  %v1500_v34 = vmul.f32 %v4029_v28, %v1499_v27 }
 0x511   :  { %v1478_v36 = vmul.f32 %v1477_v30, %v1476_v29  ;;  %v1501_v38 = vsel %vm476_vm1, %v1500_v34, 0.0 }
 0x512   :  { %v1502_v40 = vrot.slane %v1501_v38, 4 }
 0x513   :  { %v1508_v43 = vmul.f32 %v1499_v27, %v1478_v36 }
 0x514   :  { %v1503_v44 = vadd.f32 %v1502_v40, %v1501_v38 }
 0x515   :  { %v1509_v48 = vsel %vm476_vm1, %v1508_v43, 0.0 }
 0x516   :  { %v1504_v7 = vrot.slane %v1503_v44, 2  ;;  %v1510_v49 = vrot.slane %v1509_v48, 4 }
 0x518   :  { %v1505_v50 = vadd.f32 %v1504_v7, %v1503_v44  ;;  %v1511_v52 = vadd.f32 %v1510_v49, %v1509_v48 }
 0x51a   :  { %v1506_v54 = vrot.slane %v1505_v50, 1  ;;  %v1512_v55 = vrot.slane %v1511_v52, 2 }
 0x51c   :  { %v1507_v56 = vadd.f32 %v1506_v54, %v1505_v50  ;;  %v1513_v57 = vadd.f32 %v1512_v55, %v1511_v52 }
 0x51e   :  { %v1514_v58 = vrot.slane %v1513_v57, 1  ;;  %v1516_v62 = vmul.f32 6.2831855, %v1507_v56 }
 0x520   :  { %v1517_v63 = vadd.f32 %v1516_v62, %v4699_v60  ;;  %v1515_v14 = vadd.f32 %v1514_v58, %v1513_v57 }
 0x522   :  { %v1518_v0 = vmul.f32 0.15915494, %v1517_v63  ;;  %v1522_v31 = vmax.f32 %v1515_v14, 1e-30 }
 0x524   :  { %v1519_v1 = vfloor.f32 %v1518_v0  ;;  %4030 = vlog2.f32 %v1522_v31 }
 0x526   :  { %v1520_v2 = vmul.f32 6.2831855, %v1519_v1 }
 0x528   :  { %v4768_v4 = vsub.f32 %v1517_v63, %v1520_v2 }
 0x52a   :  { %v4772_v5 = vsub.f32 %v4768_v4, %v4288_v13  ;;  %1528 = vst [vmem:[#allocation2 + $0x3] sm:$0x1] %v4768_v4 }
 0x52c   :  { %v1533_v8 = vand.u32 2139095040, %v4772_v5  ;;  %v1530_v32 = vand.u32 2147483647, %v4772_v5  ;;  %vm1532_vm14 = vcmp.lt.s32.totalorder %v4772_v5, 0 }
 0x52e   :  { %v4031_v61 = vpop.eup %4030  ;;  %v1534_v10 = vshrl.u32 %v1533_v8, 23  ;;  %v1537_v42 = vand.u32 8388607, %v1530_v32  ;;  %vm1531_vm15 = vcmp.le.f32.partialorder %v1530_v32, 0.7853982 }
 0x52f   :  { %v1524_v11 = vmul.f32 0.6931472, %v4031_v61 }
 0x530   :  { %v3624_v60 = vadd.s32 4294967169, %v1534_v10  ;;  %v1538_v26 = vor.u32 8388608, %v1537_v42 }
 0x531   :  { %v1525_v45 = vsub.f32 %v1524_v11, %v4756_v6 }
 0x532   :  { %v1540_v12 = vadd.s32 1, %v3624_v60  ;;  %v1578_v50 = vshll.u32 %v1538_v26, 8 }
 0x533   :  { %v1526_v15 = vsub.f32 %v1525_v45, %v4753_v3 }
 0x534   :  { %vm1541_vm7 = vcmp.gt.s32.totalorder %v1540_v12, 0 }
 0x535   :  { %v1542_v46 = vsel %vm1541_vm7, %v1540_v12, 0  ;;  %v4780_v47 = vadd.f32 %v1526_v15, %v4712_v9 }
 0x536   :  { %v1544_v16 = vand.u32 31, %v1542_v46  ;;  %v1543_v18 = vshrl.u32 %v1542_v46, 5 }
 0x538   :  { %v1545_v17 = vsub.s32 32, %v1544_v16  ;;  %v1547_v20 = vshll.u32 %v4201_v33, %v1544_v16  ;;  %v1550_v6 = vshll.u32 %v4202_v35, %v1544_v16  ;;  %v1553_v22 = vshll.u32 %v4203_v37, %v1544_v16 }
 0x539   :  { %v1556_v9 = vshll.u32 %v4204_v39, %v1544_v16  ;;  %v1559_v24 = vshll.u32 %v4205_v41, %v1544_v16  ;;  %vm1562_vm8 = vcmp.lt.s32.totalorder %v1543_v18, 1  ;;  %vm1565_vm9 = vcmp.lt.s32.totalorder %v1543_v18, 4 }
 0x53a   :  { %v1548_v21 = vshrl.u32 %v4202_v35, %v1545_v17  ;;  %v1551_v3 = vshrl.u32 %v4203_v37, %v1545_v17  ;;  %v1554_v23 = vshrl.u32 %v4204_v39, %v1545_v17  ;;  %v1557_v19 = vshrl.u32 %v4205_v41, %v1545_v17 }
 0x53b   :  { %v1560_v25 = vshrl.u32 %v4206_v51, %v1545_v17  ;;  %v1546_v43 = vshrl.u32 %v4201_v33, %v1545_v17  ;;  %vm1564_vm10 = vcmp.lt.s32.totalorder %v1543_v18, 3  ;;  %vm1563_vm11 = vcmp.lt.s32.totalorder %v1543_v18, 2 }
 0x53c   :  { %v1549_v27 = vor.u32 %v1548_v21, %v1547_v20  ;;  %v1552_v28 = vor.u32 %v1551_v3, %v1550_v6  ;;  %v1555_v29 = vor.u32 %v1554_v23, %v1553_v22  ;;  %v1558_v30 = vor.u32 %v1557_v19, %v1556_v9  ;;  %v1750_v9 = vpop.permute.xlu1 %1749  ;;  %v1745_v19 = vpop.permute.xlu0 %1744 }
 0x53d   :  { %v1561_v34 = vor.u32 %v1560_v25, %v1559_v24 }
 0x53e   :  { %v1567_v36 = vsel %vm1565_vm9, %v1555_v29, 2102212464  ;;  %v1570_v38 = vsel %vm1562_vm8, %v1549_v27, %v1552_v28  ;;  %v1574_v40 = vsel %vm1562_vm8, %v1552_v28, %v1555_v29  ;;  %v1571_v44 = vsel %vm1565_vm9, %v1558_v30, 920167782 }
 0x53f   :  { %v1575_v48 = vsel %vm1565_vm9, %v1561_v34, 1326507024  ;;  %v1572_v7 = vsel %vm1564_vm10, %v1555_v29, %v1571_v44  ;;  %v1566_v52 = vsel %vm1562_vm8, %v1546_v43, %v1549_v27  ;;  %v1568_v53 = vsel %vm1564_vm10, %v1552_v28, %v1567_v36 }
 0x540   :  { %v1576_v49 = vsel %vm1564_vm10, %v1558_v30, %v1575_v48  ;;  %v1573_v54 = vsel %vm1563_vm11, %v1570_v38, %v1572_v7  ;;  %v1569_v63 = vsel %vm1563_vm11, %v1566_v52, %v1568_v53  ;;  %v1783_v29 = vpop.permute.xlu1 %1782  ;;  %v1778_v30 = vpop.permute.xlu0 %1777  ;;  %vm1622_vm8 = vweird.f32 %v4772_v5 }
 0x541   :  { %v1577_v55 = vsel %vm1563_vm11, %v1574_v40, %v1576_v49  ;;  %v4798_v58 = vmul.u32.u64.low %v1578_v50, %v1573_v54  ;;  %v4799_v62 = vmul.u32.u64.high %v1578_v50, %v1573_v54, %v4798_v58  ;;  %v1585_v0 = vmul.u32 %v1578_v50, %v1569_v63 }
 0x542   :  { %v4795_v56 = vmul.u32.u64.low %v1578_v50, %v1577_v55  ;;  %v4796_v57 = vmul.u32.u64.high %v1578_v50, %v1577_v55, %v4795_v56 }
 0x543   :  { %v1588_v14 = vadd.s32 1, %v4799_v62 }
 0x544   :  { %vm1587_vm12 = vc.u32 %v4796_v57, %v4798_v58  ;;  %v1586_v46 = vadd.s32 %v4798_v58, %v4796_v57  ;;  %v1760_v40 = vpop.permute.xlu1 %1759  ;;  %v1755_v43 = vpop.permute.xlu0 %1754 }
 0x545   :  { %v1589_v31 = vsel %vm1587_vm12, %v1588_v14, %v4799_v62 }
 0x546   :  { %v1590_v1 = vadd.s32 %v1589_v31, %v1585_v0 }
 0x548   :  { %v1591_v2 = vadd.s32 536870912, %v1590_v1  ;;  %v1793_v50 = vpop.permute.xlu1 %1792  ;;  %v1788_v52 = vpop.permute.xlu0 %1787 }
 0x54a   :  { %v1592_v8 = vshrl.u32 %v1591_v2, 30 }
 0x54c   :  { %v1593_v61 = vshll.u32 %v1592_v8, 30  ;;  %v1616_v25 = vsub.s32 4, %v1592_v8  ;;  %v1820_v0 = vpop.permute.xlu1 %1819  ;;  %v1815_v31 = vpop.permute.xlu0 %1814 }
 0x54e   :  { %v1594_v10 = vsub.s32 %v1590_v1, %v1593_v61  ;;  %v1617_v28 = vsel %vm1532_vm14, %v1616_v25, %v1592_v8 }
 0x54f   :  { %v1619_v36 = vsel %vm1531_vm15, 0, %v1617_v28 }
 0x550   :  { %v1596_v11 = vsub.s32 0, %v1594_v10  ;;  %v1726_v38 = vadd.s32 3, %v1619_v36  ;;  %v1623_v44 = vand.u32 3, %v1619_v36 }
 0x552   :  { %v3625_v60 = vmin.u32 %v1596_v11, %v1594_v10  ;;  %v1727_v48 = vand.u32 3, %v1726_v38  ;;  %vm1628_vm0 = vcmp.eq.s32.totalorder %v1623_v44, 2  ;;  %vm1625_vm4 = vcmp.eq.s32.totalorder %v1623_v44, 0 }
 0x553   :  { %vm1624_vm6 = vcmp.lt.s32.totalorder %v1623_v44, 2 }
 0x554   :  { %v1598_v45 = vclz %v3625_v60  ;;  %vm1732_vm2 = vcmp.eq.s32.totalorder %v1727_v48, 2  ;;  %vm1729_vm5 = vcmp.eq.s32.totalorder %v1727_v48, 0  ;;  %vm1728_vm7 = vcmp.lt.s32.totalorder %v1727_v48, 2 }
 0x556   :  { %v3626_v12 = vadd.s32 4294967294, %v1598_v45 }
 0x558   :  { %vm3627_vm13 = vcmp.lt.s32.totalorder %v3626_v12, 0 }
 0x559   :  { %v1601_v15 = vsel %vm3627_vm13, 0, %v3626_v12 }
 0x55a   :  { %v1602_v16 = vsub.s32 32, %v1601_v15  ;;  %v1606_v17 = vsub.s32 4294967266, %v1601_v15  ;;  %v1603_v42 = vshll.u32 %v1594_v10, %v1601_v15 }
 0x55c   :  { %v1604_v18 = vshrl.u32 %v1586_v46, %v1602_v16  ;;  %v1607_v20 = vadd.s32 127, %v1606_v17 }
 0x55e   :  { %v1605_v6 = vor.u32 %v1604_v18, %v1603_v42  ;;  %v1608_v21 = vshll.u32 %v1607_v20, 23  ;;  %v1830_v42 = vpop.permute.xlu1 %1829  ;;  %v1825_v18 = vpop.permute.xlu0 %1824 }
 0x560   :  { %v1609_v3 = vor.u32 4788187, %v1608_v21  ;;  %v1612_v23 = vcvt.s32.f32 %v1605_v6 }
 0x562   :  { %v1610_v22 = vand.u32 2147483647, %v1609_v3  ;;  %v1854_v38 = vpop.permute.xlu1 %1853 }
 0x564   :  { %v1613_v24 = vmul.f32 %v1612_v23, %v1610_v22 }
 0x566   :  { %v1614_v26 = vxor.u32 2147483648, %v1613_v24 }
 0x568   :  { %v1615_v27 = vsel %vm1532_vm14, %v1614_v26, %v1613_v24  ;;  %v3645_v26 = vld [vmem:[%s5066_s3 + $0x38] sm:$0xf] }
 0x569   :  { %v1618_v34 = vsel %vm1531_vm15, %v4772_v5, %v1615_v27  ;;  %v1947_v27 = vld [vmem:[%s5063_s0 + $0x4] sm:$0x1] }
 0x56a   :  { %4032 = vcosq.f32 %v1618_v34  ;;  %v1948_v28 = vsub.f32 %v1947_v27, %v4768_v4 }
 0x56b   :  { %4034 = vsinq.f32 %v1618_v34 }
 0x574   :  { %v4033_v7 = vpop.eup %4032 }
 0x575   :  { %v4035_v49 = vpop.eup %4034  ;;  %v1629_v53 = vxor.u32 2147483648, %v4033_v7 }
 0x576   :  { %v1626_v32 = vxor.u32 2147483648, %v4035_v49 }
 0x577   :  { %v1630_v54 = vsel %vm1628_vm0, %v1629_v53, %v4035_v49  ;;  %v1734_v55 = vsel %vm1732_vm2, %v1629_v53, %v4035_v49 }
 0x578   :  { %v1627_v56 = vsel %vm1625_vm4, %v4033_v7, %v1626_v32  ;;  %v1731_v57 = vsel %vm1729_vm5, %v4033_v7, %v1626_v32 }
 0x579   :  { %v1631_v58 = vsel %vm1624_vm6, %v1627_v56, %v1630_v54  ;;  %v1735_v62 = vsel %vm1728_vm7, %v1731_v57, %v1734_v55 }
 0x57a   :  { %v1632_v63 = vsel %vm1622_vm8, nan, %v1631_v58  ;;  %v1736_v14 = vsel %vm1622_vm8, nan, %v1735_v62 }
 0x57b   :  { %v1765_v1 = vrot.slane %v1632_v63, %v4515_v59  ;;  %v1798_v2 = vrot.slane %v1736_v14, %v4515_v59 }
 0x57d   :  { %v1766_v8 = vmul.f32 %v1765_v1, %v1745_v19  ;;  %v1767_v61 = vmul.f32 %v1765_v1, %v1750_v9  ;;  %v1799_v10 = vmul.f32 %v1798_v2, %v1778_v30  ;;  %v1800_v11 = vmul.f32 %v1798_v2, %v1783_v29 }
 0x57e   :  { %v1768_v60 = vmul.f32 %v1765_v1, %v1755_v43  ;;  %v1769_v45 = vmul.f32 %v1765_v1, %v1760_v40  ;;  %v1801_v12 = vmul.f32 %v1798_v2, %v1788_v52  ;;  %v1802_v15 = vmul.f32 %v1798_v2, %v1793_v50  ;;  %v1849_v43 = vpop.permute.xlu0 %1848 }
 0x57f   :  { %v1803_v46 = vadd.f32 %v1799_v10, %v1766_v8  ;;  %v1804_v5 = vadd.f32 %v1800_v11, %v1767_v61  ;;  %v1949_v29 = vmul.f32 0.15915494, %v1948_v28 }
 0x580   :  { %v1805_v16 = vadd.f32 %v1801_v12, %v1768_v60  ;;  %v1806_v17 = vadd.f32 %v1802_v15, %v1769_v45 }
 0x581   :  { %v1832_v20 = vadd.f32 %v1815_v31, %v1803_v46  ;;  %v1833_v6 = vadd.f32 %v1820_v0, %v1804_v5  ;;  %v1950_v30 = vfloor.f32 %v1949_v29 }
 0x582   :  { %v1834_v21 = vadd.f32 %v1825_v18, %v1805_v16  ;;  %v1835_v3 = vadd.f32 %v1830_v42, %v1806_v17 }
 0x583   :  { %4036 = vtanh.f32 %v1832_v20  ;;  %v1951_v34 = vmul.f32 6.2831855, %v1950_v30 }
 0x584   :  { %4038 = vtanh.f32 %v1833_v6 }
 0x585   :  { %4040 = vtanh.f32 %v1834_v21  ;;  %v1952_v36 = vsub.f32 %v1948_v28, %v1951_v34 }
 0x586   :  { %4042 = vtanh.f32 %v1835_v3 }
 0x587   :  { %v1953_v7 = vmul.f32 0.15915494, %v1952_v36 }
 0x589   :  { %v1954_v32 = vmax.f32 %v1953_v7, 1e-06 }
 0x58b   :  { %v1955_v58 = vmin.f32 %v1954_v32, 0.999999 }
 0x58d   :  { %v4037_v22 = vpop.eup %4036  ;;  %v1958_v14 = vsub.f32 1.0, %v1955_v58 }
 0x58e   :  { %v4039_v23 = vpop.eup %4038 }
 0x58f   :  { %v4041_v9 = vpop.eup %4040  ;;  %v3871_v19 = vpack.c.bf16 %v4039_v23, %v4037_v22 }
 0x590   :  { %v4043_v24 = vpop.eup %4042 }
 0x591   :  { %3872 = vmatprep.subr.bf16.mxu1 %v3871_v19  ;;  %v3875_v25 = vpack.c.bf16 %v4043_v24, %v4041_v9 }
 0x592   :  { %3874 = vmatpush3.bf16.msra.mxu1 %v3871_v19 }
 0x593   :  { %3876 = vmatprep.subr.bf16.mxu1 %v3875_v25 }
 0x596   :  { %3878 = vmatpush3.bf16.msra.mxu1 %v3875_v25 }
 0x599   :  { %3812 = vmatmul.mubr.msk.f32.vlgmr.msra.gmra.mrb[2].mxu1 %vm351_vm3, %v3645_v26 }
 0x66c   :  { %v3813_v40 = vpop.f32.mrb[2].mxu1 }
 0x66d   :  { %v1934_v44 = vadd.f32 %v3813_v40, %v1854_v38  ;;  %v1928_v48 = vpop.f32.mrb[3].mxu1 }
 0x66e   :  { %v1929_v49 = vadd.f32 %v1928_v48, %v1849_v43 }
 0x66f   :  { %v1980_v50 = vsel %vm476_vm1, %v1934_v44, -inf }
 0x670   :  { %v1981_v52 = vrot.slane %v1980_v50, 4  ;;  %v1938_v53 = vand.u32 2147483647, %v1929_v49  ;;  %v1937_v16 = vmax.f32 %v1929_v49, 0.0  ;;  %v1968_v23 = vrot.slane %v1929_v49, 4 }
 0x672   :  { %v1982_v54 = vmax.f32 %v1980_v50, %v1981_v52  ;;  %v1939_v55 = vsub.f32 0.0, %v1938_v53 }
 0x674   :  { %v1983_v56 = vrot.slane %v1982_v54, 2  ;;  %v1940_v57 = vmul.f32 1.442695, %v1939_v55 }
 0x676   :  { %v1984_v62 = vmax.f32 %v1982_v54, %v1983_v56  ;;  %4044 = vpow2.f32 %v1940_v57  ;;  %v3670_v57 = vld [vmem:[%s5066_s3 + $0x40] sm:$0xff] }
 0x677   :  { %4046 = vlog2.f32 %v1958_v14  ;;  %3822 = vmatprep.mubr.msk.f32.mxu0 %vm351_vm3, %v3670_v57 }
 0x678   :  { %v1985_v63 = vrot.slane %v1984_v62, 1  ;;  %4048 = vlog2.f32 %v1955_v58 }
 0x67a   :  { %v1986_v0 = vmax.f32 %v1984_v62, %v1985_v63 }
 0x67c   :  { %v1987_v31 = vsub.f32 %v1934_v44, %v1986_v0 }
 0x67e   :  { %v1988_v1 = vmul.f32 1.442695, %v1987_v31 }
 0x680   :  { %v4045_v2 = vpop.eup %4044  ;;  %4050 = vpow2.f32 %v1988_v1 }
 0x681   :  { %v1942_v8 = vadd.f32 1.0, %v4045_v2  ;;  %v4047_v61 = vpop.eup %4046 }
 0x682   :  { %v4049_v10 = vpop.eup %4048  ;;  %v4821_v60 = vmul.f32 0.6931472, %v4047_v61 }
 0x683   :  { %4052 = vlog2.f32 %v1942_v8  ;;  %v4824_v15 = vmul.f32 0.6931472, %v4049_v10 }
 0x685   :  { %v1961_v42 = vsub.f32 %v4824_v15, %v4821_v60 }
 0x687   :  { %v1965_v3 = vrot.slane %v1961_v42, %v4515_v59 }
 0x68a   :  { %v4051_v11 = vpop.eup %4050 }
 0x68b   :  { %v1990_v45 = vsel %vm476_vm1, %v4051_v11, 0.0 }
 0x68c   :  { %v1991_v12 = vrot.slane %v1990_v45, 4 }
 0x68d   :  { %v4053_v46 = vpop.eup %4052 }
 0x68e   :  { %v1992_v5 = vadd.f32 %v1991_v12, %v1990_v45  ;;  %v1944_v17 = vmul.f32 0.6931472, %v4053_v46 }
 0x690   :  { %v1993_v18 = vrot.slane %v1992_v5, 2  ;;  %v1945_v20 = vadd.f32 %v1944_v17, %v1937_v16 }
 0x692   :  { %v1994_v6 = vadd.f32 %v1993_v18, %v1992_v5  ;;  %v1946_v21 = vmul.f32 2.88539, %v1945_v20 }
 0x694   :  { %v1966_v22 = vmul.f32 %v1965_v3, %v1946_v21  ;;  %v1995_v9 = vrot.slane %v1994_v6, 1 }
 0x696   :  { %v1970_v19 = vadd.f32 %v1968_v23, %v1966_v22  ;;  %v1996_v25 = vadd.f32 %v1995_v9, %v1994_v6 }
 0x698   :  { %v1971_v24 = vsub.f32 0.0, %v1970_v19 }
 0x69a   :  { %v1972_v26 = vmul.f32 1.442695, %v1971_v24 }
 0x69c   :  { %4054 = vpow2.f32 %v1972_v26 }
 0x69d   :  { %4056 = vrcp.f32 %v1996_v25 }
 0x6a6   :  { %v4055_v27 = vpop.eup %4054 }
 0x6a7   :  { %v4057_v28 = vpop.eup %4056  ;;  %v1974_v29 = vadd.f32 1.0, %v4055_v27 }
 0x6a8   :  { %v1998_v30 = vmul.f32 %v4057_v28, %v4051_v11 }
 0x6a9   :  { %4058 = vrcp.f32 %v1974_v29 }
 0x6aa   :  { %v1999_v34 = vmul.f32 0.96, %v1998_v30 }
 0x6ac   :  { %v2000_v36 = vadd.f32 0.01, %v1999_v34 }
 0x6b3   :  { %v4059_v38 = vpop.eup %4058 }
 0x6b4   :  { %v1977_v40 = vmul.f32 %v4059_v38, %v1946_v21  ;;  %v1978_v43 = vsub.f32 1.0, %v4059_v38  ;;  %v2001_v44 = vmul.f32 %v4059_v38, %v2000_v36 }
 0x6b6   :  { %v1979_v48 = vmul.f32 %v1978_v43, %v1977_v40  ;;  %v2002_v7 = vsel %vm476_vm1, %v2001_v44, 0.0 }
 0x6b7   :  { %v2003_v49 = vrot.slane %v2002_v7, 4 }
 0x6b8   :  { %v2009_v50 = vmul.f32 %v2000_v36, %v1979_v48 }
 0x6b9   :  { %v2004_v52 = vadd.f32 %v2003_v49, %v2002_v7 }
 0x6ba   :  { %v2010_v53 = vsel %vm476_vm1, %v2009_v50, 0.0 }
 0x6bb   :  { %v2005_v32 = vrot.slane %v2004_v52, 2  ;;  %v2011_v54 = vrot.slane %v2010_v53, 4 }
 0x6bd   :  { %v2006_v55 = vadd.f32 %v2005_v32, %v2004_v52  ;;  %v2012_v56 = vadd.f32 %v2011_v54, %v2010_v53 }
 0x6bf   :  { %v2007_v58 = vrot.slane %v2006_v55, 1  ;;  %v2013_v62 = vrot.slane %v2012_v56, 2 }
 0x6c1   :  { %v2008_v63 = vadd.f32 %v2007_v58, %v2006_v55  ;;  %v2014_v14 = vadd.f32 %v2013_v62, %v2012_v56 }
 0x6c3   :  { %v2017_v0 = vmul.f32 6.2831855, %v2008_v63  ;;  %v2015_v31 = vrot.slane %v2014_v14, 1 }
 0x6c5   :  { %v2018_v1 = vadd.f32 %v2017_v0, %v4768_v4  ;;  %v2016_v2 = vadd.f32 %v2015_v31, %v2014_v14 }
 0x6c7   :  { %v2019_v8 = vmul.f32 0.15915494, %v2018_v1  ;;  %v2023_v61 = vmax.f32 %v2016_v2, 1e-30 }
 0x6c9   :  { %v2020_v10 = vfloor.f32 %v2019_v8  ;;  %4060 = vlog2.f32 %v2023_v61 }
 0x6cb   :  { %v2021_v11 = vmul.f32 6.2831855, %v2020_v10 }
 0x6cd   :  { %v4836_v45 = vsub.f32 %v2018_v1, %v2021_v11 }
 0x6cf   :  { %v4840_v12 = vsub.f32 %v4836_v45, %v4288_v13  ;;  %2029 = vst [vmem:[#allocation2 + $0x4] sm:$0x1] %v4836_v45 }
 0x6d1   :  { %v2034_v46 = vand.u32 2139095040, %v4840_v12  ;;  %v2031_v6 = vand.u32 2147483647, %v4840_v12  ;;  %vm2033_vm0 = vcmp.lt.s32.totalorder %v4840_v12, 0 }
 0x6d3   :  { %v4061_v5 = vpop.eup %4060  ;;  %v2035_v16 = vshrl.u32 %v2034_v46, 23  ;;  %v2038_v9 = vand.u32 8388607, %v2031_v6  ;;  %vm2032_vm2 = vcmp.le.f32.partialorder %v2031_v6, 0.7853982 }
 0x6d4   :  { %v2025_v17 = vmul.f32 0.6931472, %v4061_v5 }
 0x6d5   :  { %v3650_v4 = vadd.s32 4294967169, %v2035_v16  ;;  %v2039_v34 = vor.u32 8388608, %v2038_v9 }
 0x6d6   :  { %v2026_v42 = vsub.f32 %v2025_v17, %v4824_v15 }
 0x6d7   :  { %v2041_v18 = vadd.s32 1, %v3650_v4  ;;  %v2079_v55 = vshll.u32 %v2039_v34, 8 }
 0x6d8   :  { %v2027_v20 = vsub.f32 %v2026_v42, %v4821_v60 }
 0x6d9   :  { %vm2042_vm9 = vcmp.gt.s32.totalorder %v2041_v18, 0 }
 0x6da   :  { %v2043_v21 = vsel %vm2042_vm9, %v2041_v18, 0  ;;  %v4848_v3 = vadd.f32 %v2027_v20, %v4780_v47 }
 0x6db   :  { %v2045_v22 = vand.u32 31, %v2043_v21  ;;  %v2044_v19 = vshrl.u32 %v2043_v21, 5 }
 0x6dd   :  { %v2046_v23 = vsub.s32 32, %v2045_v22  ;;  %v2048_v24 = vshll.u32 %v4201_v33, %v2045_v22  ;;  %v2051_v15 = vshll.u32 %v4202_v35, %v2045_v22  ;;  %v2054_v26 = vshll.u32 %v4203_v37, %v2045_v22 }
 0x6de   :  { %v2057_v47 = vshll.u32 %v4204_v39, %v2045_v22  ;;  %v2060_v29 = vshll.u32 %v4205_v41, %v2045_v22  ;;  %vm2063_vm10 = vcmp.lt.s32.totalorder %v2044_v19, 1  ;;  %vm2066_vm11 = vcmp.lt.s32.totalorder %v2044_v19, 4 }
 0x6df   :  { %v2049_v25 = vshrl.u32 %v4202_v35, %v2046_v23  ;;  %v2052_v60 = vshrl.u32 %v4203_v37, %v2046_v23  ;;  %v2055_v27 = vshrl.u32 %v4204_v39, %v2046_v23  ;;  %v2058_v28 = vshrl.u32 %v4205_v41, %v2046_v23 }
 0x6e0   :  { %v2061_v30 = vshrl.u32 %v4206_v51, %v2046_v23  ;;  %v2047_v50 = vshrl.u32 %v4201_v33, %v2046_v23  ;;  %vm2065_vm12 = vcmp.lt.s32.totalorder %v2044_v19, 3  ;;  %vm2064_vm13 = vcmp.lt.s32.totalorder %v2044_v19, 2 }
 0x6e1   :  { %v2050_v36 = vor.u32 %v2049_v25, %v2048_v24  ;;  %v2053_v38 = vor.u32 %v2052_v60, %v2051_v15  ;;  %v2056_v40 = vor.u32 %v2055_v27, %v2054_v26  ;;  %v2059_v43 = vor.u32 %v2058_v28, %v2057_v47  ;;  %v2251_v47 = vpop.permute.xlu1 %2250  ;;  %v2246_v28 = vpop.permute.xlu0 %2245 }
 0x6e2   :  { %v2062_v44 = vor.u32 %v2061_v30, %v2060_v29 }
 0x6e3   :  { %v2068_v48 = vsel %vm2066_vm11, %v2056_v40, 2102212464  ;;  %v2071_v7 = vsel %vm2063_vm10, %v2050_v36, %v2053_v38  ;;  %v2075_v49 = vsel %vm2063_vm10, %v2053_v38, %v2056_v40  ;;  %v2072_v52 = vsel %vm2066_vm11, %v2059_v43, 920167782 }
 0x6e4   :  { %v2076_v53 = vsel %vm2066_vm11, %v2062_v44, 1326507024  ;;  %v2073_v32 = vsel %vm2065_vm12, %v2056_v40, %v2072_v52  ;;  %v2067_v56 = vsel %vm2063_vm10, %v2047_v50, %v2050_v36  ;;  %v2069_v57 = vsel %vm2065_vm12, %v2053_v38, %v2068_v48 }
 0x6e5   :  { %v2077_v54 = vsel %vm2065_vm12, %v2059_v43, %v2076_v53  ;;  %v2074_v58 = vsel %vm2064_vm13, %v2071_v7, %v2073_v32  ;;  %v2070_v1 = vsel %vm2064_vm13, %v2067_v56, %v2069_v57  ;;  %v2284_v40 = vpop.permute.xlu1 %2283  ;;  %v2279_v43 = vpop.permute.xlu0 %2278  ;;  %vm2123_vm10 = vweird.f32 %v4840_v12 }
 0x6e6   :  { %v2078_v62 = vsel %vm2064_vm13, %v2075_v49, %v2077_v54  ;;  %v4866_v0 = vmul.u32.u64.low %v2079_v55, %v2074_v58  ;;  %v4867_v31 = vmul.u32.u64.high %v2079_v55, %v2074_v58, %v4866_v0  ;;  %v2086_v8 = vmul.u32 %v2079_v55, %v2070_v1 }
 0x6e7   :  { %v4863_v63 = vmul.u32.u64.low %v2079_v55, %v2078_v62  ;;  %v4864_v14 = vmul.u32.u64.high %v2079_v55, %v2078_v62, %v4863_v63 }
 0x6e8   :  { %v2089_v2 = vadd.s32 1, %v4867_v31 }
 0x6e9   :  { %vm2088_vm14 = vc.u32 %v4864_v14, %v4866_v0  ;;  %v2087_v21 = vadd.s32 %v4866_v0, %v4864_v14  ;;  %v2261_v49 = vpop.permute.xlu1 %2260  ;;  %v2256_v50 = vpop.permute.xlu0 %2255 }
 0x6ea   :  { %v2090_v61 = vsel %vm2088_vm14, %v2089_v2, %v4867_v31 }
 0x6eb   :  { %v2091_v10 = vadd.s32 %v2090_v61, %v2086_v8 }
 0x6ed   :  { %v2092_v11 = vadd.s32 536870912, %v2091_v10  ;;  %v2294_v55 = vpop.permute.xlu1 %2293  ;;  %v2289_v56 = vpop.permute.xlu0 %2288 }
 0x6ef   :  { %v2093_v46 = vshrl.u32 %v2092_v11, 30 }
 0x6f1   :  { %v2094_v5 = vshll.u32 %v2093_v46, 30  ;;  %v2117_v30 = vsub.s32 4, %v2093_v46  ;;  %v2321_v8 = vpop.permute.xlu1 %2320  ;;  %v2316_v61 = vpop.permute.xlu0 %2315 }
 0x6f3   :  { %v2095_v16 = vsub.s32 %v2091_v10, %v2094_v5  ;;  %v2118_v38 = vsel %vm2033_vm0, %v2117_v30, %v2093_v46 }
 0x6f4   :  { %v2120_v48 = vsel %vm2032_vm2, 0, %v2118_v38 }
 0x6f5   :  { %v2097_v17 = vsub.s32 0, %v2095_v16  ;;  %v2227_v7 = vadd.s32 3, %v2120_v48  ;;  %v2124_v52 = vand.u32 3, %v2120_v48 }
 0x6f7   :  { %v3651_v4 = vmin.u32 %v2097_v17, %v2095_v16  ;;  %v2228_v53 = vand.u32 3, %v2227_v7  ;;  %vm2129_vm4 = vcmp.eq.s32.totalorder %v2124_v52, 2  ;;  %vm2126_vm6 = vcmp.eq.s32.totalorder %v2124_v52, 0 }
 0x6f8   :  { %vm2125_vm8 = vcmp.lt.s32.totalorder %v2124_v52, 2 }
 0x6f9   :  { %v2099_v42 = vclz %v3651_v4  ;;  %vm2233_vm5 = vcmp.eq.s32.totalorder %v2228_v53, 2  ;;  %vm2230_vm7 = vcmp.eq.s32.totalorder %v2228_v53, 0  ;;  %vm2229_vm9 = vcmp.lt.s32.totalorder %v2228_v53, 2 }
 0x6fb   :  { %v3652_v18 = vadd.s32 4294967294, %v2099_v42 }
 0x6fd   :  { %vm3653_vm15 = vcmp.lt.s32.totalorder %v3652_v18, 0 }
 0x6fe   :  { %v2102_v20 = vsel %vm3653_vm15, 0, %v3652_v18 }
 0x6ff   :  { %v2103_v22 = vsub.s32 32, %v2102_v20  ;;  %v2107_v23 = vsub.s32 4294967266, %v2102_v20  ;;  %v2104_v9 = vshll.u32 %v2095_v16, %v2102_v20 }
 0x701   :  { %v2105_v19 = vshrl.u32 %v2087_v21, %v2103_v22  ;;  %v2108_v24 = vadd.s32 127, %v2107_v23 }
 0x703   :  { %v2106_v15 = vor.u32 %v2105_v19, %v2104_v9  ;;  %v2109_v25 = vshll.u32 %v2108_v24, 23  ;;  %v2331_v9 = vpop.permute.xlu1 %2330  ;;  %v2326_v19 = vpop.permute.xlu0 %2325 }
 0x705   :  { %v2110_v60 = vor.u32 4788187, %v2109_v25  ;;  %v2113_v27 = vcvt.s32.f32 %v2106_v15 }
 0x707   :  { %v2111_v26 = vand.u32 2147483647, %v2110_v60  ;;  %v2355_v7 = vpop.permute.xlu1 %2354 }
 0x709   :  { %v2114_v29 = vmul.f32 %v2113_v27, %v2111_v26 }
 0x70b   :  { %v2115_v34 = vxor.u32 2147483648, %v2114_v29 }
 0x70d   :  { %v2116_v36 = vsel %vm2033_vm0, %v2115_v34, %v2114_v29  ;;  %v3671_v34 = vld [vmem:[%s5066_s3 + $0x48] sm:$0xf] }
 0x70e   :  { %v2119_v44 = vsel %vm2032_vm2, %v4840_v12, %v2116_v36  ;;  %v2448_v36 = vld [vmem:[%s5063_s0 + $0x5] sm:$0x1] }
 0x70f   :  { %4062 = vcosq.f32 %v2119_v44  ;;  %v2449_v38 = vsub.f32 %v2448_v36, %v4836_v45 }
 0x710   :  { %4064 = vsinq.f32 %v2119_v44 }
 0x719   :  { %v4063_v32 = vpop.eup %4062 }
 0x71a   :  { %v4065_v54 = vpop.eup %4064  ;;  %v2130_v57 = vxor.u32 2147483648, %v4063_v32 }
 0x71b   :  { %v2127_v6 = vxor.u32 2147483648, %v4065_v54 }
 0x71c   :  { %v2131_v58 = vsel %vm2129_vm4, %v2130_v57, %v4065_v54  ;;  %v2235_v62 = vsel %vm2233_vm5, %v2130_v57, %v4065_v54 }
 0x71d   :  { %v2128_v63 = vsel %vm2126_vm6, %v4063_v32, %v2127_v6  ;;  %v2232_v14 = vsel %vm2230_vm7, %v4063_v32, %v2127_v6 }
 0x71e   :  { %v2132_v0 = vsel %vm2125_vm8, %v2128_v63, %v2131_v58  ;;  %v2236_v31 = vsel %vm2229_vm9, %v2232_v14, %v2235_v62 }
 0x71f   :  { %v2133_v1 = vsel %vm2123_vm10, nan, %v2132_v0  ;;  %v2237_v2 = vsel %vm2123_vm10, nan, %v2236_v31 }
 0x720   :  { %v2266_v10 = vrot.slane %v2133_v1, %v4515_v59  ;;  %v2299_v11 = vrot.slane %v2237_v2, %v4515_v59 }
 0x722   :  { %v2267_v46 = vmul.f32 %v2266_v10, %v2246_v28  ;;  %v2268_v5 = vmul.f32 %v2266_v10, %v2251_v47  ;;  %v2300_v16 = vmul.f32 %v2299_v11, %v2279_v43  ;;  %v2301_v17 = vmul.f32 %v2299_v11, %v2284_v40 }
 0x723   :  { %v2269_v4 = vmul.f32 %v2266_v10, %v2256_v50  ;;  %v2270_v42 = vmul.f32 %v2266_v10, %v2261_v49  ;;  %v2302_v18 = vmul.f32 %v2299_v11, %v2289_v56  ;;  %v2303_v20 = vmul.f32 %v2299_v11, %v2294_v55  ;;  %v2350_v50 = vpop.permute.xlu0 %2349 }
 0x724   :  { %v2304_v21 = vadd.f32 %v2300_v16, %v2267_v46  ;;  %v2305_v12 = vadd.f32 %v2301_v17, %v2268_v5  ;;  %v2450_v40 = vmul.f32 0.15915494, %v2449_v38 }
 0x725   :  { %v2306_v22 = vadd.f32 %v2302_v18, %v2269_v4  ;;  %v2307_v23 = vadd.f32 %v2303_v20, %v2270_v42 }
 0x726   :  { %v2333_v24 = vadd.f32 %v2316_v61, %v2304_v21  ;;  %v2334_v15 = vadd.f32 %v2321_v8, %v2305_v12  ;;  %v2451_v43 = vfloor.f32 %v2450_v40 }
 0x727   :  { %v2335_v25 = vadd.f32 %v2326_v19, %v2306_v22  ;;  %v2336_v60 = vadd.f32 %v2331_v9, %v2307_v23 }
 0x728   :  { %4066 = vtanh.f32 %v2333_v24  ;;  %v2452_v44 = vmul.f32 6.2831855, %v2451_v43 }
 0x729   :  { %4068 = vtanh.f32 %v2334_v15 }
 0x72a   :  { %4070 = vtanh.f32 %v2335_v25  ;;  %v2453_v48 = vsub.f32 %v2449_v38, %v2452_v44 }
 0x72b   :  { %4072 = vtanh.f32 %v2336_v60 }
 0x72c   :  { %v2454_v32 = vmul.f32 0.15915494, %v2453_v48 }
 0x72e   :  { %v2455_v6 = vmax.f32 %v2454_v32, 1e-06 }
 0x730   :  { %v2456_v0 = vmin.f32 %v2455_v6, 0.999999 }
 0x732   :  { %v4067_v26 = vpop.eup %4066  ;;  %v2459_v2 = vsub.f32 1.0, %v2456_v0 }
 0x733   :  { %v4069_v27 = vpop.eup %4068 }
 0x734   :  { %v4071_v47 = vpop.eup %4070  ;;  %v3879_v28 = vpack.c.bf16 %v4069_v27, %v4067_v26 }
 0x735   :  { %v4073_v29 = vpop.eup %4072 }
 0x736   :  { %3880 = vmatprep.subr.bf16.mxu0 %v3879_v28  ;;  %v3883_v30 = vpack.c.bf16 %v4073_v29, %v4071_v47 }
 0x737   :  { %3882 = vmatpush3.bf16.msra.mxu0 %v3879_v28 }
 0x738   :  { %3884 = vmatprep.subr.bf16.mxu0 %v3883_v30 }
 0x73b   :  { %3886 = vmatpush3.bf16.msra.mxu0 %v3883_v30 }
 0x73e   :  { %3823 = vmatmul.mubr.msk.f32.vlgmr.msra.gmra.mrb[4].mxu0 %vm351_vm3, %v3671_v34 }
 0x811   :  { %v3824_v49 = vpop.f32.mrb[4].mxu0 }
 0x812   :  { %v2435_v52 = vadd.f32 %v3824_v49, %v2355_v7  ;;  %v2429_v53 = vpop.f32.mrb[5].mxu0 }
 0x813   :  { %v2430_v54 = vadd.f32 %v2429_v53, %v2350_v50 }
 0x814   :  { %v2481_v55 = vsel %vm476_vm1, %v2435_v52, -inf }
 0x815   :  { %v2482_v56 = vrot.slane %v2481_v55, 4  ;;  %v2439_v57 = vand.u32 2147483647, %v2430_v54  ;;  %v2438_v22 = vmax.f32 %v2430_v54, 0.0  ;;  %v2469_v27 = vrot.slane %v2430_v54, 4 }
 0x817   :  { %v2483_v58 = vmax.f32 %v2481_v55, %v2482_v56  ;;  %v2440_v62 = vsub.f32 0.0, %v2439_v57 }
 0x819   :  { %v2484_v63 = vrot.slane %v2483_v58, 2  ;;  %v2441_v14 = vmul.f32 1.442695, %v2440_v62 }
 0x81b   :  { %v2485_v31 = vmax.f32 %v2483_v58, %v2484_v63  ;;  %4074 = vpow2.f32 %v2441_v14  ;;  %v3696_v14 = vld [vmem:[%s5066_s3 + $0x50] sm:$0xff] }
 0x81c   :  { %4076 = vlog2.f32 %v2459_v2  ;;  %3833 = vmatprep.mubr.msk.f32.mxu1 %vm351_vm3, %v3696_v14 }
 0x81d   :  { %v2486_v1 = vrot.slane %v2485_v31, 1  ;;  %4078 = vlog2.f32 %v2456_v0 }
 0x81f   :  { %v2487_v8 = vmax.f32 %v2485_v31, %v2486_v1 }
 0x821   :  { %v2488_v61 = vsub.f32 %v2435_v52, %v2487_v8 }
 0x823   :  { %v2489_v10 = vmul.f32 1.442695, %v2488_v61 }
 0x825   :  { %v4075_v11 = vpop.eup %4074  ;;  %4080 = vpow2.f32 %v2489_v10 }
 0x826   :  { %v2443_v46 = vadd.f32 1.0, %v4075_v11  ;;  %v4077_v5 = vpop.eup %4076 }
 0x827   :  { %v4079_v16 = vpop.eup %4078  ;;  %v4889_v4 = vmul.f32 0.6931472, %v4077_v5 }
 0x828   :  { %4082 = vlog2.f32 %v2443_v46  ;;  %v4892_v20 = vmul.f32 0.6931472, %v4079_v16 }
 0x82a   :  { %v2462_v9 = vsub.f32 %v4892_v20, %v4889_v4 }
 0x82c   :  { %v2466_v60 = vrot.slane %v2462_v9, %v4515_v59 }
 0x82f   :  { %v4081_v17 = vpop.eup %4080 }
 0x830   :  { %v2491_v42 = vsel %vm476_vm1, %v4081_v17, 0.0 }
 0x831   :  { %v2492_v18 = vrot.slane %v2491_v42, 4 }
 0x832   :  { %v4083_v21 = vpop.eup %4082 }
 0x833   :  { %v2493_v12 = vadd.f32 %v2492_v18, %v2491_v42  ;;  %v2445_v23 = vmul.f32 0.6931472, %v4083_v21 }
 0x835   :  { %v2494_v19 = vrot.slane %v2493_v12, 2  ;;  %v2446_v24 = vadd.f32 %v2445_v23, %v2438_v22 }
 0x837   :  { %v2495_v15 = vadd.f32 %v2494_v19, %v2493_v12  ;;  %v2447_v25 = vmul.f32 2.88539, %v2446_v24 }
 0x839   :  { %v2467_v26 = vmul.f32 %v2466_v60, %v2447_v25  ;;  %v2496_v47 = vrot.slane %v2495_v15, 1 }
 0x83b   :  { %v2471_v28 = vadd.f32 %v2469_v27, %v2467_v26  ;;  %v2497_v30 = vadd.f32 %v2496_v47, %v2495_v15 }
 0x83d   :  { %v2472_v29 = vsub.f32 0.0, %v2471_v28 }
 0x83f   :  { %v2473_v34 = vmul.f32 1.442695, %v2472_v29 }
 0x841   :  { %4084 = vpow2.f32 %v2473_v34 }
 0x842   :  { %4086 = vrcp.f32 %v2497_v30 }
 0x84b   :  { %v4085_v36 = vpop.eup %4084 }
 0x84c   :  { %v4087_v38 = vpop.eup %4086  ;;  %v2475_v40 = vadd.f32 1.0, %v4085_v36 }
 0x84d   :  { %v2499_v43 = vmul.f32 %v4087_v38, %v4081_v17 }
 0x84e   :  { %4088 = vrcp.f32 %v2475_v40 }
 0x84f   :  { %v2500_v44 = vmul.f32 0.96, %v2499_v43 }
 0x851   :  { %v2501_v48 = vadd.f32 0.01, %v2500_v44 }
 0x858   :  { %v4089_v7 = vpop.eup %4088 }
 0x859   :  { %v2478_v49 = vmul.f32 %v4089_v7, %v2447_v25  ;;  %v2479_v50 = vsub.f32 1.0, %v4089_v7  ;;  %v2502_v52 = vmul.f32 %v4089_v7, %v2501_v48 }
 0x85b   :  { %v2480_v53 = vmul.f32 %v2479_v50, %v2478_v49  ;;  %v2503_v32 = vsel %vm476_vm1, %v2502_v52, 0.0 }
 0x85c   :  { %v2504_v54 = vrot.slane %v2503_v32, 4 }
 0x85d   :  { %v2510_v55 = vmul.f32 %v2501_v48, %v2480_v53 }
 0x85e   :  { %v2505_v56 = vadd.f32 %v2504_v54, %v2503_v32 }
 0x85f   :  { %v2511_v57 = vsel %vm476_vm1, %v2510_v55, 0.0 }
 0x860   :  { %v2506_v6 = vrot.slane %v2505_v56, 2  ;;  %v2512_v58 = vrot.slane %v2511_v57, 4 }
 0x862   :  { %v2507_v62 = vadd.f32 %v2506_v6, %v2505_v56  ;;  %v2513_v63 = vadd.f32 %v2512_v58, %v2511_v57 }
 0x864   :  { %v2508_v0 = vrot.slane %v2507_v62, 1  ;;  %v2514_v31 = vrot.slane %v2513_v63, 2 }
 0x866   :  { %v2509_v1 = vadd.f32 %v2508_v0, %v2507_v62  ;;  %v2515_v2 = vadd.f32 %v2514_v31, %v2513_v63 }
 0x868   :  { %v2518_v8 = vmul.f32 6.2831855, %v2509_v1  ;;  %v2516_v61 = vrot.slane %v2515_v2, 1 }
 0x86a   :  { %v2519_v10 = vadd.f32 %v2518_v8, %v4836_v45  ;;  %v2517_v11 = vadd.f32 %v2516_v61, %v2515_v2 }
 0x86c   :  { %v2520_v46 = vmul.f32 0.15915494, %v2519_v10  ;;  %v2524_v5 = vmax.f32 %v2517_v11, 1e-30 }
 0x86e   :  { %v2521_v16 = vfloor.f32 %v2520_v46  ;;  %4090 = vlog2.f32 %v2524_v5 }
 0x870   :  { %v2522_v17 = vmul.f32 6.2831855, %v2521_v16 }
 0x872   :  { %v4904_v42 = vsub.f32 %v2519_v10, %v2522_v17 }
 0x874   :  { %v4908_v18 = vsub.f32 %v4904_v42, %v4288_v13  ;;  %2530 = vst [vmem:[#allocation2 + $0x5] sm:$0x1] %v4904_v42 }
 0x876   :  { %v2535_v21 = vand.u32 2139095040, %v4908_v18  ;;  %v2532_v15 = vand.u32 2147483647, %v4908_v18  ;;  %vm2534_vm4 = vcmp.lt.s32.totalorder %v4908_v18, 0 }
 0x878   :  { %v4091_v12 = vpop.eup %4090  ;;  %v2536_v22 = vshrl.u32 %v2535_v21, 23  ;;  %v2539_v47 = vand.u32 8388607, %v2532_v15  ;;  %vm2533_vm5 = vcmp.le.f32.partialorder %v2532_v15, 0.7853982 }
 0x879   :  { %v2526_v23 = vmul.f32 0.6931472, %v4091_v12 }
 0x87a   :  { %v3676_v45 = vadd.s32 4294967169, %v2536_v22  ;;  %v2540_v44 = vor.u32 8388608, %v2539_v47 }
 0x87b   :  { %v2527_v9 = vsub.f32 %v2526_v23, %v4892_v20 }
 0x87c   :  { %v2542_v19 = vadd.s32 1, %v3676_v45  ;;  %v2580_v62 = vshll.u32 %v2540_v44, 8 }
 0x87d   :  { %v2528_v24 = vsub.f32 %v2527_v9, %v4889_v4 }
 0x87e   :  { %vm2543_vm11 = vcmp.gt.s32.totalorder %v2542_v19, 0 }
 0x87f   :  { %v2544_v25 = vsel %vm2543_vm11, %v2542_v19, 0  ;;  %v4916_v60 = vadd.f32 %v2528_v24, %v4848_v3 }
 0x880   :  { %v2546_v26 = vand.u32 31, %v2544_v25  ;;  %v2545_v28 = vshrl.u32 %v2544_v25, 5 }
 0x882   :  { %v2547_v27 = vsub.s32 32, %v2546_v26  ;;  %v2549_v29 = vshll.u32 %v4201_v33, %v2546_v26  ;;  %v2552_v20 = vshll.u32 %v4202_v35, %v2546_v26  ;;  %v2555_v34 = vshll.u32 %v4203_v37, %v2546_v26 }
 0x883   :  { %v2558_v3 = vshll.u32 %v4204_v39, %v2546_v26  ;;  %v2561_v40 = vshll.u32 %v4205_v41, %v2546_v26  ;;  %vm2564_vm12 = vcmp.lt.s32.totalorder %v2545_v28, 1  ;;  %vm2567_vm13 = vcmp.lt.s32.totalorder %v2545_v28, 4 }
 0x884   :  { %v2550_v30 = vshrl.u32 %v4202_v35, %v2547_v27  ;;  %v2553_v4 = vshrl.u32 %v4203_v37, %v2547_v27  ;;  %v2556_v36 = vshrl.u32 %v4204_v39, %v2547_v27  ;;  %v2559_v38 = vshrl.u32 %v4205_v41, %v2547_v27 }
 0x885   :  { %v2562_v43 = vshrl.u32 %v4206_v51, %v2547_v27  ;;  %v2548_v55 = vshrl.u32 %v4201_v33, %v2547_v27  ;;  %vm2566_vm14 = vcmp.lt.s32.totalorder %v2545_v28, 3  ;;  %vm2565_vm15 = vcmp.lt.s32.totalorder %v2545_v28, 2 }
 0x886   :  { %v2551_v48 = vor.u32 %v2550_v30, %v2549_v29  ;;  %v2554_v7 = vor.u32 %v2553_v4, %v2552_v20  ;;  %v2557_v49 = vor.u32 %v2556_v36, %v2555_v34  ;;  %v2560_v50 = vor.u32 %v2559_v38, %v2558_v3  ;;  %v2752_v3 = vpop.permute.xlu1 %2751  ;;  %v2747_v38 = vpop.permute.xlu0 %2746 }
 0x887   :  { %v2563_v52 = vor.u32 %v2562_v43, %v2561_v40 }
 0x888   :  { %v2569_v53 = vsel %vm2567_vm13, %v2557_v49, 2102212464  ;;  %v2572_v32 = vsel %vm2564_vm12, %v2551_v48, %v2554_v7  ;;  %v2576_v54 = vsel %vm2564_vm12, %v2554_v7, %v2557_v49  ;;  %v2573_v56 = vsel %vm2567_vm13, %v2560_v50, 920167782 }
 0x889   :  { %v2577_v57 = vsel %vm2567_vm13, %v2563_v52, 1326507024  ;;  %v2574_v6 = vsel %vm2566_vm14, %v2557_v49, %v2573_v56  ;;  %v2568_v63 = vsel %vm2564_vm12, %v2548_v55, %v2551_v48  ;;  %v2570_v14 = vsel %vm2566_vm14, %v2554_v7, %v2569_v53 }
 0x88a   :  { %v2578_v58 = vsel %vm2566_vm14, %v2560_v50, %v2577_v57  ;;  %v2575_v0 = vsel %vm2565_vm15, %v2572_v32, %v2574_v6  ;;  %v2571_v10 = vsel %vm2565_vm15, %v2568_v63, %v2570_v14  ;;  %v2785_v49 = vpop.permute.xlu1 %2784  ;;  %v2780_v50 = vpop.permute.xlu0 %2779  ;;  %vm2624_vm12 = vweird.f32 %v4908_v18 }
 0x88b   :  { %v2579_v31 = vsel %vm2565_vm15, %v2576_v54, %v2578_v58  ;;  %v4934_v8 = vmul.u32.u64.low %v2580_v62, %v2575_v0  ;;  %v4935_v61 = vmul.u32.u64.high %v2580_v62, %v2575_v0, %v4934_v8  ;;  %v2587_v46 = vmul.u32 %v2580_v62, %v2571_v10 }
 0x88c   :  { %v4931_v1 = vmul.u32.u64.low %v2580_v62, %v2579_v31  ;;  %v4932_v2 = vmul.u32.u64.high %v2580_v62, %v2579_v31, %v4931_v1 }
 0x88d   :  { %v2590_v11 = vadd.s32 1, %v4935_v61 }
 0x88e   :  { %vm2589_vm0 = vc.u32 %v4932_v2, %v4934_v8  ;;  %v2588_v25 = vadd.s32 %v4934_v8, %v4932_v2  ;;  %v2762_v54 = vpop.permute.xlu1 %2761  ;;  %v2757_v55 = vpop.permute.xlu0 %2756 }
 0x88f   :  { %v2591_v5 = vsel %vm2589_vm0, %v2590_v11, %v4935_v61 }
 0x890   :  { %v2592_v16 = vadd.s32 %v2591_v5, %v2587_v46 }
 0x892   :  { %v2593_v17 = vadd.s32 536870912, %v2592_v16  ;;  %v2795_v62 = vpop.permute.xlu1 %2794  ;;  %v2790_v63 = vpop.permute.xlu0 %2789 }
 0x894   :  { %v2594_v21 = vshrl.u32 %v2593_v17, 30 }
 0x896   :  { %v2595_v12 = vshll.u32 %v2594_v21, 30  ;;  %v2618_v43 = vsub.s32 4, %v2594_v21  ;;  %v2822_v46 = vpop.permute.xlu1 %2821  ;;  %v2817_v5 = vpop.permute.xlu0 %2816 }
 0x898   :  { %v2596_v22 = vsub.s32 %v2592_v16, %v2595_v12  ;;  %v2619_v7 = vsel %vm2534_vm4, %v2618_v43, %v2594_v21 }
 0x899   :  { %v2621_v53 = vsel %vm2533_vm5, 0, %v2619_v7 }
 0x89a   :  { %v2598_v23 = vsub.s32 0, %v2596_v22  ;;  %v2728_v32 = vadd.s32 3, %v2621_v53  ;;  %v2625_v56 = vand.u32 3, %v2621_v53 }
 0x89c   :  { %v3677_v45 = vmin.u32 %v2598_v23, %v2596_v22  ;;  %v2729_v57 = vand.u32 3, %v2728_v32  ;;  %vm2630_vm6 = vcmp.eq.s32.totalorder %v2625_v56, 2  ;;  %vm2627_vm8 = vcmp.eq.s32.totalorder %v2625_v56, 0 }
 0x89d   :  { %vm2626_vm10 = vcmp.lt.s32.totalorder %v2625_v56, 2 }
 0x89e   :  { %v2600_v9 = vclz %v3677_v45  ;;  %vm2734_vm7 = vcmp.eq.s32.totalorder %v2729_v57, 2  ;;  %vm2731_vm9 = vcmp.eq.s32.totalorder %v2729_v57, 0  ;;  %vm2730_vm11 = vcmp.lt.s32.totalorder %v2729_v57, 2 }
 0x8a0   :  { %v3678_v19 = vadd.s32 4294967294, %v2600_v9 }
 0x8a2   :  { %vm3679_vm2 = vcmp.lt.s32.totalorder %v3678_v19, 0 }
 0x8a3   :  { %v2603_v24 = vsel %vm3679_vm2, 0, %v3678_v19 }
 0x8a4   :  { %v2604_v26 = vsub.s32 32, %v2603_v24  ;;  %v2608_v27 = vsub.s32 4294967266, %v2603_v24  ;;  %v2605_v47 = vshll.u32 %v2596_v22, %v2603_v24 }
 0x8a6   :  { %v2606_v28 = vshrl.u32 %v2588_v25, %v2604_v26  ;;  %v2609_v29 = vadd.s32 127, %v2608_v27 }
 0x8a8   :  { %v2607_v20 = vor.u32 %v2606_v28, %v2605_v47  ;;  %v2610_v30 = vshll.u32 %v2609_v29, 23  ;;  %v2832_v47 = vpop.permute.xlu1 %2831  ;;  %v2827_v28 = vpop.permute.xlu0 %2826 }
 0x8aa   :  { %v2611_v4 = vor.u32 4788187, %v2610_v30  ;;  %v2614_v36 = vcvt.s32.f32 %v2607_v20 }
 0x8ac   :  { %v2612_v34 = vand.u32 2147483647, %v2611_v4  ;;  %v2856_v32 = vpop.permute.xlu1 %2855 }
 0x8ae   :  { %v2615_v40 = vmul.f32 %v2614_v36, %v2612_v34 }
 0x8b0   :  { %v2616_v44 = vxor.u32 2147483648, %v2615_v40 }
 0x8b2   :  { %v2617_v48 = vsel %vm2534_vm4, %v2616_v44, %v2615_v40  ;;  %v3697_v44 = vld [vmem:[%s5066_s3 + $0x58] sm:$0xf] }
 0x8b3   :  { %v2620_v52 = vsel %vm2533_vm5, %v4908_v18, %v2617_v48  ;;  %v2949_v48 = vld [vmem:[%s5063_s0 + $0x6] sm:$0x1] }
 0x8b4   :  { %4092 = vcosq.f32 %v2620_v52  ;;  %v2950_v7 = vsub.f32 %v2949_v48, %v4904_v42 }
 0x8b5   :  { %4094 = vsinq.f32 %v2620_v52 }
 0x8be   :  { %v4093_v6 = vpop.eup %4092 }
 0x8bf   :  { %v4095_v58 = vpop.eup %4094  ;;  %v2631_v14 = vxor.u32 2147483648, %v4093_v6 }
 0x8c0   :  { %v2628_v15 = vxor.u32 2147483648, %v4095_v58 }
 0x8c1   :  { %v2632_v0 = vsel %vm2630_vm6, %v2631_v14, %v4095_v58  ;;  %v2736_v31 = vsel %vm2734_vm7, %v2631_v14, %v4095_v58 }
 0x8c2   :  { %v2629_v1 = vsel %vm2627_vm8, %v4093_v6, %v2628_v15  ;;  %v2733_v2 = vsel %vm2731_vm9, %v4093_v6, %v2628_v15 }
 0x8c3   :  { %v2633_v8 = vsel %vm2626_vm10, %v2629_v1, %v2632_v0  ;;  %v2737_v61 = vsel %vm2730_vm11, %v2733_v2, %v2736_v31 }
 0x8c4   :  { %v2634_v10 = vsel %vm2624_vm12, nan, %v2633_v8  ;;  %v2738_v11 = vsel %vm2624_vm12, nan, %v2737_v61 }
 0x8c5   :  { %v2767_v16 = vrot.slane %v2634_v10, %v4515_v59  ;;  %v2800_v17 = vrot.slane %v2738_v11, %v4515_v59 }
 0x8c7   :  { %v2768_v21 = vmul.f32 %v2767_v16, %v2747_v38  ;;  %v2769_v12 = vmul.f32 %v2767_v16, %v2752_v3  ;;  %v2801_v22 = vmul.f32 %v2800_v17, %v2780_v50  ;;  %v2802_v23 = vmul.f32 %v2800_v17, %v2785_v49 }
 0x8c8   :  { %v2770_v45 = vmul.f32 %v2767_v16, %v2757_v55  ;;  %v2771_v9 = vmul.f32 %v2767_v16, %v2762_v54  ;;  %v2803_v19 = vmul.f32 %v2800_v17, %v2790_v63  ;;  %v2804_v24 = vmul.f32 %v2800_v17, %v2795_v62  ;;  %v2851_v55 = vpop.permute.xlu0 %2850 }
 0x8c9   :  { %v2805_v25 = vadd.f32 %v2801_v22, %v2768_v21  ;;  %v2806_v18 = vadd.f32 %v2802_v23, %v2769_v12  ;;  %v2951_v49 = vmul.f32 0.15915494, %v2950_v7 }
 0x8ca   :  { %v2807_v26 = vadd.f32 %v2803_v19, %v2770_v45  ;;  %v2808_v27 = vadd.f32 %v2804_v24, %v2771_v9 }
 0x8cb   :  { %v2834_v29 = vadd.f32 %v2817_v5, %v2805_v25  ;;  %v2835_v20 = vadd.f32 %v2822_v46, %v2806_v18  ;;  %v2952_v50 = vfloor.f32 %v2951_v49 }
 0x8cc   :  { %v2836_v30 = vadd.f32 %v2827_v28, %v2807_v26  ;;  %v2837_v4 = vadd.f32 %v2832_v47, %v2808_v27 }
 0x8cd   :  { %4096 = vtanh.f32 %v2834_v29  ;;  %v2953_v52 = vmul.f32 6.2831855, %v2952_v50 }
 0x8ce   :  { %4098 = vtanh.f32 %v2835_v20 }
 0x8cf   :  { %4100 = vtanh.f32 %v2836_v30  ;;  %v2954_v53 = vsub.f32 %v2950_v7, %v2953_v52 }
 0x8d0   :  { %4102 = vtanh.f32 %v2837_v4 }
 0x8d1   :  { %v2955_v6 = vmul.f32 0.15915494, %v2954_v53 }
 0x8d3   :  { %v2956_v15 = vmax.f32 %v2955_v6, 1e-06 }
 0x8d5   :  { %v2957_v8 = vmin.f32 %v2956_v15, 0.999999 }
 0x8d7   :  { %v4097_v34 = vpop.eup %4096  ;;  %v2960_v11 = vsub.f32 1.0, %v2957_v8 }
 0x8d8   :  { %v4099_v36 = vpop.eup %4098 }
 0x8d9   :  { %v4101_v3 = vpop.eup %4100  ;;  %v3887_v38 = vpack.c.bf16 %v4099_v36, %v4097_v34 }
 0x8da   :  { %v4103_v40 = vpop.eup %4102 }
 0x8db   :  { %3888 = vmatprep.subr.bf16.mxu1 %v3887_v38  ;;  %v3891_v43 = vpack.c.bf16 %v4103_v40, %v4101_v3 }
 0x8dc   :  { %3890 = vmatpush3.bf16.msra.mxu1 %v3887_v38 }
 0x8dd   :  { %3892 = vmatprep.subr.bf16.mxu1 %v3891_v43 }
 0x8e0   :  { %3894 = vmatpush3.bf16.msra.mxu1 %v3891_v43 }
 0x8e3   :  { %3834 = vmatmul.mubr.msk.f32.vlgmr.msra.gmra.mrb[4].mxu1 %vm351_vm3, %v3697_v44 }
 0x9b6   :  { %v3835_v54 = vpop.f32.mrb[4].mxu1 }
 0x9b7   :  { %v2936_v56 = vadd.f32 %v3835_v54, %v2856_v32  ;;  %v2930_v57 = vpop.f32.mrb[5].mxu1 }
 0x9b8   :  { %v2931_v58 = vadd.f32 %v2930_v57, %v2851_v55 }
 0x9b9   :  { %v2982_v62 = vsel %vm476_vm1, %v2936_v56, -inf }
 0x9ba   :  { %v2983_v63 = vrot.slane %v2982_v62, 4  ;;  %v2940_v14 = vand.u32 2147483647, %v2931_v58  ;;  %v2939_v26 = vmax.f32 %v2931_v58, 0.0  ;;  %v2970_v36 = vrot.slane %v2931_v58, 4 }
 0x9bc   :  { %v2984_v0 = vmax.f32 %v2982_v62, %v2983_v63  ;;  %v2941_v31 = vsub.f32 0.0, %v2940_v14 }
 0x9be   :  { %v2985_v1 = vrot.slane %v2984_v0, 2  ;;  %v2942_v2 = vmul.f32 1.442695, %v2941_v31 }
 0x9c0   :  { %v2986_v61 = vmax.f32 %v2984_v0, %v2985_v1  ;;  %4104 = vpow2.f32 %v2942_v2  ;;  %v3722_v2 = vld [vmem:[%s5066_s3 + $0x60] sm:$0xff] }
 0x9c1   :  { %4106 = vlog2.f32 %v2960_v11  ;;  %3844 = vmatprep.mubr.msk.f32.mxu0 %vm351_vm3, %v3722_v2 }
 0x9c2   :  { %v2987_v10 = vrot.slane %v2986_v61, 1  ;;  %4108 = vlog2.f32 %v2957_v8 }
 0x9c4   :  { %v2988_v46 = vmax.f32 %v2986_v61, %v2987_v10 }
 0x9c6   :  { %v2989_v5 = vsub.f32 %v2936_v56, %v2988_v46 }
 0x9c8   :  { %v2990_v16 = vmul.f32 1.442695, %v2989_v5 }
 0x9ca   :  { %v4105_v17 = vpop.eup %4104  ;;  %4110 = vpow2.f32 %v2990_v16 }
 0x9cb   :  { %v2944_v21 = vadd.f32 1.0, %v4105_v17  ;;  %v4107_v12 = vpop.eup %4106 }
 0x9cc   :  { %v4109_v22 = vpop.eup %4108  ;;  %v4957_v45 = vmul.f32 0.6931472, %v4107_v12 }
 0x9cd   :  { %4112 = vlog2.f32 %v2944_v21  ;;  %v4960_v24 = vmul.f32 0.6931472, %v4109_v22 }
 0x9cf   :  { %v2963_v47 = vsub.f32 %v4960_v24, %v4957_v45 }
 0x9d1   :  { %v2967_v4 = vrot.slane %v2963_v47, %v4515_v59 }
 0x9d4   :  { %v4111_v23 = vpop.eup %4110 }
 0x9d5   :  { %v2992_v9 = vsel %vm476_vm1, %v4111_v23, 0.0 }
 0x9d6   :  { %v2993_v19 = vrot.slane %v2992_v9, 4 }
 0x9d7   :  { %v4113_v25 = vpop.eup %4112 }
 0x9d8   :  { %v2994_v18 = vadd.f32 %v2993_v19, %v2992_v9  ;;  %v2946_v27 = vmul.f32 0.6931472, %v4113_v25 }
 0x9da   :  { %v2995_v28 = vrot.slane %v2994_v18, 2  ;;  %v2947_v29 = vadd.f32 %v2946_v27, %v2939_v26 }
 0x9dc   :  { %v2996_v20 = vadd.f32 %v2995_v28, %v2994_v18  ;;  %v2948_v30 = vmul.f32 2.88539, %v2947_v29 }
 0x9de   :  { %v2968_v34 = vmul.f32 %v2967_v4, %v2948_v30  ;;  %v2997_v3 = vrot.slane %v2996_v20, 1 }
 0x9e0   :  { %v2972_v38 = vadd.f32 %v2970_v36, %v2968_v34  ;;  %v2998_v43 = vadd.f32 %v2997_v3, %v2996_v20 }
 0x9e2   :  { %v2973_v40 = vsub.f32 0.0, %v2972_v38 }
 0x9e4   :  { %v2974_v44 = vmul.f32 1.442695, %v2973_v40 }
 0x9e6   :  { %4114 = vpow2.f32 %v2974_v44 }
 0x9e7   :  { %4116 = vrcp.f32 %v2998_v43 }
 0x9f0   :  { %v4115_v48 = vpop.eup %4114 }
 0x9f1   :  { %v4117_v7 = vpop.eup %4116  ;;  %v2976_v49 = vadd.f32 1.0, %v4115_v48 }
 0x9f2   :  { %v3000_v50 = vmul.f32 %v4117_v7, %v4111_v23 }
 0x9f3   :  { %4118 = vrcp.f32 %v2976_v49 }
 0x9f4   :  { %v3001_v52 = vmul.f32 0.96, %v3000_v50 }
 0x9f6   :  { %v3002_v53 = vadd.f32 0.01, %v3001_v52 }
 0x9fd   :  { %v4119_v32 = vpop.eup %4118 }
 0x9fe   :  { %v2979_v54 = vmul.f32 %v4119_v32, %v2948_v30  ;;  %v2980_v55 = vsub.f32 1.0, %v4119_v32  ;;  %v3003_v56 = vmul.f32 %v4119_v32, %v3002_v53 }
 0xa00   :  { %v2981_v57 = vmul.f32 %v2980_v55, %v2979_v54  ;;  %v3004_v6 = vsel %vm476_vm1, %v3003_v56, 0.0 }
 0xa01   :  { %v3005_v58 = vrot.slane %v3004_v6, 4 }
 0xa02   :  { %v3011_v62 = vmul.f32 %v3002_v53, %v2981_v57 }
 0xa03   :  { %v3006_v63 = vadd.f32 %v3005_v58, %v3004_v6 }
 0xa04   :  { %v3012_v14 = vsel %vm476_vm1, %v3011_v62, 0.0 }
 0xa05   :  { %v3007_v15 = vrot.slane %v3006_v63, 2  ;;  %v3013_v0 = vrot.slane %v3012_v14, 4 }
 0xa07   :  { %v3008_v31 = vadd.f32 %v3007_v15, %v3006_v63  ;;  %v3014_v1 = vadd.f32 %v3013_v0, %v3012_v14 }
 0xa09   :  { %v3009_v8 = vrot.slane %v3008_v31, 1  ;;  %v3015_v61 = vrot.slane %v3014_v1, 2 }
 0xa0b   :  { %v3010_v10 = vadd.f32 %v3009_v8, %v3008_v31  ;;  %v3016_v11 = vadd.f32 %v3015_v61, %v3014_v1 }
 0xa0d   :  { %v3019_v46 = vmul.f32 6.2831855, %v3010_v10  ;;  %v3017_v5 = vrot.slane %v3016_v11, 1 }
 0xa0f   :  { %v3020_v16 = vadd.f32 %v3019_v46, %v4904_v42  ;;  %v3018_v17 = vadd.f32 %v3017_v5, %v3016_v11 }
 0xa11   :  { %v3021_v21 = vmul.f32 0.15915494, %v3020_v16  ;;  %v3025_v12 = vmax.f32 %v3018_v17, 1e-30 }
 0xa13   :  { %v3022_v22 = vfloor.f32 %v3021_v21  ;;  %4120 = vlog2.f32 %v3025_v12 }
 0xa15   :  { %v3023_v23 = vmul.f32 6.2831855, %v3022_v22 }
 0xa17   :  { %v4972_v9 = vsub.f32 %v3020_v16, %v3023_v23 }
 0xa19   :  { %v4976_v19 = vsub.f32 %v4972_v9, %v4288_v13  ;;  %3031 = vst [vmem:[#allocation2 + $0x6] sm:$0x1] %v4972_v9 }
 0xa1b   :  { %v3036_v25 = vand.u32 2139095040, %v4976_v19  ;;  %v3033_v20 = vand.u32 2147483647, %v4976_v19  ;;  %vm3035_vm6 = vcmp.lt.s32.totalorder %v4976_v19, 0 }
 0xa1d   :  { %v4121_v18 = vpop.eup %4120  ;;  %v3037_v26 = vshrl.u32 %v3036_v25, 23  ;;  %v3040_v36 = vand.u32 8388607, %v3033_v20  ;;  %vm3034_vm7 = vcmp.le.f32.partialorder %v3033_v20, 0.7853982 }
 0xa1e   :  { %v3027_v27 = vmul.f32 0.6931472, %v4121_v18 }
 0xa1f   :  { %v3702_v42 = vadd.s32 4294967169, %v3037_v26  ;;  %v3041_v50 = vor.u32 8388608, %v3040_v36 }
 0xa20   :  { %v3028_v47 = vsub.f32 %v3027_v27, %v4960_v24 }
 0xa21   :  { %v3043_v28 = vadd.s32 1, %v3702_v42 }
 0xa22   :  { %v3029_v29 = vsub.f32 %v3028_v47, %v4957_v45 }
 0xa23   :  { %vm3044_vm13 = vcmp.gt.s32.totalorder %v3043_v28, 0 }
 0xa24   :  { %v3045_v30 = vsel %vm3044_vm13, %v3043_v28, 0  ;;  %v4984_v13 = vadd.f32 %v3029_v29, %v4916_v60 }
 0xa25   :  { %v3047_v4 = vand.u32 31, %v3045_v30  ;;  %v3046_v3 = vshrl.u32 %v3045_v30, 5 }
 0xa27   :  { %v3048_v34 = vsub.s32 32, %v3047_v4  ;;  %v3050_v38 = vshll.u32 %v4201_v33, %v3047_v4  ;;  %v3053_v24 = vshll.u32 %v4202_v35, %v3047_v4  ;;  %v3056_v43 = vshll.u32 %v4203_v37, %v3047_v4 }
 0xa28   :  { %v3059_v60 = vshll.u32 %v4204_v39, %v3047_v4  ;;  %v3062_v7 = vshll.u32 %v4205_v41, %v3047_v4  ;;  %vm3065_vm14 = vcmp.lt.s32.totalorder %v3046_v3, 1  ;;  %vm3068_vm15 = vcmp.lt.s32.totalorder %v3046_v3, 4 }
 0xa29   :  { %v3051_v40 = vshrl.u32 %v4202_v35, %v3048_v34  ;;  %v3054_v45 = vshrl.u32 %v4203_v37, %v3048_v34  ;;  %v3057_v44 = vshrl.u32 %v4204_v39, %v3048_v34  ;;  %v3060_v48 = vshrl.u32 %v4205_v41, %v3048_v34 }
 0xa2a   :  { %v3063_v49 = vshrl.u32 %v4206_v51, %v3048_v34  ;;  %v3049_v57 = vshrl.u32 %v4201_v33, %v3048_v34  ;;  %vm3067_vm0 = vcmp.lt.s32.totalorder %v3046_v3, 3  ;;  %vm3066_vm2 = vcmp.lt.s32.totalorder %v3046_v3, 2  ;;  %v3253_v3 = vpop.permute.xlu1 %3252 }
 0xa2b   :  { %v3052_v52 = vor.u32 %v3051_v40, %v3050_v38  ;;  %v3055_v53 = vor.u32 %v3054_v45, %v3053_v24  ;;  %v3058_v32 = vor.u32 %v3057_v44, %v3056_v43  ;;  %v3061_v54 = vor.u32 %v3060_v48, %v3059_v60  ;;  %v3248_v38 = vpop.permute.xlu0 %3247 }
 0xa2c   :  { %v3064_v35 = vor.u32 %v3063_v49, %v3062_v7  ;;  %v3081_v51 = vshll.u32 %v3041_v50, 8 }
 0xa2d   :  { %v3070_v55 = vsel %vm3068_vm15, %v3058_v32, 2102212464  ;;  %v3073_v37 = vsel %vm3065_vm14, %v3052_v52, %v3055_v53  ;;  %v3077_v56 = vsel %vm3065_vm14, %v3055_v53, %v3058_v32  ;;  %v3074_v39 = vsel %vm3068_vm15, %v3061_v54, 920167782 }
 0xa2e   :  { %v3078_v6 = vsel %vm3068_vm15, %v3064_v35, 1326507024  ;;  %v3075_v41 = vsel %vm3067_vm0, %v3058_v32, %v3074_v39  ;;  %v3069_v62 = vsel %vm3065_vm14, %v3049_v57, %v3052_v52  ;;  %v3071_v63 = vsel %vm3067_vm0, %v3055_v53, %v3070_v55  ;;  %v3286_v60 = vpop.permute.xlu1 %3285 }
 0xa2f   :  { %v3079_v58 = vsel %vm3067_vm0, %v3061_v54, %v3078_v6  ;;  %v3076_v14 = vsel %vm3066_vm2, %v3073_v37, %v3075_v41  ;;  %v3072_v8 = vsel %vm3066_vm2, %v3069_v62, %v3071_v63  ;;  %v3281_v48 = vpop.permute.xlu0 %3280  ;;  %vm3125_vm14 = vweird.f32 %v4976_v19 }
 0xa30   :  { %v3080_v15 = vsel %vm3066_vm2, %v3077_v56, %v3079_v58  ;;  %v5002_v1 = vmul.u32.u64.low %v3081_v51, %v3076_v14  ;;  %v5003_v2 = vmul.u32.u64.high %v3081_v51, %v3076_v14, %v5002_v1  ;;  %v3088_v61 = vmul.u32 %v3081_v51, %v3072_v8 }
 0xa31   :  { %v4999_v0 = vmul.u32.u64.low %v3081_v51, %v3080_v15  ;;  %v5000_v31 = vmul.u32.u64.high %v3081_v51, %v3080_v15, %v4999_v0 }
 0xa32   :  { %v3091_v33 = vadd.s32 1, %v5003_v2  ;;  %v3263_v52 = vpop.permute.xlu1 %3262 }
 0xa33   :  { %vm3090_vm4 = vc.u32 %v5000_v31, %v5002_v1  ;;  %v3089_v18 = vadd.s32 %v5002_v1, %v5000_v31  ;;  %v3258_v53 = vpop.permute.xlu0 %3257 }
 0xa34   :  { %v3092_v10 = vsel %vm3090_vm4, %v3091_v33, %v5003_v2 }
 0xa35   :  { %v3093_v11 = vadd.s32 %v3092_v10, %v3088_v61 }
 0xa36   :  { %v3296_v37 = vpop.permute.xlu1 %3295 }
 0xa37   :  { %v3094_v46 = vadd.s32 536870912, %v3093_v11  ;;  %v3291_v56 = vpop.permute.xlu0 %3290 }
 0xa39   :  { %v3095_v5 = vshrl.u32 %v3094_v46, 30 }
 0xa3a   :  { %v3323_v15 = vpop.permute.xlu1 %3322 }
 0xa3b   :  { %v3096_v16 = vshll.u32 %v3095_v5, 30  ;;  %v3119_v40 = vsub.s32 4, %v3095_v5  ;;  %v3318_v0 = vpop.permute.xlu0 %3317 }
 0xa3d   :  { %v3097_v17 = vsub.s32 %v3093_v11, %v3096_v16  ;;  %v3120_v44 = vsel %vm3035_vm6, %v3119_v40, %v3095_v5 }
 0xa3e   :  { %v3122_v49 = vsel %vm3034_vm7, 0, %v3120_v44 }
 0xa3f   :  { %v3099_v21 = vsub.s32 0, %v3097_v17  ;;  %v3229_v50 = vadd.s32 3, %v3122_v49  ;;  %v3126_v32 = vand.u32 3, %v3122_v49 }
 0xa41   :  { %v3703_v12 = vmin.u32 %v3099_v21, %v3097_v17  ;;  %v3230_v54 = vand.u32 3, %v3229_v50  ;;  %vm3131_vm8 = vcmp.eq.s32.totalorder %v3126_v32, 2  ;;  %vm3128_vm10 = vcmp.eq.s32.totalorder %v3126_v32, 0 }
 0xa42   :  { %vm3127_vm12 = vcmp.lt.s32.totalorder %v3126_v32, 2 }
 0xa43   :  { %v3101_v22 = vclz %v3703_v12  ;;  %vm3235_vm9 = vcmp.eq.s32.totalorder %v3230_v54, 2  ;;  %vm3232_vm11 = vcmp.eq.s32.totalorder %v3230_v54, 0  ;;  %vm3231_vm13 = vcmp.lt.s32.totalorder %v3230_v54, 2  ;;  %v3333_v12 = vpop.permute.xlu1 %3332 }
 0xa45   :  { %v3704_v23 = vadd.s32 4294967294, %v3101_v22  ;;  %v3328_v22 = vpop.permute.xlu0 %3327 }
 0xa47   :  { %vm3705_vm5 = vcmp.lt.s32.totalorder %v3704_v23, 0 }
 0xa48   :  { %v3104_v25 = vsel %vm3705_vm5, 0, %v3704_v23 }
 0xa49   :  { %v3105_v26 = vsub.s32 32, %v3104_v25  ;;  %v3109_v27 = vsub.s32 4294967266, %v3104_v25  ;;  %v3106_v42 = vshll.u32 %v3097_v17, %v3104_v25  ;;  %v3352_v44 = vpop.permute.xlu0 %3351 }
 0xa4b   :  { %v3107_v47 = vshrl.u32 %v3089_v18, %v3105_v26  ;;  %v3110_v28 = vadd.s32 127, %v3109_v27 }
 0xa4d   :  { %v3108_v29 = vor.u32 %v3107_v47, %v3106_v42  ;;  %v3111_v30 = vshll.u32 %v3110_v28, 23 }
 0xa4f   :  { %v3112_v4 = vor.u32 4788187, %v3111_v30  ;;  %v3115_v36 = vcvt.s32.f32 %v3108_v29 }
 0xa51   :  { %v3113_v34 = vand.u32 2147483647, %v3112_v4  ;;  %v3723_v4 = vld [vmem:[%s5066_s3 + $0x68] sm:$0xf] }
 0xa53   :  { %v3116_v24 = vmul.f32 %v3115_v36, %v3113_v34  ;;  %v3450_v34 = vld [vmem:[%s5063_s0 + $0x7] sm:$0x1]  ;;  %s4207_s0 = smov [#allocation2]  }
 0xa54   :  { %v3451_v36 = vsub.f32 %v3450_v34, %v4972_v9  ;;  %s3540_s3 = sshll.u32 %s4207_s0, 4  ;;  %s3541_s3 = int_to_ptr.vmem [resolvable:$true] %s3540_s3 }
 0xa55   :  { %v3117_v45 = vxor.u32 2147483648, %v3116_v24  ;;  %s4152_s26 = scalar_lea.vmem %s3541_s3, 128  ;;  %p4157_p1 = scmp.lt.s32.totalorder %s3541_s3, %s3541_s3 }
 0xa56   :  { %p4153_p0 = scmp.ne.s32.totalorder %s3541_s3, %s4152_s26  ;;  %p4158_p2 = scmp.lt.s32.totalorder %s4152_s26, %s4152_s26 }
 0xa57   :  { %v3118_v43 = vsel %vm3035_vm6, %v3117_v45, %v3116_v24  ;;  %v3357_v45 = vpop.permute.xlu1 %3356 }
 0xa58   :  { %v3121_v7 = vsel %vm3034_vm7, %v4976_v19, %v3118_v43  ;;  %p4159_p3 = por %p4158_p2, %p4157_p1 }
 0xa59   :  { %4122 = vcosq.f32 %v3121_v7 }
 0xa5a   :  { %4124 = vsinq.f32 %v3121_v7  ;;  %p4160_p4 = pnand %p4159_p3, %p4153_p0 }
 0xa63   :  { %v4123_v35 = vpop.eup %4122 }
 0xa64   :  { %v4125_v55 = vpop.eup %4124  ;;  %v3132_v57 = vxor.u32 2147483648, %v4123_v35 }
 0xa65   :  { %v3129_v20 = vxor.u32 2147483648, %v4125_v55 }
 0xa66   :  { %v3133_v39 = vsel %vm3131_vm8, %v3132_v57, %v4125_v55  ;;  %v3237_v6 = vsel %vm3235_vm9, %v3132_v57, %v4125_v55 }
 0xa67   :  { %v3130_v41 = vsel %vm3128_vm10, %v4123_v35, %v3129_v20  ;;  %v3234_v58 = vsel %vm3232_vm11, %v4123_v35, %v3129_v20 }
 0xa68   :  { %v3134_v51 = vsel %vm3127_vm12, %v3130_v41, %v3133_v39  ;;  %v3238_v62 = vsel %vm3231_vm13, %v3234_v58, %v3237_v6 }
 0xa69   :  { %v3135_v63 = vsel %vm3125_vm14, nan, %v3134_v51  ;;  %v3239_v14 = vsel %vm3125_vm14, nan, %v3238_v62 }
 0xa6a   :  { %v3268_v31 = vrot.slane %v3135_v63, %v4515_v59  ;;  %v3301_v1 = vrot.slane %v3239_v14, %v4515_v59 }
 0xa6c   :  { %v3269_v2 = vmul.f32 %v3268_v31, %v3248_v38  ;;  %v3270_v8 = vmul.f32 %v3268_v31, %v3253_v3  ;;  %v3302_v33 = vmul.f32 %v3301_v1, %v3281_v48  ;;  %v3303_v61 = vmul.f32 %v3301_v1, %v3286_v60 }
 0xa6d   :  { %v3271_v10 = vmul.f32 %v3268_v31, %v3258_v53  ;;  %v3272_v11 = vmul.f32 %v3268_v31, %v3263_v52  ;;  %v3304_v46 = vmul.f32 %v3301_v1, %v3291_v56  ;;  %v3305_v5 = vmul.f32 %v3301_v1, %v3296_v37 }
 0xa6e   :  { %v3306_v16 = vadd.f32 %v3302_v33, %v3269_v2  ;;  %v3307_v19 = vadd.f32 %v3303_v61, %v3270_v8  ;;  %v3452_v3 = vmul.f32 0.15915494, %v3451_v36 }
 0xa6f   :  { %v3308_v17 = vadd.f32 %v3304_v46, %v3271_v10  ;;  %v3309_v21 = vadd.f32 %v3305_v5, %v3272_v11 }
 0xa70   :  { %v3335_v23 = vadd.f32 %v3318_v0, %v3306_v16  ;;  %v3336_v25 = vadd.f32 %v3323_v15, %v3307_v19  ;;  %v3453_v38 = vfloor.f32 %v3452_v3 }
 0xa71   :  { %v3337_v18 = vadd.f32 %v3328_v22, %v3308_v17  ;;  %v3338_v26 = vadd.f32 %v3333_v12, %v3309_v21 }
 0xa72   :  { %4126 = vtanh.f32 %v3335_v23  ;;  %v3454_v24 = vmul.f32 6.2831855, %v3453_v38 }
 0xa73   :  { %4128 = vtanh.f32 %v3336_v25 }
 0xa74   :  { %4130 = vtanh.f32 %v3337_v18  ;;  %v3455_v40 = vsub.f32 %v3451_v36, %v3454_v24 }
 0xa75   :  { %4132 = vtanh.f32 %v3338_v26 }
 0xa76   :  { %v3456_v7 = vmul.f32 0.15915494, %v3455_v40 }
 0xa78   :  { %v3457_v32 = vmax.f32 %v3456_v7, 1e-06 }
 0xa7a   :  { %v3458_v56 = vmin.f32 %v3457_v32, 0.999999 }
 0xa7c   :  { %v4127_v27 = vpop.eup %4126  ;;  %v3461_v39 = vsub.f32 1.0, %v3458_v56 }
 0xa7d   :  { %v4129_v42 = vpop.eup %4128 }
 0xa7e   :  { %v4131_v47 = vpop.eup %4130  ;;  %v3895_v28 = vpack.c.bf16 %v4129_v42, %v4127_v27 }
 0xa7f   :  { %v4133_v29 = vpop.eup %4132 }
 0xa80   :  { %3896 = vmatprep.subr.bf16.mxu0 %v3895_v28  ;;  %v3899_v30 = vpack.c.bf16 %v4133_v29, %v4131_v47 }
 0xa81   :  { %3898 = vmatpush3.bf16.msra.mxu0 %v3895_v28 }
 0xa82   :  { %3900 = vmatprep.subr.bf16.mxu0 %v3899_v30 }
 0xa85   :  { %3902 = vmatpush3.bf16.msra.mxu0 %v3899_v30 }
 0xa88   :  { %3845 = vmatmul.mubr.msk.f32.vlgmr.msra.gmra.mrb[6].mxu0 %vm351_vm3, %v3723_v4 }
 0xb5b   :  { %v3846_v43 = vpop.f32.mrb[6].mxu0 }
 0xb5c   :  { %v3437_v60 = vadd.f32 %v3846_v43, %v3357_v45  ;;  %v3431_v48 = vpop.f32.mrb[7].mxu0 }
 0xb5d   :  { %v3432_v49 = vadd.f32 %v3431_v48, %v3352_v44 }
 0xb5e   :  { %v3483_v50 = vsel %vm476_vm1, %v3437_v60, -inf }
 0xb5f   :  { %v3484_v52 = vrot.slane %v3483_v50, 4  ;;  %v3441_v53 = vand.u32 2147483647, %v3432_v49  ;;  %v3440_v61 = vmax.f32 %v3432_v49, 0.0  ;;  %v3471_v12 = vrot.slane %v3432_v49, 4 }
 0xb61   :  { %v3485_v54 = vmax.f32 %v3483_v50, %v3484_v52  ;;  %v3442_v35 = vsub.f32 0.0, %v3441_v53 }
 0xb63   :  { %v3486_v55 = vrot.slane %v3485_v54, 2  ;;  %v3443_v37 = vmul.f32 1.442695, %v3442_v35 }
 0xb65   :  { %v3487_v57 = vmax.f32 %v3485_v54, %v3486_v55  ;;  %4134 = vpow2.f32 %v3443_v37 }
 0xb66   :  { %4136 = vlog2.f32 %v3461_v39 }
 0xb67   :  { %v3488_v20 = vrot.slane %v3487_v57, 1  ;;  %4138 = vlog2.f32 %v3458_v56 }
 0xb69   :  { %v3489_v6 = vmax.f32 %v3487_v57, %v3488_v20 }
 0xb6b   :  { %v3490_v41 = vsub.f32 %v3437_v60, %v3489_v6 }
 0xb6d   :  { %v3491_v58 = vmul.f32 1.442695, %v3490_v41 }
 0xb6f   :  { %v4135_v51 = vpop.eup %4134  ;;  %4140 = vpow2.f32 %v3491_v58 }
 0xb70   :  { %v3445_v62 = vadd.f32 1.0, %v4135_v51  ;;  %v4137_v63 = vpop.eup %4136 }
 0xb71   :  { %v4139_v14 = vpop.eup %4138  ;;  %v5025_v0 = vmul.f32 0.6931472, %v4137_v63 }
 0xb72   :  { %4142 = vlog2.f32 %v3445_v62  ;;  %v5028_v2 = vmul.f32 0.6931472, %v4139_v14 }
 0xb74   :  { %v3464_v11 = vsub.f32 %v5028_v2, %v5025_v0 }
 0xb76   :  { %v3468_v17 = vrot.slane %v3464_v11, %v4515_v59 }
 0xb79   :  { %v4141_v15 = vpop.eup %4140 }
 0xb7a   :  { %v3493_v31 = vsel %vm476_vm1, %v4141_v15, 0.0 }
 0xb7b   :  { %v3494_v1 = vrot.slane %v3493_v31, 4 }
 0xb7c   :  { %v4143_v8 = vpop.eup %4142 }
 0xb7d   :  { %v3495_v33 = vadd.f32 %v3494_v1, %v3493_v31  ;;  %v3447_v10 = vmul.f32 0.6931472, %v4143_v8 }
 0xb7f   :  { %v3496_v46 = vrot.slane %v3495_v33, 2  ;;  %v3448_v5 = vadd.f32 %v3447_v10, %v3440_v61 }
 0xb81   :  { %v3497_v16 = vadd.f32 %v3496_v46, %v3495_v33  ;;  %v3449_v19 = vmul.f32 2.88539, %v3448_v5 }
 0xb83   :  { %v3469_v21 = vmul.f32 %v3468_v17, %v3449_v19  ;;  %v3498_v22 = vrot.slane %v3497_v16, 1 }
 0xb85   :  { %v3473_v23 = vadd.f32 %v3471_v12, %v3469_v21  ;;  %v3499_v18 = vadd.f32 %v3498_v22, %v3497_v16 }
 0xb87   :  { %v3474_v25 = vsub.f32 0.0, %v3473_v23 }
 0xb89   :  { %v3475_v26 = vmul.f32 1.442695, %v3474_v25 }
 0xb8b   :  { %4144 = vpow2.f32 %v3475_v26 }
 0xb8c   :  { %4146 = vrcp.f32 %v3499_v18 }
 0xb95   :  { %v4145_v27 = vpop.eup %4144 }
 0xb96   :  { %v4147_v42 = vpop.eup %4146  ;;  %v3477_v47 = vadd.f32 1.0, %v4145_v27 }
 0xb97   :  { %v3501_v28 = vmul.f32 %v4147_v42, %v4141_v15 }
 0xb98   :  { %4148 = vrcp.f32 %v3477_v47 }
 0xb99   :  { %v3502_v29 = vmul.f32 0.96, %v3501_v28 }
 0xb9b   :  { %v3503_v30 = vadd.f32 0.01, %v3502_v29 }
 0xba2   :  { %v4149_v4 = vpop.eup %4148 }
 0xba3   :  { %v3480_v34 = vmul.f32 %v4149_v4, %v3449_v19  ;;  %v3481_v36 = vsub.f32 1.0, %v4149_v4  ;;  %v3504_v59 = vmul.f32 %v4149_v4, %v3503_v30 }
 0xba5   :  { %v3482_v3 = vmul.f32 %v3481_v36, %v3480_v34  ;;  %v3505_v38 = vsel %vm476_vm1, %v3504_v59, 0.0 }
 0xba6   :  { %v3506_v24 = vrot.slane %v3505_v38, 4 }
 0xba7   :  { %v3512_v40 = vmul.f32 %v3503_v30, %v3482_v3 }
 0xba8   :  { %v3507_v45 = vadd.f32 %v3506_v24, %v3505_v38 }
 0xba9   :  { %v3513_v43 = vsel %vm476_vm1, %v3512_v40, 0.0 }
 0xbaa   :  { %v3508_v44 = vrot.slane %v3507_v45, 2  ;;  %v3514_v60 = vrot.slane %v3513_v43, 4 }
 0xbac   :  { %v3509_v48 = vadd.f32 %v3508_v44, %v3507_v45  ;;  %v3515_v7 = vadd.f32 %v3514_v60, %v3513_v43 }
 0xbae   :  { %v3510_v49 = vrot.slane %v3509_v48, 1  ;;  %v3516_v50 = vrot.slane %v3515_v7, 2 }
 0xbb0   :  { %v3511_v52 = vadd.f32 %v3510_v49, %v3509_v48  ;;  %v3517_v53 = vadd.f32 %v3516_v50, %v3515_v7 }
 0xbb2   :  { %v3520_v32 = vmul.f32 6.2831855, %v3511_v52  ;;  %v3518_v54 = vrot.slane %v3517_v53, 1 }
 0xbb4   :  { %v3521_v35 = vadd.f32 %v3520_v32, %v4972_v9  ;;  %v3519_v55 = vadd.f32 %v3518_v54, %v3517_v53 }
 0xbb6   :  { %v3522_v37 = vmul.f32 0.15915494, %v3521_v35  ;;  %v3526_v56 = vmax.f32 %v3519_v55, 1e-30 }
 0xbb8   :  { %v3523_v57 = vfloor.f32 %v3522_v37  ;;  %4150 = vlog2.f32 %v3526_v56 }
 0xbba   :  { %v3524_v20 = vmul.f32 6.2831855, %v3523_v57 }
 0xbbc   :  { %v3525_v39 = vsub.f32 %v3521_v35, %v3524_v20 }
 0xbbe   :  { %3532 = vst [vmem:[#allocation2 + $0x7] sm:$0x1] %v3525_v39 }
 0xbbf   :  { %4163 = shalt.err (!%p4160_p4)
}
 0xbc0   :  { %s4164_s29 = scalar_lea.hbm %s5069_s6, 128 }
 0xbc1   :  { %p4165_p5 = scmp.ne.s32.totalorder %s5069_s6, %s4164_s29  ;;  %p4168_p6 = scmp.lt.u32.totalorder %s4164_s29, %s5069_s6 }
 0xbc3   :  { %p4170_p7 = pnand %p4168_p6, %p4165_p5 }
 0xbc5   :  { %4173 = shalt.err (!%p4170_p7)
}
 0xbc6   :  { %3543 = dma.vmem_to_hbm [thread:$0]  %s3541_s3, 128, %s5069_s6, [#allocation3]   ;;  %v4151_v9 = vpop.eup %4150 }
 0xbc7   :  { %v3528_v6 = vmul.f32 0.6931472, %v4151_v9  ;;  %s4208_s12 = smov [#allocation4]  }
 0xbc8   :  { %s3550_s13 = sshll.u32 %s4208_s12, 4  ;;  %s3551_s13 = int_to_ptr.vmem [resolvable:$true] %s3550_s13 }
 0xbc9   :  { %v3529_v41 = vsub.f32 %v3528_v6, %v5028_v2  ;;  %s4174_s2 = scalar_lea.vmem %s3551_s13, 16  ;;  %s4178_s14 = scalar_lea.vmem %s3551_s13, 32 }
 0xbca   :  { %p4175_p8 = scmp.ne.s32.totalorder %s3551_s13, %s4174_s2  ;;  %p4179_p9 = scmp.lt.s32.totalorder %s3551_s13, %s3551_s13 }
 0xbcb   :  { %v3530_v58 = vsub.f32 %v3529_v41, %v5025_v0  ;;  %p4180_p10 = scmp.lt.s32.totalorder %s4178_s14, %s4174_s2 }
 0xbcd   :  { %v3531_v51 = vadd.f32 %v3530_v58, %v4984_v13  ;;  %p4181_p11 = por %p4180_p10, %p4179_p9 }
 0xbcf   :  { %3533 = vst [vmem:[#allocation4] sm:$0x1] %v3531_v51  ;;  %p4182_p12 = pnand %p4181_p11, %p4175_p8 }
 0xbd1   :  { %4185 = shalt.err (!%p4182_p12)
}
 0xbd2   :  { %s4186_s16 = scalar_lea.hbm %s5070_s7, 16 }
 0xbd3   :  { %p4187_p13 = scmp.ne.s32.totalorder %s5070_s7, %s4186_s16  ;;  %p4190_p0 = scmp.lt.u32.totalorder %s4186_s16, %s5070_s7 }
 0xbd5   :  { %p4192_p1 = pnand %p4190_p0, %p4187_p13 }
 0xbd7   :  { %4195 = shalt.err (!%p4192_p1)
}
 0xbd8   :  { %3553 = dma.vmem_to_hbm [thread:$0]  %s3551_s13, 16, %s5070_s7, [#allocation5]  }
 0xbd9   :  { %4196 = dma.done.wait [#allocation3], 128  }
 0xbda   :  { %4197 = vsyncadd [#allocation3], 4294967168 }
 0xbdb   :  { %4198 = dma.done.wait [#allocation5], 16  }
 0xbdc   :  { %4199 = vsyncadd [#allocation5], 4294967280 }
 0xbdd   :  { %3560 = vsyncpa [#allocation3], 1 }
 0xbde   :  { %3561 = vsyncpa [#allocation5], 1 }

</bundles_post_ra>
